<compile_context>
chip_gen: v7x
topology: tpu7x:2x2x1
jax: 0.10.0
libtpu: 0.0.40
codegen_flags: <defaults>
</compile_context>

<pallas_src>
import numpy as np
import jax
import jax.numpy as jnp
from jax.experimental import pallas as pl
from jax.experimental.pallas import tpu as pltpu


def make_masks(H, W, K):
    """(K*K, 1, H*W) f32 validity masks; tap order (dh, dw) row-major.

    mask[t, 0, h*W + w] == 1.0 iff the source pixel (h+dh, w+dw) of tap t lies
    inside the image (i.e. the zero-padding region and lane-wraparound rows are
    zeroed after the lane shift).
    """
    p = K // 2
    hh = np.arange(H)[:, None]
    ww = np.arange(W)[None, :]
    rows = []
    for dh in range(-p, p + 1):
        for dw in range(-p, p + 1):
            valid = ((hh + dh >= 0) & (hh + dh < H) &
                     (ww + dw >= 0) & (ww + dw < W))
            rows.append(valid.astype(np.float32).reshape(1, H * W))
    return jnp.asarray(np.stack(rows, axis=0))


def make_fused_kernel(H, W):
    """Fused conv1(5x5,1->64)+tanh, conv2(3x3,64->32)+tanh, conv3(3x3,32->c3)+sigmoid.

    One grid step = one batch element.  All activations live in (C, M) form
    (M = H*W on lanes); intermediates never touch HBM.
    """
    M = H * W
    taps5 = [(dh, dw) for dh in range(-2, 3) for dw in range(-2, 3)]
    taps3 = [(dh, dw) for dh in range(-1, 2) for dw in range(-1, 2)]

    def lane_shift(a, off):
        # out[:, m] = a[:, (m + off) % M]; wrapped / out-of-image entries are
        # zeroed by the caller's mask.  Explicit 2-slice lane concat keeps the
        # rotation direction unambiguous and lowers on the XLU lane path.
        off = off % M
        if off == 0:
            return a
        return jnp.concatenate([a[:, off:], a[:, :off]], axis=1)

    def kernel(x_ref, w1_ref, b1_ref, w2_ref, b2_ref, w3_ref, b3_ref,
               m5_ref, m3_ref, o_ref):

        def tap(a, dh, dw, m_ref, t):
            s = lane_shift(a, dh * W + dw)
            if dh == 0 and dw == 0:          # center tap: no shift, all valid
                return s
            return s * m_ref[t]              # (1, M) mask broadcast over channels

        # -------- conv1: 5x5, 1 -> 64, pad 2, tanh (one MXU matmul, K=25) ----
        xT = x_ref[0]                                             # (1, M)
        col1 = jnp.concatenate(
            [tap(xT, dh, dw, m5_ref, t) for t, (dh, dw) in enumerate(taps5)],
            axis=0)                                               # (25, M)
        a1 = jnp.tanh(
            jnp.dot(w1_ref[...], col1, preferred_element_type=jnp.float32)
            + b1_ref[...])                                        # (64, M)

        # -------- conv2: 3x3, 64 -> 32, pad 1, tanh (per-tap MXU, K=64) ------
        acc = None
        for t, (dh, dw) in enumerate(taps3):
            c = jnp.dot(w2_ref[t], tap(a1, dh, dw, m3_ref, t),
                        preferred_element_type=jnp.float32)       # (32, M)
            acc = c if acc is None else acc + c
        a2 = jnp.tanh(acc + b2_ref[...])                          # (32, M)

        # -------- conv3: 3x3, 32 -> c3, pad 1, sigmoid fused (per-tap, K=32) -
        acc = None
        for t, (dh, dw) in enumerate(taps3):
            c = jnp.dot(w3_ref[t], tap(a2, dh, dw, m3_ref, t),
                        preferred_element_type=jnp.float32)       # (c3, M)
            acc = c if acc is None else acc + c
        # Lane-dense (c3, 256) store; sigmoid commutes with the pixel shuffle.
        o_ref[0] = jax.nn.sigmoid(acc + b3_ref[...])

    return kernel


def prepare_params(params, H, W):
    """Host-side (free) weight relayout for the transposed kernel.

    Weights arrive HWIO (kh, kw, cin, cout); per-tap matmul form needs
    (cout, cin) per tap, conv1 (cin==1) needs (cout, 25).
    """
    (w1, b1), (w2, b2), (w3, b3) = params
    c1, c2, c3 = w1.shape[-1], w2.shape[-1], w3.shape[-1]
    w1t = jnp.transpose(w1.reshape(5 * 5, c1), (1, 0))            # (64, 25)
    w2t = jnp.transpose(w2.reshape(3 * 3, c1, c2), (0, 2, 1))     # (9, 32, 64)
    w3t = jnp.transpose(w3.reshape(3 * 3, c2, c3), (0, 2, 1))     # (9, c3, 32)
    return (w1t, b1.reshape(c1, 1),
            w2t, b2.reshape(c2, 1),
            w3t, b3.reshape(c3, 1),
            make_masks(H, W, 5), make_masks(H, W, 3))


def net_forward(x_nchw, prepped, upscale_factor):
    w1t, b1c, w2t, b2c, w3t, b3c, m5, m3 = prepped
    N, _, H, W = x_nchw.shape          # channel dim is 1
    r = upscale_factor
    M = H * W
    c3 = w3t.shape[1]                  # r*r

    # NCHW (C==1) -> (N, 1, H*W): metadata-only reshape, lane-dense DMA block.
    x_flat = x_nchw.reshape(N, 1, M)

    kernel = make_fused_kernel(H, W)
    y = pl.pallas_call(
        kernel,
        out_shape=jax.ShapeDtypeStruct((N, c3, M), jnp.float32),
        grid_spec=pltpu.PrefetchScalarGridSpec(
            num_scalar_prefetch=0,
            grid=(N,),
            in_specs=[
                pl.BlockSpec((1, 1, M), lambda n: (n, 0, 0)),
                pl.BlockSpec(w1t.shape, lambda n: (0, 0)),
                pl.BlockSpec(b1c.shape, lambda n: (0, 0)),
                pl.BlockSpec(w2t.shape, lambda n: (0, 0, 0)),
                pl.BlockSpec(b2c.shape, lambda n: (0, 0)),
                pl.BlockSpec(w3t.shape, lambda n: (0, 0, 0)),
                pl.BlockSpec(b3c.shape, lambda n: (0, 0)),
                pl.BlockSpec(m5.shape, lambda n: (0, 0, 0)),
                pl.BlockSpec(m3.shape, lambda n: (0, 0, 0)),
            ],
            out_specs=pl.BlockSpec((1, c3, M), lambda n: (n, 0, 0)),
        ),
        compiler_params=pltpu.CompilerParams(
            dimension_semantics=("parallel",)),
    )(x_flat, w1t, b1c, w2t, b2c, w3t, b3c, m5, m3)

    # y is exactly the NCHW conv3 output (N, r*r, H, W) with sigmoid already
    # applied (commutes with the pure permutation below).  PixelShuffle(r):
    y = y.reshape(N, r, r, H, W)
    y = jnp.transpose(y, (0, 3, 1, 4, 2))          # (N, H, r, W, r)
    return y.reshape(N, 1, H * r, W * r)


def make_params(key, upscale_factor):
    """Deterministic PyTorch-style (uniform +/- 1/sqrt(fan_in)) init, HWIO."""
    def conv_init(kw_key, kb_key, kh, kw, cin, cout):
        fan_in = cin * kh * kw
        bound = 1.0 / float(fan_in) ** 0.5
        w = jax.random.uniform(kw_key, (kh, kw, cin, cout), jnp.float32,
                               -bound, bound)
        b = jax.random.uniform(kb_key, (cout,), jnp.float32, -bound, bound)
        return w, b

    keys = jax.random.split(key, 6)
    w1, b1 = conv_init(keys[0], keys[1], 5, 5, 1, 64)
    w2, b2 = conv_init(keys[2], keys[3], 3, 3, 64, 32)
    w3, b3 = conv_init(keys[4], keys[5], 3, 3, 32, upscale_factor ** 2)
    return (w1, b1), (w2, b2), (w3, b3)


def reference_forward(x_nchw, params, r):
    """Pure-XLA reference (matches the PyTorch module) for a correctness check."""
    (w1, b1), (w2, b2), (w3, b3) = params

    def conv(x, w, b, pad):
        y = jax.lax.conv_general_dilated(
            x, w, window_strides=(1, 1), padding=[(pad, pad), (pad, pad)],
            dimension_numbers=("NCHW", "HWIO", "NCHW"),
            precision=jax.lax.Precision.HIGHEST)
        return y + b.reshape(1, -1, 1, 1)

    x = jnp.tanh(conv(x_nchw, w1, b1, 2))
    x = jnp.tanh(conv(x, w2, b2, 1))
    x = conv(x, w3, b3, 1)                       # (N, r*r, H, W)
    N, _, H, W = x.shape
    x = x.reshape(N, r, r, H, W)
    x = jnp.transpose(x, (0, 3, 1, 4, 2))        # (N, H, r, W, r)
    x = x.reshape(N, 1, H * r, W * r)
    return jax.nn.sigmoid(x)


if __name__ == "__main__":
    upscale_factor = 2
    N, H, W = 2, 16, 16

    key = jax.random.PRNGKey(0)
    k_x, k_p = jax.random.split(key)
    x = jax.random.normal(k_x, (N, 1, H, W), jnp.float32)   # NCHW like PyTorch
    params = make_params(k_p, upscale_factor)
    prepped = prepare_params(params, H, W)

    fwd = jax.jit(lambda inp: net_forward(inp, prepped, upscale_factor))
    y = fwd(x)
    jax.block_until_ready(y)

    assert y.shape == (N, 1, H * upscale_factor, W * upscale_factor), y.shape
    y_ref = reference_forward(x, params, upscale_factor)
    max_err = float(jnp.max(jnp.abs(y - y_ref)))
    assert max_err < 5e-3, f"max abs err vs reference: {max_err}"
    print("KERNEL_OK")
</pallas_src>

<mosaic_0001>
module attributes {stable_mosaic.version = 11 : i64} {
  func.func @kernel(%arg0: i32, %arg1: memref<1x1x256xf32, #tpu.memory_space<vmem>>, %arg2: memref<64x25xf32, #tpu.memory_space<vmem>>, %arg3: memref<64x1xf32, #tpu.memory_space<vmem>>, %arg4: memref<9x32x64xf32, #tpu.memory_space<vmem>>, %arg5: memref<32x1xf32, #tpu.memory_space<vmem>>, %arg6: memref<9x4x32xf32, #tpu.memory_space<vmem>>, %arg7: memref<4x1xf32, #tpu.memory_space<vmem>>, %arg8: memref<25x1x256xf32, #tpu.memory_space<vmem>>, %arg9: memref<9x1x256xf32, #tpu.memory_space<vmem>>, %arg10: memref<1x4x256xf32, #tpu.memory_space<vmem>>) attributes {dimension_semantics = [#tpu.dimension_semantics<parallel>], iteration_bounds = array<i64: 2>, scalar_prefetch = 0 : i64, scratch_operands = 0 : i64, tpu.core_type = #tpu.core_type<tc>, window_params = [{transform_indices = @transform_0, window_bounds = array<i64: 1, 1, 256>}, {pipeline_mode = #tpu.pipeline_mode<synchronous>, transform_indices = @transform_1, window_bounds = array<i64: 64, 25>}, {pipeline_mode = #tpu.pipeline_mode<synchronous>, transform_indices = @transform_2, window_bounds = array<i64: 64, 1>}, {pipeline_mode = #tpu.pipeline_mode<synchronous>, transform_indices = @transform_3, window_bounds = array<i64: 9, 32, 64>}, {pipeline_mode = #tpu.pipeline_mode<synchronous>, transform_indices = @transform_4, window_bounds = array<i64: 32, 1>}, {pipeline_mode = #tpu.pipeline_mode<synchronous>, transform_indices = @transform_5, window_bounds = array<i64: 9, 4, 32>}, {pipeline_mode = #tpu.pipeline_mode<synchronous>, transform_indices = @transform_6, window_bounds = array<i64: 4, 1>}, {pipeline_mode = #tpu.pipeline_mode<synchronous>, transform_indices = @transform_7, window_bounds = array<i64: 25, 1, 256>}, {pipeline_mode = #tpu.pipeline_mode<synchronous>, transform_indices = @transform_8, window_bounds = array<i64: 9, 1, 256>}, {transform_indices = @transform_9, window_bounds = array<i64: 1, 4, 256>}]} {
    %c0 = arith.constant 0 : index
    %c0_0 = arith.constant 0 : index
    %c0_1 = arith.constant 0 : index
    %0 = vector.load %arg1[%c0, %c0_0, %c0_1] : memref<1x1x256xf32, #tpu.memory_space<vmem>>, vector<1x1x256xf32>
    %1 = vector.shape_cast %0 : vector<1x1x256xf32> to vector<1x256xf32>
    %2 = vector.extract_strided_slice %1 {offsets = [0, 222], sizes = [1, 34], strides = [1, 1]} : vector<1x256xf32> to vector<1x34xf32>
    %3 = vector.extract_strided_slice %1 {offsets = [0, 0], sizes = [1, 222], strides = [1, 1]} : vector<1x256xf32> to vector<1x222xf32>
    %4 = tpu.concatenate %2, %3 in 1 : vector<1x34xf32>, vector<1x222xf32> -> vector<1x256xf32>
    %c0_2 = arith.constant 0 : index
    %c0_3 = arith.constant 0 : index
    %c0_4 = arith.constant 0 : index
    %5 = vector.load %arg8[%c0_2, %c0_3, %c0_4] : memref<25x1x256xf32, #tpu.memory_space<vmem>>, vector<1x1x256xf32>
    %6 = vector.shape_cast %5 : vector<1x1x256xf32> to vector<1x256xf32>
    %7 = arith.mulf %4, %6 : vector<1x256xf32>
    %8 = vector.extract_strided_slice %1 {offsets = [0, 223], sizes = [1, 33], strides = [1, 1]} : vector<1x256xf32> to vector<1x33xf32>
    %9 = vector.extract_strided_slice %1 {offsets = [0, 0], sizes = [1, 223], strides = [1, 1]} : vector<1x256xf32> to vector<1x223xf32>
    %10 = tpu.concatenate %8, %9 in 1 : vector<1x33xf32>, vector<1x223xf32> -> vector<1x256xf32>
    %c1 = arith.constant 1 : index
    %c0_5 = arith.constant 0 : index
    %c0_6 = arith.constant 0 : index
    %11 = vector.load %arg8[%c1, %c0_5, %c0_6] : memref<25x1x256xf32, #tpu.memory_space<vmem>>, vector<1x1x256xf32>
    %12 = vector.shape_cast %11 : vector<1x1x256xf32> to vector<1x256xf32>
    %13 = arith.mulf %10, %12 : vector<1x256xf32>
    %14 = vector.extract_strided_slice %1 {offsets = [0, 224], sizes = [1, 32], strides = [1, 1]} : vector<1x256xf32> to vector<1x32xf32>
    %15 = vector.extract_strided_slice %1 {offsets = [0, 0], sizes = [1, 224], strides = [1, 1]} : vector<1x256xf32> to vector<1x224xf32>
    %16 = tpu.concatenate %14, %15 in 1 : vector<1x32xf32>, vector<1x224xf32> -> vector<1x256xf32>
    %c2 = arith.constant 2 : index
    %c0_7 = arith.constant 0 : index
    %c0_8 = arith.constant 0 : index
    %17 = vector.load %arg8[%c2, %c0_7, %c0_8] : memref<25x1x256xf32, #tpu.memory_space<vmem>>, vector<1x1x256xf32>
    %18 = vector.shape_cast %17 : vector<1x1x256xf32> to vector<1x256xf32>
    %19 = arith.mulf %16, %18 : vector<1x256xf32>
    %20 = vector.extract_strided_slice %1 {offsets = [0, 225], sizes = [1, 31], strides = [1, 1]} : vector<1x256xf32> to vector<1x31xf32>
    %21 = vector.extract_strided_slice %1 {offsets = [0, 0], sizes = [1, 225], strides = [1, 1]} : vector<1x256xf32> to vector<1x225xf32>
    %22 = tpu.concatenate %20, %21 in 1 : vector<1x31xf32>, vector<1x225xf32> -> vector<1x256xf32>
    %c3 = arith.constant 3 : index
    %c0_9 = arith.constant 0 : index
    %c0_10 = arith.constant 0 : index
    %23 = vector.load %arg8[%c3, %c0_9, %c0_10] : memref<25x1x256xf32, #tpu.memory_space<vmem>>, vector<1x1x256xf32>
    %24 = vector.shape_cast %23 : vector<1x1x256xf32> to vector<1x256xf32>
    %25 = arith.mulf %22, %24 : vector<1x256xf32>
    %26 = vector.extract_strided_slice %1 {offsets = [0, 226], sizes = [1, 30], strides = [1, 1]} : vector<1x256xf32> to vector<1x30xf32>
    %27 = vector.extract_strided_slice %1 {offsets = [0, 0], sizes = [1, 226], strides = [1, 1]} : vector<1x256xf32> to vector<1x226xf32>
    %28 = tpu.concatenate %26, %27 in 1 : vector<1x30xf32>, vector<1x226xf32> -> vector<1x256xf32>
    %c4 = arith.constant 4 : index
    %c0_11 = arith.constant 0 : index
    %c0_12 = arith.constant 0 : index
    %29 = vector.load %arg8[%c4, %c0_11, %c0_12] : memref<25x1x256xf32, #tpu.memory_space<vmem>>, vector<1x1x256xf32>
    %30 = vector.shape_cast %29 : vector<1x1x256xf32> to vector<1x256xf32>
    %31 = arith.mulf %28, %30 : vector<1x256xf32>
    %32 = vector.extract_strided_slice %1 {offsets = [0, 238], sizes = [1, 18], strides = [1, 1]} : vector<1x256xf32> to vector<1x18xf32>
    %33 = vector.extract_strided_slice %1 {offsets = [0, 0], sizes = [1, 238], strides = [1, 1]} : vector<1x256xf32> to vector<1x238xf32>
    %34 = tpu.concatenate %32, %33 in 1 : vector<1x18xf32>, vector<1x238xf32> -> vector<1x256xf32>
    %c5 = arith.constant 5 : index
    %c0_13 = arith.constant 0 : index
    %c0_14 = arith.constant 0 : index
    %35 = vector.load %arg8[%c5, %c0_13, %c0_14] : memref<25x1x256xf32, #tpu.memory_space<vmem>>, vector<1x1x256xf32>
    %36 = vector.shape_cast %35 : vector<1x1x256xf32> to vector<1x256xf32>
    %37 = arith.mulf %34, %36 : vector<1x256xf32>
    %38 = vector.extract_strided_slice %1 {offsets = [0, 239], sizes = [1, 17], strides = [1, 1]} : vector<1x256xf32> to vector<1x17xf32>
    %39 = vector.extract_strided_slice %1 {offsets = [0, 0], sizes = [1, 239], strides = [1, 1]} : vector<1x256xf32> to vector<1x239xf32>
    %40 = tpu.concatenate %38, %39 in 1 : vector<1x17xf32>, vector<1x239xf32> -> vector<1x256xf32>
    %c6 = arith.constant 6 : index
    %c0_15 = arith.constant 0 : index
    %c0_16 = arith.constant 0 : index
    %41 = vector.load %arg8[%c6, %c0_15, %c0_16] : memref<25x1x256xf32, #tpu.memory_space<vmem>>, vector<1x1x256xf32>
    %42 = vector.shape_cast %41 : vector<1x1x256xf32> to vector<1x256xf32>
    %43 = arith.mulf %40, %42 : vector<1x256xf32>
    %44 = vector.extract_strided_slice %1 {offsets = [0, 240], sizes = [1, 16], strides = [1, 1]} : vector<1x256xf32> to vector<1x16xf32>
    %45 = vector.extract_strided_slice %1 {offsets = [0, 0], sizes = [1, 240], strides = [1, 1]} : vector<1x256xf32> to vector<1x240xf32>
    %46 = tpu.concatenate %44, %45 in 1 : vector<1x16xf32>, vector<1x240xf32> -> vector<1x256xf32>
    %c7 = arith.constant 7 : index
    %c0_17 = arith.constant 0 : index
    %c0_18 = arith.constant 0 : index
    %47 = vector.load %arg8[%c7, %c0_17, %c0_18] : memref<25x1x256xf32, #tpu.memory_space<vmem>>, vector<1x1x256xf32>
    %48 = vector.shape_cast %47 : vector<1x1x256xf32> to vector<1x256xf32>
    %49 = arith.mulf %46, %48 : vector<1x256xf32>
    %50 = vector.extract_strided_slice %1 {offsets = [0, 241], sizes = [1, 15], strides = [1, 1]} : vector<1x256xf32> to vector<1x15xf32>
    %51 = vector.extract_strided_slice %1 {offsets = [0, 0], sizes = [1, 241], strides = [1, 1]} : vector<1x256xf32> to vector<1x241xf32>
    %52 = tpu.concatenate %50, %51 in 1 : vector<1x15xf32>, vector<1x241xf32> -> vector<1x256xf32>
    %c8 = arith.constant 8 : index
    %c0_19 = arith.constant 0 : index
    %c0_20 = arith.constant 0 : index
    %53 = vector.load %arg8[%c8, %c0_19, %c0_20] : memref<25x1x256xf32, #tpu.memory_space<vmem>>, vector<1x1x256xf32>
    %54 = vector.shape_cast %53 : vector<1x1x256xf32> to vector<1x256xf32>
    %55 = arith.mulf %52, %54 : vector<1x256xf32>
    %56 = vector.extract_strided_slice %1 {offsets = [0, 242], sizes = [1, 14], strides = [1, 1]} : vector<1x256xf32> to vector<1x14xf32>
    %57 = vector.extract_strided_slice %1 {offsets = [0, 0], sizes = [1, 242], strides = [1, 1]} : vector<1x256xf32> to vector<1x242xf32>
    %58 = tpu.concatenate %56, %57 in 1 : vector<1x14xf32>, vector<1x242xf32> -> vector<1x256xf32>
    %c9 = arith.constant 9 : index
    %c0_21 = arith.constant 0 : index
    %c0_22 = arith.constant 0 : index
    %59 = vector.load %arg8[%c9, %c0_21, %c0_22] : memref<25x1x256xf32, #tpu.memory_space<vmem>>, vector<1x1x256xf32>
    %60 = vector.shape_cast %59 : vector<1x1x256xf32> to vector<1x256xf32>
    %61 = arith.mulf %58, %60 : vector<1x256xf32>
    %62 = vector.extract_strided_slice %1 {offsets = [0, 254], sizes = [1, 2], strides = [1, 1]} : vector<1x256xf32> to vector<1x2xf32>
    %63 = vector.extract_strided_slice %1 {offsets = [0, 0], sizes = [1, 254], strides = [1, 1]} : vector<1x256xf32> to vector<1x254xf32>
    %64 = tpu.concatenate %62, %63 in 1 : vector<1x2xf32>, vector<1x254xf32> -> vector<1x256xf32>
    %c10 = arith.constant 10 : index
    %c0_23 = arith.constant 0 : index
    %c0_24 = arith.constant 0 : index
    %65 = vector.load %arg8[%c10, %c0_23, %c0_24] : memref<25x1x256xf32, #tpu.memory_space<vmem>>, vector<1x1x256xf32>
    %66 = vector.shape_cast %65 : vector<1x1x256xf32> to vector<1x256xf32>
    %67 = arith.mulf %64, %66 : vector<1x256xf32>
    %68 = vector.extract_strided_slice %1 {offsets = [0, 255], sizes = [1, 1], strides = [1, 1]} : vector<1x256xf32> to vector<1x1xf32>
    %69 = vector.extract_strided_slice %1 {offsets = [0, 0], sizes = [1, 255], strides = [1, 1]} : vector<1x256xf32> to vector<1x255xf32>
    %70 = tpu.concatenate %68, %69 in 1 : vector<1x1xf32>, vector<1x255xf32> -> vector<1x256xf32>
    %c11 = arith.constant 11 : index
    %c0_25 = arith.constant 0 : index
    %c0_26 = arith.constant 0 : index
    %71 = vector.load %arg8[%c11, %c0_25, %c0_26] : memref<25x1x256xf32, #tpu.memory_space<vmem>>, vector<1x1x256xf32>
    %72 = vector.shape_cast %71 : vector<1x1x256xf32> to vector<1x256xf32>
    %73 = arith.mulf %70, %72 : vector<1x256xf32>
    %74 = vector.extract_strided_slice %1 {offsets = [0, 1], sizes = [1, 255], strides = [1, 1]} : vector<1x256xf32> to vector<1x255xf32>
    %75 = vector.extract_strided_slice %1 {offsets = [0, 0], sizes = [1, 1], strides = [1, 1]} : vector<1x256xf32> to vector<1x1xf32>
    %76 = tpu.concatenate %74, %75 in 1 : vector<1x255xf32>, vector<1x1xf32> -> vector<1x256xf32>
    %c13 = arith.constant 13 : index
    %c0_27 = arith.constant 0 : index
    %c0_28 = arith.constant 0 : index
    %77 = vector.load %arg8[%c13, %c0_27, %c0_28] : memref<25x1x256xf32, #tpu.memory_space<vmem>>, vector<1x1x256xf32>
    %78 = vector.shape_cast %77 : vector<1x1x256xf32> to vector<1x256xf32>
    %79 = arith.mulf %76, %78 : vector<1x256xf32>
    %80 = vector.extract_strided_slice %1 {offsets = [0, 2], sizes = [1, 254], strides = [1, 1]} : vector<1x256xf32> to vector<1x254xf32>
    %81 = vector.extract_strided_slice %1 {offsets = [0, 0], sizes = [1, 2], strides = [1, 1]} : vector<1x256xf32> to vector<1x2xf32>
    %82 = tpu.concatenate %80, %81 in 1 : vector<1x254xf32>, vector<1x2xf32> -> vector<1x256xf32>
    %c14 = arith.constant 14 : index
    %c0_29 = arith.constant 0 : index
    %c0_30 = arith.constant 0 : index
    %83 = vector.load %arg8[%c14, %c0_29, %c0_30] : memref<25x1x256xf32, #tpu.memory_space<vmem>>, vector<1x1x256xf32>
    %84 = vector.shape_cast %83 : vector<1x1x256xf32> to vector<1x256xf32>
    %85 = arith.mulf %82, %84 : vector<1x256xf32>
    %86 = vector.extract_strided_slice %1 {offsets = [0, 14], sizes = [1, 242], strides = [1, 1]} : vector<1x256xf32> to vector<1x242xf32>
    %87 = vector.extract_strided_slice %1 {offsets = [0, 0], sizes = [1, 14], strides = [1, 1]} : vector<1x256xf32> to vector<1x14xf32>
    %88 = tpu.concatenate %86, %87 in 1 : vector<1x242xf32>, vector<1x14xf32> -> vector<1x256xf32>
    %c15 = arith.constant 15 : index
    %c0_31 = arith.constant 0 : index
    %c0_32 = arith.constant 0 : index
    %89 = vector.load %arg8[%c15, %c0_31, %c0_32] : memref<25x1x256xf32, #tpu.memory_space<vmem>>, vector<1x1x256xf32>
    %90 = vector.shape_cast %89 : vector<1x1x256xf32> to vector<1x256xf32>
    %91 = arith.mulf %88, %90 : vector<1x256xf32>
    %92 = vector.extract_strided_slice %1 {offsets = [0, 15], sizes = [1, 241], strides = [1, 1]} : vector<1x256xf32> to vector<1x241xf32>
    %93 = vector.extract_strided_slice %1 {offsets = [0, 0], sizes = [1, 15], strides = [1, 1]} : vector<1x256xf32> to vector<1x15xf32>
    %94 = tpu.concatenate %92, %93 in 1 : vector<1x241xf32>, vector<1x15xf32> -> vector<1x256xf32>
    %c16 = arith.constant 16 : index
    %c0_33 = arith.constant 0 : index
    %c0_34 = arith.constant 0 : index
    %95 = vector.load %arg8[%c16, %c0_33, %c0_34] : memref<25x1x256xf32, #tpu.memory_space<vmem>>, vector<1x1x256xf32>
    %96 = vector.shape_cast %95 : vector<1x1x256xf32> to vector<1x256xf32>
    %97 = arith.mulf %94, %96 : vector<1x256xf32>
    %98 = vector.extract_strided_slice %1 {offsets = [0, 16], sizes = [1, 240], strides = [1, 1]} : vector<1x256xf32> to vector<1x240xf32>
    %99 = vector.extract_strided_slice %1 {offsets = [0, 0], sizes = [1, 16], strides = [1, 1]} : vector<1x256xf32> to vector<1x16xf32>
    %100 = tpu.concatenate %98, %99 in 1 : vector<1x240xf32>, vector<1x16xf32> -> vector<1x256xf32>
    %c17 = arith.constant 17 : index
    %c0_35 = arith.constant 0 : index
    %c0_36 = arith.constant 0 : index
    %101 = vector.load %arg8[%c17, %c0_35, %c0_36] : memref<25x1x256xf32, #tpu.memory_space<vmem>>, vector<1x1x256xf32>
    %102 = vector.shape_cast %101 : vector<1x1x256xf32> to vector<1x256xf32>
    %103 = arith.mulf %100, %102 : vector<1x256xf32>
    %104 = vector.extract_strided_slice %1 {offsets = [0, 17], sizes = [1, 239], strides = [1, 1]} : vector<1x256xf32> to vector<1x239xf32>
    %105 = vector.extract_strided_slice %1 {offsets = [0, 0], sizes = [1, 17], strides = [1, 1]} : vector<1x256xf32> to vector<1x17xf32>
    %106 = tpu.concatenate %104, %105 in 1 : vector<1x239xf32>, vector<1x17xf32> -> vector<1x256xf32>
    %c18 = arith.constant 18 : index
    %c0_37 = arith.constant 0 : index
    %c0_38 = arith.constant 0 : index
    %107 = vector.load %arg8[%c18, %c0_37, %c0_38] : memref<25x1x256xf32, #tpu.memory_space<vmem>>, vector<1x1x256xf32>
    %108 = vector.shape_cast %107 : vector<1x1x256xf32> to vector<1x256xf32>
    %109 = arith.mulf %106, %108 : vector<1x256xf32>
    %110 = vector.extract_strided_slice %1 {offsets = [0, 18], sizes = [1, 238], strides = [1, 1]} : vector<1x256xf32> to vector<1x238xf32>
    %111 = vector.extract_strided_slice %1 {offsets = [0, 0], sizes = [1, 18], strides = [1, 1]} : vector<1x256xf32> to vector<1x18xf32>
    %112 = tpu.concatenate %110, %111 in 1 : vector<1x238xf32>, vector<1x18xf32> -> vector<1x256xf32>
    %c19 = arith.constant 19 : index
    %c0_39 = arith.constant 0 : index
    %c0_40 = arith.constant 0 : index
    %113 = vector.load %arg8[%c19, %c0_39, %c0_40] : memref<25x1x256xf32, #tpu.memory_space<vmem>>, vector<1x1x256xf32>
    %114 = vector.shape_cast %113 : vector<1x1x256xf32> to vector<1x256xf32>
    %115 = arith.mulf %112, %114 : vector<1x256xf32>
    %116 = vector.extract_strided_slice %1 {offsets = [0, 30], sizes = [1, 226], strides = [1, 1]} : vector<1x256xf32> to vector<1x226xf32>
    %117 = vector.extract_strided_slice %1 {offsets = [0, 0], sizes = [1, 30], strides = [1, 1]} : vector<1x256xf32> to vector<1x30xf32>
    %118 = tpu.concatenate %116, %117 in 1 : vector<1x226xf32>, vector<1x30xf32> -> vector<1x256xf32>
    %c20 = arith.constant 20 : index
    %c0_41 = arith.constant 0 : index
    %c0_42 = arith.constant 0 : index
    %119 = vector.load %arg8[%c20, %c0_41, %c0_42] : memref<25x1x256xf32, #tpu.memory_space<vmem>>, vector<1x1x256xf32>
    %120 = vector.shape_cast %119 : vector<1x1x256xf32> to vector<1x256xf32>
    %121 = arith.mulf %118, %120 : vector<1x256xf32>
    %122 = vector.extract_strided_slice %1 {offsets = [0, 31], sizes = [1, 225], strides = [1, 1]} : vector<1x256xf32> to vector<1x225xf32>
    %123 = vector.extract_strided_slice %1 {offsets = [0, 0], sizes = [1, 31], strides = [1, 1]} : vector<1x256xf32> to vector<1x31xf32>
    %124 = tpu.concatenate %122, %123 in 1 : vector<1x225xf32>, vector<1x31xf32> -> vector<1x256xf32>
    %c21 = arith.constant 21 : index
    %c0_43 = arith.constant 0 : index
    %c0_44 = arith.constant 0 : index
    %125 = vector.load %arg8[%c21, %c0_43, %c0_44] : memref<25x1x256xf32, #tpu.memory_space<vmem>>, vector<1x1x256xf32>
    %126 = vector.shape_cast %125 : vector<1x1x256xf32> to vector<1x256xf32>
    %127 = arith.mulf %124, %126 : vector<1x256xf32>
    %128 = vector.extract_strided_slice %1 {offsets = [0, 32], sizes = [1, 224], strides = [1, 1]} : vector<1x256xf32> to vector<1x224xf32>
    %129 = vector.extract_strided_slice %1 {offsets = [0, 0], sizes = [1, 32], strides = [1, 1]} : vector<1x256xf32> to vector<1x32xf32>
    %130 = tpu.concatenate %128, %129 in 1 : vector<1x224xf32>, vector<1x32xf32> -> vector<1x256xf32>
    %c22 = arith.constant 22 : index
    %c0_45 = arith.constant 0 : index
    %c0_46 = arith.constant 0 : index
    %131 = vector.load %arg8[%c22, %c0_45, %c0_46] : memref<25x1x256xf32, #tpu.memory_space<vmem>>, vector<1x1x256xf32>
    %132 = vector.shape_cast %131 : vector<1x1x256xf32> to vector<1x256xf32>
    %133 = arith.mulf %130, %132 : vector<1x256xf32>
    %134 = vector.extract_strided_slice %1 {offsets = [0, 33], sizes = [1, 223], strides = [1, 1]} : vector<1x256xf32> to vector<1x223xf32>
    %135 = vector.extract_strided_slice %1 {offsets = [0, 0], sizes = [1, 33], strides = [1, 1]} : vector<1x256xf32> to vector<1x33xf32>
    %136 = tpu.concatenate %134, %135 in 1 : vector<1x223xf32>, vector<1x33xf32> -> vector<1x256xf32>
    %c23 = arith.constant 23 : index
    %c0_47 = arith.constant 0 : index
    %c0_48 = arith.constant 0 : index
    %137 = vector.load %arg8[%c23, %c0_47, %c0_48] : memref<25x1x256xf32, #tpu.memory_space<vmem>>, vector<1x1x256xf32>
    %138 = vector.shape_cast %137 : vector<1x1x256xf32> to vector<1x256xf32>
    %139 = arith.mulf %136, %138 : vector<1x256xf32>
    %140 = vector.extract_strided_slice %1 {offsets = [0, 34], sizes = [1, 222], strides = [1, 1]} : vector<1x256xf32> to vector<1x222xf32>
    %141 = vector.extract_strided_slice %1 {offsets = [0, 0], sizes = [1, 34], strides = [1, 1]} : vector<1x256xf32> to vector<1x34xf32>
    %142 = tpu.concatenate %140, %141 in 1 : vector<1x222xf32>, vector<1x34xf32> -> vector<1x256xf32>
    %c24 = arith.constant 24 : index
    %c0_49 = arith.constant 0 : index
    %c0_50 = arith.constant 0 : index
    %143 = vector.load %arg8[%c24, %c0_49, %c0_50] : memref<25x1x256xf32, #tpu.memory_space<vmem>>, vector<1x1x256xf32>
    %144 = vector.shape_cast %143 : vector<1x1x256xf32> to vector<1x256xf32>
    %145 = arith.mulf %142, %144 : vector<1x256xf32>
    %146 = tpu.concatenate %7, %13, %19, %25, %31, %37, %43, %49, %55, %61, %67, %73, %1, %79, %85, %91 in 0 : vector<1x256xf32>, vector<1x256xf32>, vector<1x256xf32>, vector<1x256xf32>, vector<1x256xf32>, vector<1x256xf32>, vector<1x256xf32>, vector<1x256xf32>, vector<1x256xf32>, vector<1x256xf32>, vector<1x256xf32>, vector<1x256xf32>, vector<1x256xf32>, vector<1x256xf32>, vector<1x256xf32>, vector<1x256xf32> -> vector<16x256xf32>
    %147 = tpu.concatenate %97, %103, %109, %115, %121, %127, %133, %139, %145 in 0 : vector<1x256xf32>, vector<1x256xf32>, vector<1x256xf32>, vector<1x256xf32>, vector<1x256xf32>, vector<1x256xf32>, vector<1x256xf32>, vector<1x256xf32>, vector<1x256xf32> -> vector<9x256xf32>
    %148 = tpu.concatenate %146, %147 in 0 : vector<16x256xf32>, vector<9x256xf32> -> vector<25x256xf32>
    %c0_51 = arith.constant 0 : index
    %c0_52 = arith.constant 0 : index
    %149 = vector.load %arg2[%c0_51, %c0_52] : memref<64x25xf32, #tpu.memory_space<vmem>>, vector<64x25xf32>
    %cst = arith.constant dense<0.000000e+00> : vector<64x256xf32>
    %150 = tpu.matmul %149, %148, %cst {dimension_numbers = #tpu.dot_dimension_numbers<[1], [0], [0], [1], [0, 0, 1, 1], [], []>} : vector<64x25xf32>, vector<25x256xf32>, vector<64x256xf32> -> vector<64x256xf32>
    %c0_53 = arith.constant 0 : index
    %c0_54 = arith.constant 0 : index
    %151 = vector.load %arg3[%c0_53, %c0_54] : memref<64x1xf32, #tpu.memory_space<vmem>>, vector<64x1xf32>
    %152 = vector.broadcast %151 : vector<64x1xf32> to vector<64x256xf32>
    %153 = arith.addf %150, %152 : vector<64x256xf32>
    %154 = math.tanh %153 : vector<64x256xf32>
    %c0_55 = arith.constant 0 : index
    %c0_56 = arith.constant 0 : index
    %c0_57 = arith.constant 0 : index
    %155 = vector.load %arg4[%c0_55, %c0_56, %c0_57] : memref<9x32x64xf32, #tpu.memory_space<vmem>>, vector<1x32x64xf32>
    %156 = vector.shape_cast %155 : vector<1x32x64xf32> to vector<32x64xf32>
    %157 = vector.extract_strided_slice %154 {offsets = [0, 239], sizes = [64, 17], strides = [1, 1]} : vector<64x256xf32> to vector<64x17xf32>
    %158 = vector.extract_strided_slice %154 {offsets = [0, 0], sizes = [64, 239], strides = [1, 1]} : vector<64x256xf32> to vector<64x239xf32>
    %159 = tpu.concatenate %157, %158 in 1 : vector<64x17xf32>, vector<64x239xf32> -> vector<64x256xf32>
    %c0_58 = arith.constant 0 : index
    %c0_59 = arith.constant 0 : index
    %c0_60 = arith.constant 0 : index
    %160 = vector.load %arg9[%c0_58, %c0_59, %c0_60] : memref<9x1x256xf32, #tpu.memory_space<vmem>>, vector<1x1x256xf32>
    %161 = vector.shape_cast %160 : vector<1x1x256xf32> to vector<1x256xf32>
    %162 = vector.broadcast %161 : vector<1x256xf32> to vector<64x256xf32>
    %163 = arith.mulf %159, %162 : vector<64x256xf32>
    %cst_61 = arith.constant dense<0.000000e+00> : vector<32x256xf32>
    %164 = tpu.matmul %156, %163, %cst_61 {dimension_numbers = #tpu.dot_dimension_numbers<[1], [0], [0], [1], [0, 0, 1, 1], [], []>} : vector<32x64xf32>, vector<64x256xf32>, vector<32x256xf32> -> vector<32x256xf32>
    %c1_62 = arith.constant 1 : index
    %c0_63 = arith.constant 0 : index
    %c0_64 = arith.constant 0 : index
    %165 = vector.load %arg4[%c1_62, %c0_63, %c0_64] : memref<9x32x64xf32, #tpu.memory_space<vmem>>, vector<1x32x64xf32>
    %166 = vector.shape_cast %165 : vector<1x32x64xf32> to vector<32x64xf32>
    %167 = vector.extract_strided_slice %154 {offsets = [0, 240], sizes = [64, 16], strides = [1, 1]} : vector<64x256xf32> to vector<64x16xf32>
    %168 = vector.extract_strided_slice %154 {offsets = [0, 0], sizes = [64, 240], strides = [1, 1]} : vector<64x256xf32> to vector<64x240xf32>
    %169 = tpu.concatenate %167, %168 in 1 : vector<64x16xf32>, vector<64x240xf32> -> vector<64x256xf32>
    %c1_65 = arith.constant 1 : index
    %c0_66 = arith.constant 0 : index
    %c0_67 = arith.constant 0 : index
    %170 = vector.load %arg9[%c1_65, %c0_66, %c0_67] : memref<9x1x256xf32, #tpu.memory_space<vmem>>, vector<1x1x256xf32>
    %171 = vector.shape_cast %170 : vector<1x1x256xf32> to vector<1x256xf32>
    %172 = vector.broadcast %171 : vector<1x256xf32> to vector<64x256xf32>
    %173 = arith.mulf %169, %172 : vector<64x256xf32>
    %cst_68 = arith.constant dense<0.000000e+00> : vector<32x256xf32>
    %174 = tpu.matmul %166, %173, %cst_68 {dimension_numbers = #tpu.dot_dimension_numbers<[1], [0], [0], [1], [0, 0, 1, 1], [], []>} : vector<32x64xf32>, vector<64x256xf32>, vector<32x256xf32> -> vector<32x256xf32>
    %175 = arith.addf %164, %174 : vector<32x256xf32>
    %c2_69 = arith.constant 2 : index
    %c0_70 = arith.constant 0 : index
    %c0_71 = arith.constant 0 : index
    %176 = vector.load %arg4[%c2_69, %c0_70, %c0_71] : memref<9x32x64xf32, #tpu.memory_space<vmem>>, vector<1x32x64xf32>
    %177 = vector.shape_cast %176 : vector<1x32x64xf32> to vector<32x64xf32>
    %178 = vector.extract_strided_slice %154 {offsets = [0, 241], sizes = [64, 15], strides = [1, 1]} : vector<64x256xf32> to vector<64x15xf32>
    %179 = vector.extract_strided_slice %154 {offsets = [0, 0], sizes = [64, 241], strides = [1, 1]} : vector<64x256xf32> to vector<64x241xf32>
    %180 = tpu.concatenate %178, %179 in 1 : vector<64x15xf32>, vector<64x241xf32> -> vector<64x256xf32>
    %c2_72 = arith.constant 2 : index
    %c0_73 = arith.constant 0 : index
    %c0_74 = arith.constant 0 : index
    %181 = vector.load %arg9[%c2_72, %c0_73, %c0_74] : memref<9x1x256xf32, #tpu.memory_space<vmem>>, vector<1x1x256xf32>
    %182 = vector.shape_cast %181 : vector<1x1x256xf32> to vector<1x256xf32>
    %183 = vector.broadcast %182 : vector<1x256xf32> to vector<64x256xf32>
    %184 = arith.mulf %180, %183 : vector<64x256xf32>
    %cst_75 = arith.constant dense<0.000000e+00> : vector<32x256xf32>
    %185 = tpu.matmul %177, %184, %cst_75 {dimension_numbers = #tpu.dot_dimension_numbers<[1], [0], [0], [1], [0, 0, 1, 1], [], []>} : vector<32x64xf32>, vector<64x256xf32>, vector<32x256xf32> -> vector<32x256xf32>
    %186 = arith.addf %175, %185 : vector<32x256xf32>
    %c3_76 = arith.constant 3 : index
    %c0_77 = arith.constant 0 : index
    %c0_78 = arith.constant 0 : index
    %187 = vector.load %arg4[%c3_76, %c0_77, %c0_78] : memref<9x32x64xf32, #tpu.memory_space<vmem>>, vector<1x32x64xf32>
    %188 = vector.shape_cast %187 : vector<1x32x64xf32> to vector<32x64xf32>
    %189 = vector.extract_strided_slice %154 {offsets = [0, 255], sizes = [64, 1], strides = [1, 1]} : vector<64x256xf32> to vector<64x1xf32>
    %190 = vector.extract_strided_slice %154 {offsets = [0, 0], sizes = [64, 255], strides = [1, 1]} : vector<64x256xf32> to vector<64x255xf32>
    %191 = tpu.concatenate %189, %190 in 1 : vector<64x1xf32>, vector<64x255xf32> -> vector<64x256xf32>
    %c3_79 = arith.constant 3 : index
    %c0_80 = arith.constant 0 : index
    %c0_81 = arith.constant 0 : index
    %192 = vector.load %arg9[%c3_79, %c0_80, %c0_81] : memref<9x1x256xf32, #tpu.memory_space<vmem>>, vector<1x1x256xf32>
    %193 = vector.shape_cast %192 : vector<1x1x256xf32> to vector<1x256xf32>
    %194 = vector.broadcast %193 : vector<1x256xf32> to vector<64x256xf32>
    %195 = arith.mulf %191, %194 : vector<64x256xf32>
    %cst_82 = arith.constant dense<0.000000e+00> : vector<32x256xf32>
    %196 = tpu.matmul %188, %195, %cst_82 {dimension_numbers = #tpu.dot_dimension_numbers<[1], [0], [0], [1], [0, 0, 1, 1], [], []>} : vector<32x64xf32>, vector<64x256xf32>, vector<32x256xf32> -> vector<32x256xf32>
    %197 = arith.addf %186, %196 : vector<32x256xf32>
    %c4_83 = arith.constant 4 : index
    %c0_84 = arith.constant 0 : index
    %c0_85 = arith.constant 0 : index
    %198 = vector.load %arg4[%c4_83, %c0_84, %c0_85] : memref<9x32x64xf32, #tpu.memory_space<vmem>>, vector<1x32x64xf32>
    %199 = vector.shape_cast %198 : vector<1x32x64xf32> to vector<32x64xf32>
    %cst_86 = arith.constant dense<0.000000e+00> : vector<32x256xf32>
    %200 = tpu.matmul %199, %154, %cst_86 {dimension_numbers = #tpu.dot_dimension_numbers<[1], [0], [0], [1], [0, 0, 1, 1], [], []>} : vector<32x64xf32>, vector<64x256xf32>, vector<32x256xf32> -> vector<32x256xf32>
    %201 = arith.addf %197, %200 : vector<32x256xf32>
    %c5_87 = arith.constant 5 : index
    %c0_88 = arith.constant 0 : index
    %c0_89 = arith.constant 0 : index
    %202 = vector.load %arg4[%c5_87, %c0_88, %c0_89] : memref<9x32x64xf32, #tpu.memory_space<vmem>>, vector<1x32x64xf32>
    %203 = vector.shape_cast %202 : vector<1x32x64xf32> to vector<32x64xf32>
    %204 = vector.extract_strided_slice %154 {offsets = [0, 1], sizes = [64, 255], strides = [1, 1]} : vector<64x256xf32> to vector<64x255xf32>
    %205 = vector.extract_strided_slice %154 {offsets = [0, 0], sizes = [64, 1], strides = [1, 1]} : vector<64x256xf32> to vector<64x1xf32>
    %206 = tpu.concatenate %204, %205 in 1 : vector<64x255xf32>, vector<64x1xf32> -> vector<64x256xf32>
    %c5_90 = arith.constant 5 : index
    %c0_91 = arith.constant 0 : index
    %c0_92 = arith.constant 0 : index
    %207 = vector.load %arg9[%c5_90, %c0_91, %c0_92] : memref<9x1x256xf32, #tpu.memory_space<vmem>>, vector<1x1x256xf32>
    %208 = vector.shape_cast %207 : vector<1x1x256xf32> to vector<1x256xf32>
    %209 = vector.broadcast %208 : vector<1x256xf32> to vector<64x256xf32>
    %210 = arith.mulf %206, %209 : vector<64x256xf32>
    %cst_93 = arith.constant dense<0.000000e+00> : vector<32x256xf32>
    %211 = tpu.matmul %203, %210, %cst_93 {dimension_numbers = #tpu.dot_dimension_numbers<[1], [0], [0], [1], [0, 0, 1, 1], [], []>} : vector<32x64xf32>, vector<64x256xf32>, vector<32x256xf32> -> vector<32x256xf32>
    %212 = arith.addf %201, %211 : vector<32x256xf32>
    %c6_94 = arith.constant 6 : index
    %c0_95 = arith.constant 0 : index
    %c0_96 = arith.constant 0 : index
    %213 = vector.load %arg4[%c6_94, %c0_95, %c0_96] : memref<9x32x64xf32, #tpu.memory_space<vmem>>, vector<1x32x64xf32>
    %214 = vector.shape_cast %213 : vector<1x32x64xf32> to vector<32x64xf32>
    %215 = vector.extract_strided_slice %154 {offsets = [0, 15], sizes = [64, 241], strides = [1, 1]} : vector<64x256xf32> to vector<64x241xf32>
    %216 = vector.extract_strided_slice %154 {offsets = [0, 0], sizes = [64, 15], strides = [1, 1]} : vector<64x256xf32> to vector<64x15xf32>
    %217 = tpu.concatenate %215, %216 in 1 : vector<64x241xf32>, vector<64x15xf32> -> vector<64x256xf32>
    %c6_97 = arith.constant 6 : index
    %c0_98 = arith.constant 0 : index
    %c0_99 = arith.constant 0 : index
    %218 = vector.load %arg9[%c6_97, %c0_98, %c0_99] : memref<9x1x256xf32, #tpu.memory_space<vmem>>, vector<1x1x256xf32>
    %219 = vector.shape_cast %218 : vector<1x1x256xf32> to vector<1x256xf32>
    %220 = vector.broadcast %219 : vector<1x256xf32> to vector<64x256xf32>
    %221 = arith.mulf %217, %220 : vector<64x256xf32>
    %cst_100 = arith.constant dense<0.000000e+00> : vector<32x256xf32>
    %222 = tpu.matmul %214, %221, %cst_100 {dimension_numbers = #tpu.dot_dimension_numbers<[1], [0], [0], [1], [0, 0, 1, 1], [], []>} : vector<32x64xf32>, vector<64x256xf32>, vector<32x256xf32> -> vector<32x256xf32>
    %223 = arith.addf %212, %222 : vector<32x256xf32>
    %c7_101 = arith.constant 7 : index
    %c0_102 = arith.constant 0 : index
    %c0_103 = arith.constant 0 : index
    %224 = vector.load %arg4[%c7_101, %c0_102, %c0_103] : memref<9x32x64xf32, #tpu.memory_space<vmem>>, vector<1x32x64xf32>
    %225 = vector.shape_cast %224 : vector<1x32x64xf32> to vector<32x64xf32>
    %226 = vector.extract_strided_slice %154 {offsets = [0, 16], sizes = [64, 240], strides = [1, 1]} : vector<64x256xf32> to vector<64x240xf32>
    %227 = vector.extract_strided_slice %154 {offsets = [0, 0], sizes = [64, 16], strides = [1, 1]} : vector<64x256xf32> to vector<64x16xf32>
    %228 = tpu.concatenate %226, %227 in 1 : vector<64x240xf32>, vector<64x16xf32> -> vector<64x256xf32>
    %c7_104 = arith.constant 7 : index
    %c0_105 = arith.constant 0 : index
    %c0_106 = arith.constant 0 : index
    %229 = vector.load %arg9[%c7_104, %c0_105, %c0_106] : memref<9x1x256xf32, #tpu.memory_space<vmem>>, vector<1x1x256xf32>
    %230 = vector.shape_cast %229 : vector<1x1x256xf32> to vector<1x256xf32>
    %231 = vector.broadcast %230 : vector<1x256xf32> to vector<64x256xf32>
    %232 = arith.mulf %228, %231 : vector<64x256xf32>
    %cst_107 = arith.constant dense<0.000000e+00> : vector<32x256xf32>
    %233 = tpu.matmul %225, %232, %cst_107 {dimension_numbers = #tpu.dot_dimension_numbers<[1], [0], [0], [1], [0, 0, 1, 1], [], []>} : vector<32x64xf32>, vector<64x256xf32>, vector<32x256xf32> -> vector<32x256xf32>
    %234 = arith.addf %223, %233 : vector<32x256xf32>
    %c8_108 = arith.constant 8 : index
    %c0_109 = arith.constant 0 : index
    %c0_110 = arith.constant 0 : index
    %235 = vector.load %arg4[%c8_108, %c0_109, %c0_110] : memref<9x32x64xf32, #tpu.memory_space<vmem>>, vector<1x32x64xf32>
    %236 = vector.shape_cast %235 : vector<1x32x64xf32> to vector<32x64xf32>
    %237 = vector.extract_strided_slice %154 {offsets = [0, 17], sizes = [64, 239], strides = [1, 1]} : vector<64x256xf32> to vector<64x239xf32>
    %238 = vector.extract_strided_slice %154 {offsets = [0, 0], sizes = [64, 17], strides = [1, 1]} : vector<64x256xf32> to vector<64x17xf32>
    %239 = tpu.concatenate %237, %238 in 1 : vector<64x239xf32>, vector<64x17xf32> -> vector<64x256xf32>
    %c8_111 = arith.constant 8 : index
    %c0_112 = arith.constant 0 : index
    %c0_113 = arith.constant 0 : index
    %240 = vector.load %arg9[%c8_111, %c0_112, %c0_113] : memref<9x1x256xf32, #tpu.memory_space<vmem>>, vector<1x1x256xf32>
    %241 = vector.shape_cast %240 : vector<1x1x256xf32> to vector<1x256xf32>
    %242 = vector.broadcast %241 : vector<1x256xf32> to vector<64x256xf32>
    %243 = arith.mulf %239, %242 : vector<64x256xf32>
    %cst_114 = arith.constant dense<0.000000e+00> : vector<32x256xf32>
    %244 = tpu.matmul %236, %243, %cst_114 {dimension_numbers = #tpu.dot_dimension_numbers<[1], [0], [0], [1], [0, 0, 1, 1], [], []>} : vector<32x64xf32>, vector<64x256xf32>, vector<32x256xf32> -> vector<32x256xf32>
    %245 = arith.addf %234, %244 : vector<32x256xf32>
    %c0_115 = arith.constant 0 : index
    %c0_116 = arith.constant 0 : index
    %246 = vector.load %arg5[%c0_115, %c0_116] : memref<32x1xf32, #tpu.memory_space<vmem>>, vector<32x1xf32>
    %247 = vector.broadcast %246 : vector<32x1xf32> to vector<32x256xf32>
    %248 = arith.addf %245, %247 : vector<32x256xf32>
    %249 = math.tanh %248 : vector<32x256xf32>
    %c0_117 = arith.constant 0 : index
    %c0_118 = arith.constant 0 : index
    %c0_119 = arith.constant 0 : index
    %250 = vector.load %arg6[%c0_117, %c0_118, %c0_119] : memref<9x4x32xf32, #tpu.memory_space<vmem>>, vector<1x4x32xf32>
    %251 = vector.shape_cast %250 : vector<1x4x32xf32> to vector<4x32xf32>
    %252 = vector.extract_strided_slice %249 {offsets = [0, 239], sizes = [32, 17], strides = [1, 1]} : vector<32x256xf32> to vector<32x17xf32>
    %253 = vector.extract_strided_slice %249 {offsets = [0, 0], sizes = [32, 239], strides = [1, 1]} : vector<32x256xf32> to vector<32x239xf32>
    %254 = tpu.concatenate %252, %253 in 1 : vector<32x17xf32>, vector<32x239xf32> -> vector<32x256xf32>
    %c0_120 = arith.constant 0 : index
    %c0_121 = arith.constant 0 : index
    %c0_122 = arith.constant 0 : index
    %255 = vector.load %arg9[%c0_120, %c0_121, %c0_122] : memref<9x1x256xf32, #tpu.memory_space<vmem>>, vector<1x1x256xf32>
    %256 = vector.shape_cast %255 : vector<1x1x256xf32> to vector<1x256xf32>
    %257 = vector.broadcast %256 : vector<1x256xf32> to vector<32x256xf32>
    %258 = arith.mulf %254, %257 : vector<32x256xf32>
    %cst_123 = arith.constant dense<0.000000e+00> : vector<4x256xf32>
    %259 = tpu.matmul %251, %258, %cst_123 {dimension_numbers = #tpu.dot_dimension_numbers<[1], [0], [0], [1], [0, 0, 1, 1], [], []>} : vector<4x32xf32>, vector<32x256xf32>, vector<4x256xf32> -> vector<4x256xf32>
    %c1_124 = arith.constant 1 : index
    %c0_125 = arith.constant 0 : index
    %c0_126 = arith.constant 0 : index
    %260 = vector.load %arg6[%c1_124, %c0_125, %c0_126] : memref<9x4x32xf32, #tpu.memory_space<vmem>>, vector<1x4x32xf32>
    %261 = vector.shape_cast %260 : vector<1x4x32xf32> to vector<4x32xf32>
    %262 = vector.extract_strided_slice %249 {offsets = [0, 240], sizes = [32, 16], strides = [1, 1]} : vector<32x256xf32> to vector<32x16xf32>
    %263 = vector.extract_strided_slice %249 {offsets = [0, 0], sizes = [32, 240], strides = [1, 1]} : vector<32x256xf32> to vector<32x240xf32>
    %264 = tpu.concatenate %262, %263 in 1 : vector<32x16xf32>, vector<32x240xf32> -> vector<32x256xf32>
    %c1_127 = arith.constant 1 : index
    %c0_128 = arith.constant 0 : index
    %c0_129 = arith.constant 0 : index
    %265 = vector.load %arg9[%c1_127, %c0_128, %c0_129] : memref<9x1x256xf32, #tpu.memory_space<vmem>>, vector<1x1x256xf32>
    %266 = vector.shape_cast %265 : vector<1x1x256xf32> to vector<1x256xf32>
    %267 = vector.broadcast %266 : vector<1x256xf32> to vector<32x256xf32>
    %268 = arith.mulf %264, %267 : vector<32x256xf32>
    %cst_130 = arith.constant dense<0.000000e+00> : vector<4x256xf32>
    %269 = tpu.matmul %261, %268, %cst_130 {dimension_numbers = #tpu.dot_dimension_numbers<[1], [0], [0], [1], [0, 0, 1, 1], [], []>} : vector<4x32xf32>, vector<32x256xf32>, vector<4x256xf32> -> vector<4x256xf32>
    %270 = arith.addf %259, %269 : vector<4x256xf32>
    %c2_131 = arith.constant 2 : index
    %c0_132 = arith.constant 0 : index
    %c0_133 = arith.constant 0 : index
    %271 = vector.load %arg6[%c2_131, %c0_132, %c0_133] : memref<9x4x32xf32, #tpu.memory_space<vmem>>, vector<1x4x32xf32>
    %272 = vector.shape_cast %271 : vector<1x4x32xf32> to vector<4x32xf32>
    %273 = vector.extract_strided_slice %249 {offsets = [0, 241], sizes = [32, 15], strides = [1, 1]} : vector<32x256xf32> to vector<32x15xf32>
    %274 = vector.extract_strided_slice %249 {offsets = [0, 0], sizes = [32, 241], strides = [1, 1]} : vector<32x256xf32> to vector<32x241xf32>
    %275 = tpu.concatenate %273, %274 in 1 : vector<32x15xf32>, vector<32x241xf32> -> vector<32x256xf32>
    %c2_134 = arith.constant 2 : index
    %c0_135 = arith.constant 0 : index
    %c0_136 = arith.constant 0 : index
    %276 = vector.load %arg9[%c2_134, %c0_135, %c0_136] : memref<9x1x256xf32, #tpu.memory_space<vmem>>, vector<1x1x256xf32>
    %277 = vector.shape_cast %276 : vector<1x1x256xf32> to vector<1x256xf32>
    %278 = vector.broadcast %277 : vector<1x256xf32> to vector<32x256xf32>
    %279 = arith.mulf %275, %278 : vector<32x256xf32>
    %cst_137 = arith.constant dense<0.000000e+00> : vector<4x256xf32>
    %280 = tpu.matmul %272, %279, %cst_137 {dimension_numbers = #tpu.dot_dimension_numbers<[1], [0], [0], [1], [0, 0, 1, 1], [], []>} : vector<4x32xf32>, vector<32x256xf32>, vector<4x256xf32> -> vector<4x256xf32>
    %281 = arith.addf %270, %280 : vector<4x256xf32>
    %c3_138 = arith.constant 3 : index
    %c0_139 = arith.constant 0 : index
    %c0_140 = arith.constant 0 : index
    %282 = vector.load %arg6[%c3_138, %c0_139, %c0_140] : memref<9x4x32xf32, #tpu.memory_space<vmem>>, vector<1x4x32xf32>
    %283 = vector.shape_cast %282 : vector<1x4x32xf32> to vector<4x32xf32>
    %284 = vector.extract_strided_slice %249 {offsets = [0, 255], sizes = [32, 1], strides = [1, 1]} : vector<32x256xf32> to vector<32x1xf32>
    %285 = vector.extract_strided_slice %249 {offsets = [0, 0], sizes = [32, 255], strides = [1, 1]} : vector<32x256xf32> to vector<32x255xf32>
    %286 = tpu.concatenate %284, %285 in 1 : vector<32x1xf32>, vector<32x255xf32> -> vector<32x256xf32>
    %c3_141 = arith.constant 3 : index
    %c0_142 = arith.constant 0 : index
    %c0_143 = arith.constant 0 : index
    %287 = vector.load %arg9[%c3_141, %c0_142, %c0_143] : memref<9x1x256xf32, #tpu.memory_space<vmem>>, vector<1x1x256xf32>
    %288 = vector.shape_cast %287 : vector<1x1x256xf32> to vector<1x256xf32>
    %289 = vector.broadcast %288 : vector<1x256xf32> to vector<32x256xf32>
    %290 = arith.mulf %286, %289 : vector<32x256xf32>
    %cst_144 = arith.constant dense<0.000000e+00> : vector<4x256xf32>
    %291 = tpu.matmul %283, %290, %cst_144 {dimension_numbers = #tpu.dot_dimension_numbers<[1], [0], [0], [1], [0, 0, 1, 1], [], []>} : vector<4x32xf32>, vector<32x256xf32>, vector<4x256xf32> -> vector<4x256xf32>
    %292 = arith.addf %281, %291 : vector<4x256xf32>
    %c4_145 = arith.constant 4 : index
    %c0_146 = arith.constant 0 : index
    %c0_147 = arith.constant 0 : index
    %293 = vector.load %arg6[%c4_145, %c0_146, %c0_147] : memref<9x4x32xf32, #tpu.memory_space<vmem>>, vector<1x4x32xf32>
    %294 = vector.shape_cast %293 : vector<1x4x32xf32> to vector<4x32xf32>
    %cst_148 = arith.constant dense<0.000000e+00> : vector<4x256xf32>
    %295 = tpu.matmul %294, %249, %cst_148 {dimension_numbers = #tpu.dot_dimension_numbers<[1], [0], [0], [1], [0, 0, 1, 1], [], []>} : vector<4x32xf32>, vector<32x256xf32>, vector<4x256xf32> -> vector<4x256xf32>
    %296 = arith.addf %292, %295 : vector<4x256xf32>
    %c5_149 = arith.constant 5 : index
    %c0_150 = arith.constant 0 : index
    %c0_151 = arith.constant 0 : index
    %297 = vector.load %arg6[%c5_149, %c0_150, %c0_151] : memref<9x4x32xf32, #tpu.memory_space<vmem>>, vector<1x4x32xf32>
    %298 = vector.shape_cast %297 : vector<1x4x32xf32> to vector<4x32xf32>
    %299 = vector.extract_strided_slice %249 {offsets = [0, 1], sizes = [32, 255], strides = [1, 1]} : vector<32x256xf32> to vector<32x255xf32>
    %300 = vector.extract_strided_slice %249 {offsets = [0, 0], sizes = [32, 1], strides = [1, 1]} : vector<32x256xf32> to vector<32x1xf32>
    %301 = tpu.concatenate %299, %300 in 1 : vector<32x255xf32>, vector<32x1xf32> -> vector<32x256xf32>
    %c5_152 = arith.constant 5 : index
    %c0_153 = arith.constant 0 : index
    %c0_154 = arith.constant 0 : index
    %302 = vector.load %arg9[%c5_152, %c0_153, %c0_154] : memref<9x1x256xf32, #tpu.memory_space<vmem>>, vector<1x1x256xf32>
    %303 = vector.shape_cast %302 : vector<1x1x256xf32> to vector<1x256xf32>
    %304 = vector.broadcast %303 : vector<1x256xf32> to vector<32x256xf32>
    %305 = arith.mulf %301, %304 : vector<32x256xf32>
    %cst_155 = arith.constant dense<0.000000e+00> : vector<4x256xf32>
    %306 = tpu.matmul %298, %305, %cst_155 {dimension_numbers = #tpu.dot_dimension_numbers<[1], [0], [0], [1], [0, 0, 1, 1], [], []>} : vector<4x32xf32>, vector<32x256xf32>, vector<4x256xf32> -> vector<4x256xf32>
    %307 = arith.addf %296, %306 : vector<4x256xf32>
    %c6_156 = arith.constant 6 : index
    %c0_157 = arith.constant 0 : index
    %c0_158 = arith.constant 0 : index
    %308 = vector.load %arg6[%c6_156, %c0_157, %c0_158] : memref<9x4x32xf32, #tpu.memory_space<vmem>>, vector<1x4x32xf32>
    %309 = vector.shape_cast %308 : vector<1x4x32xf32> to vector<4x32xf32>
    %310 = vector.extract_strided_slice %249 {offsets = [0, 15], sizes = [32, 241], strides = [1, 1]} : vector<32x256xf32> to vector<32x241xf32>
    %311 = vector.extract_strided_slice %249 {offsets = [0, 0], sizes = [32, 15], strides = [1, 1]} : vector<32x256xf32> to vector<32x15xf32>
    %312 = tpu.concatenate %310, %311 in 1 : vector<32x241xf32>, vector<32x15xf32> -> vector<32x256xf32>
    %c6_159 = arith.constant 6 : index
    %c0_160 = arith.constant 0 : index
    %c0_161 = arith.constant 0 : index
    %313 = vector.load %arg9[%c6_159, %c0_160, %c0_161] : memref<9x1x256xf32, #tpu.memory_space<vmem>>, vector<1x1x256xf32>
    %314 = vector.shape_cast %313 : vector<1x1x256xf32> to vector<1x256xf32>
    %315 = vector.broadcast %314 : vector<1x256xf32> to vector<32x256xf32>
    %316 = arith.mulf %312, %315 : vector<32x256xf32>
    %cst_162 = arith.constant dense<0.000000e+00> : vector<4x256xf32>
    %317 = tpu.matmul %309, %316, %cst_162 {dimension_numbers = #tpu.dot_dimension_numbers<[1], [0], [0], [1], [0, 0, 1, 1], [], []>} : vector<4x32xf32>, vector<32x256xf32>, vector<4x256xf32> -> vector<4x256xf32>
    %318 = arith.addf %307, %317 : vector<4x256xf32>
    %c7_163 = arith.constant 7 : index
    %c0_164 = arith.constant 0 : index
    %c0_165 = arith.constant 0 : index
    %319 = vector.load %arg6[%c7_163, %c0_164, %c0_165] : memref<9x4x32xf32, #tpu.memory_space<vmem>>, vector<1x4x32xf32>
    %320 = vector.shape_cast %319 : vector<1x4x32xf32> to vector<4x32xf32>
    %321 = vector.extract_strided_slice %249 {offsets = [0, 16], sizes = [32, 240], strides = [1, 1]} : vector<32x256xf32> to vector<32x240xf32>
    %322 = vector.extract_strided_slice %249 {offsets = [0, 0], sizes = [32, 16], strides = [1, 1]} : vector<32x256xf32> to vector<32x16xf32>
    %323 = tpu.concatenate %321, %322 in 1 : vector<32x240xf32>, vector<32x16xf32> -> vector<32x256xf32>
    %c7_166 = arith.constant 7 : index
    %c0_167 = arith.constant 0 : index
    %c0_168 = arith.constant 0 : index
    %324 = vector.load %arg9[%c7_166, %c0_167, %c0_168] : memref<9x1x256xf32, #tpu.memory_space<vmem>>, vector<1x1x256xf32>
    %325 = vector.shape_cast %324 : vector<1x1x256xf32> to vector<1x256xf32>
    %326 = vector.broadcast %325 : vector<1x256xf32> to vector<32x256xf32>
    %327 = arith.mulf %323, %326 : vector<32x256xf32>
    %cst_169 = arith.constant dense<0.000000e+00> : vector<4x256xf32>
    %328 = tpu.matmul %320, %327, %cst_169 {dimension_numbers = #tpu.dot_dimension_numbers<[1], [0], [0], [1], [0, 0, 1, 1], [], []>} : vector<4x32xf32>, vector<32x256xf32>, vector<4x256xf32> -> vector<4x256xf32>
    %329 = arith.addf %318, %328 : vector<4x256xf32>
    %c8_170 = arith.constant 8 : index
    %c0_171 = arith.constant 0 : index
    %c0_172 = arith.constant 0 : index
    %330 = vector.load %arg6[%c8_170, %c0_171, %c0_172] : memref<9x4x32xf32, #tpu.memory_space<vmem>>, vector<1x4x32xf32>
    %331 = vector.shape_cast %330 : vector<1x4x32xf32> to vector<4x32xf32>
    %332 = vector.extract_strided_slice %249 {offsets = [0, 17], sizes = [32, 239], strides = [1, 1]} : vector<32x256xf32> to vector<32x239xf32>
    %333 = vector.extract_strided_slice %249 {offsets = [0, 0], sizes = [32, 17], strides = [1, 1]} : vector<32x256xf32> to vector<32x17xf32>
    %334 = tpu.concatenate %332, %333 in 1 : vector<32x239xf32>, vector<32x17xf32> -> vector<32x256xf32>
    %c8_173 = arith.constant 8 : index
    %c0_174 = arith.constant 0 : index
    %c0_175 = arith.constant 0 : index
    %335 = vector.load %arg9[%c8_173, %c0_174, %c0_175] : memref<9x1x256xf32, #tpu.memory_space<vmem>>, vector<1x1x256xf32>
    %336 = vector.shape_cast %335 : vector<1x1x256xf32> to vector<1x256xf32>
    %337 = vector.broadcast %336 : vector<1x256xf32> to vector<32x256xf32>
    %338 = arith.mulf %334, %337 : vector<32x256xf32>
    %cst_176 = arith.constant dense<0.000000e+00> : vector<4x256xf32>
    %339 = tpu.matmul %331, %338, %cst_176 {dimension_numbers = #tpu.dot_dimension_numbers<[1], [0], [0], [1], [0, 0, 1, 1], [], []>} : vector<4x32xf32>, vector<32x256xf32>, vector<4x256xf32> -> vector<4x256xf32>
    %340 = arith.addf %329, %339 : vector<4x256xf32>
    %c0_177 = arith.constant 0 : index
    %c0_178 = arith.constant 0 : index
    %341 = vector.load %arg7[%c0_177, %c0_178] : memref<4x1xf32, #tpu.memory_space<vmem>>, vector<4x1xf32>
    %342 = vector.broadcast %341 : vector<4x1xf32> to vector<4x256xf32>
    %343 = arith.addf %340, %342 : vector<4x256xf32>
    %344 = arith.negf %343 : vector<4x256xf32>
    %345 = math.exp %344 : vector<4x256xf32>
    %cst_179 = arith.constant 1.000000e+00 : f32
    %346 = vector.broadcast %cst_179 : f32 to vector<4x256xf32>
    %347 = arith.addf %346, %345 : vector<4x256xf32>
    %348 = arith.divf %346, %347 : vector<4x256xf32>
    %c0_180 = arith.constant 0 : index
    %c0_181 = arith.constant 0 : index
    %c0_182 = arith.constant 0 : index
    %349 = vector.load %arg10[%c0_180, %c0_181, %c0_182] : memref<1x4x256xf32, #tpu.memory_space<vmem>>, vector<1x4x256xf32>
    %350 = vector.shape_cast %349 : vector<1x4x256xf32> to vector<4x256xf32>
    %351 = vector.shape_cast %348 : vector<4x256xf32> to vector<1x4x256xf32>
    tpu.vector_store %arg10[%c0_180, %c0_181, %c0_182], %351 {strides = array<i32>} : memref<1x4x256xf32, #tpu.memory_space<vmem>>, vector<1x4x256xf32>,
    return
  }
  func.func @transform_0(%arg0: i32) -> (i32, i32, i32) {
    %c0_i32 = arith.constant 0 : i32
    %c0_i32_0 = arith.constant 0 : i32
    %c0_i32_1 = arith.constant 0 : i32
    return %arg0, %c0_i32, %c0_i32_0 : i32, i32, i32
  }
  func.func @transform_1(%arg0: i32) -> (i32, i32) {
    %c0_i32 = arith.constant 0 : i32
    %c0_i32_0 = arith.constant 0 : i32
    %c0_i32_1 = arith.constant 0 : i32
    return %c0_i32, %c0_i32_0 : i32, i32
  }
  func.func @transform_2(%arg0: i32) -> (i32, i32) {
    %c0_i32 = arith.constant 0 : i32
    %c0_i32_0 = arith.constant 0 : i32
    %c0_i32_1 = arith.constant 0 : i32
    return %c0_i32, %c0_i32_0 : i32, i32
  }
  func.func @transform_3(%arg0: i32) -> (i32, i32, i32) {
    %c0_i32 = arith.constant 0 : i32
    %c0_i32_0 = arith.constant 0 : i32
    %c0_i32_1 = arith.constant 0 : i32
    %c0_i32_2 = arith.constant 0 : i32
    return %c0_i32, %c0_i32_0, %c0_i32_1 : i32, i32, i32
  }
  func.func @transform_4(%arg0: i32) -> (i32, i32) {
    %c0_i32 = arith.constant 0 : i32
    %c0_i32_0 = arith.constant 0 : i32
    %c0_i32_1 = arith.constant 0 : i32
    return %c0_i32, %c0_i32_0 : i32, i32
  }
  func.func @transform_5(%arg0: i32) -> (i32, i32, i32) {
    %c0_i32 = arith.constant 0 : i32
    %c0_i32_0 = arith.constant 0 : i32
    %c0_i32_1 = arith.constant 0 : i32
    %c0_i32_2 = arith.constant 0 : i32
    return %c0_i32, %c0_i32_0, %c0_i32_1 : i32, i32, i32
  }
  func.func @transform_6(%arg0: i32) -> (i32, i32) {
    %c0_i32 = arith.constant 0 : i32
    %c0_i32_0 = arith.constant 0 : i32
    %c0_i32_1 = arith.constant 0 : i32
    return %c0_i32, %c0_i32_0 : i32, i32
  }
  func.func @transform_7(%arg0: i32) -> (i32, i32, i32) {
    %c0_i32 = arith.constant 0 : i32
    %c0_i32_0 = arith.constant 0 : i32
    %c0_i32_1 = arith.constant 0 : i32
    %c0_i32_2 = arith.constant 0 : i32
    return %c0_i32, %c0_i32_0, %c0_i32_1 : i32, i32, i32
  }
  func.func @transform_8(%arg0: i32) -> (i32, i32, i32) {
    %c0_i32 = arith.constant 0 : i32
    %c0_i32_0 = arith.constant 0 : i32
    %c0_i32_1 = arith.constant 0 : i32
    %c0_i32_2 = arith.constant 0 : i32
    return %c0_i32, %c0_i32_0, %c0_i32_1 : i32, i32, i32
  }
  func.func @transform_9(%arg0: i32) -> (i32, i32, i32) {
    %c0_i32 = arith.constant 0 : i32
    %c0_i32_0 = arith.constant 0 : i32
    %c0_i32_1 = arith.constant 0 : i32
    return %arg0, %c0_i32, %c0_i32_0 : i32, i32, i32
  }
}

</mosaic_0001>

<bundles_post_ra>
// kernel: _lambda_.1
= control target key start
LH: loop header
LB: loop body
LE: loop exit
PB: predicated region body
PF: predicated region fallthrough
CT: control target
= control target key end

     0   :  { %14 = vsyncpa [#allocation3], 0  ;;  %s7534_s0 = inlined_call_operand.vmem [shape: f32[2,1,256], index: 0, kind: input, shape index: {}]   ;;  %s7535_s1 = inlined_call_operand.hbm [shape: f32[64,25], index: 1, kind: input, shape index: {}]   ;;  %s7536_s2 = inlined_call_operand.hbm [shape: f32[64,1], index: 2, kind: input, shape index: {}]   ;;  %s7537_s3 = inlined_call_operand.hbm [shape: f32[9,32,64], index: 3, kind: input, shape index: {}]   ;;  %s7538_s4 = inlined_call_operand.hbm [shape: f32[32,1], index: 4, kind: input, shape index: {}]   ;;  %s7539_s5 = inlined_call_operand.hbm [shape: f32[9,4,32], index: 5, kind: input, shape index: {}]   ;;  %s7540_s6 = inlined_call_operand.vmem [shape: f32[4,1], index: 6, kind: input, shape index: {}]   ;;  %s7541_s7 = inlined_call_operand.vmem [shape: f32[25,1,256], index: 7, kind: input, shape index: {}]   ;;  %s7542_s8 = inlined_call_operand.hbm [shape: f32[9,1,256], index: 8, kind: input, shape index: {}]   ;;  %s7543_s9 = inlined_call_operand.vmem [shape: f32[2,4,256], index: 9, kind: output, shape index: {}]  }
   0x1   :  { %15 = vsyncpa [#allocation5], 0 }
   0x2   :  { %16 = vsyncpa [#allocation8], 0 }
   0x3   :  { %17 = vsyncpa [#allocation11], 0  ;;  %s5342_s30 = smov 0  }
   0x4 LB: > { %s5348_s10 = sadd.s32 4294967295, %s5251_s30   ;;  %p4486_p0 = scmp.ge.s32.totalorder %s5251_s30, 1  ;;  %s5251_s30 = sphi %s5342_s30, %s23_s30  }
   0x5   : > { %p248_p1 = scmp.lt.s32.totalorder %s5251_s30, 3  ;;  %p7544_p2 = scmp.eq.s32.totalorder %s5348_s10, 0 }
   0x6   : > { %s5253_s12 = smov [#allocation4]   ;;  %s5254_s14 = smov [#allocation7]  }
   0x7   : > { %p5353_p3 = pnand %p4486_p0, %p248_p1  ;;  %s273_s13 = sshll.u32 %s5253_s12, 4  ;;  %s5357_s13 = int_to_ptr.vmem [resolvable:$true] %s273_s13 }
   0x8   : > { %s299_s15 = sshll.u32 %s5254_s14, 4  ;;  %s5255_s17 = smov [#allocation2]   ;;  %s5361_s15 = int_to_ptr.vmem [resolvable:$true] %s299_s15 }
   0x9   : > { %s7591_s11 = scalar_select %p5353_p3, 1, 0 }
   0xa   : > { %p4925_p4 = pneg %p5353_p3  ;;  %s260_s18 = sshll.u32 %s5255_s17, 4  ;;  %s5369_s18 = int_to_ptr.vmem [resolvable:$true] %s260_s18 }
   0xb   : > { %s5256_s19 = smov [#allocation6]   ;;  %s5061_s23 = scalar_lea.hbm %s7536_s2, 1024 }
   0xc   : > { %p5365_p5 = pnand %p7544_p2, %p4925_p4  ;;  %s5371_s20 = sshll.u32 %s5256_s19, 4  ;;  %s287_s20 = int_to_ptr.vmem [resolvable:$true] %s5371_s20 }
   0xd   : > { %p5062_p6 = scmp.ne.s32.totalorder %s7536_s2, %s5061_s23  ;;  %p5068_p10 = scmp.lt.u32.totalorder %s5061_s23, %s7536_s2 }
   0xe   : > { %p5381_p7 = pneg %p5365_p5 }
  0x10   : > { %p5064_p8 = pnand %p5381_p7, %p5062_p6 }
  0x12   : > { %p5065_p9 = pneg %p5064_p8 }
  0x14   : > { %p5070_p11 = pnand %p5068_p10, %p5065_p9 }
  0x16   : > { %5073 = shalt.err (!%p5070_p11)
}
  0x17   : > { %s5074_s29 = scalar_lea.vmem %s5357_s13, 1024  ;;  %p5082_p1 = scmp.lt.s32.totalorder %s5357_s13, %s5357_s13 }
  0x18   : > { %p5075_p12 = scmp.ne.s32.totalorder %s5357_s13, %s5074_s29  ;;  %p5083_p4 = scmp.lt.s32.totalorder %s5074_s29, %s5074_s29 }
  0x1a   : > { %p5077_p13 = pnand %p5075_p12, %p5381_p7  ;;  %p5084_p6 = por %p5083_p4, %p5082_p1 }
  0x1c   : > { %p5078_p0 = pneg %p5077_p13 }
  0x1e   : > { %p5085_p8 = pnand %p5084_p6, %p5078_p0 }
  0x20   : > { %5088 = shalt.err (!%p5085_p8)
}
  0x21   : > { %s5257_s12 = smov 128   ;;  %s5258_s14 = smov 8  }
  0x22   : > { %4931 = dma.hbm_to_vmem [thread:$0]  (!%p5365_p5), %s7536_s2, 1024, %s5357_s13, [#allocation5], %s5257_s12, %s5257_s12, %s5258_s14  }
  0x23   : > { %s5089_s23 = scalar_lea.hbm %s7538_s4, 512 }
  0x24   : > { %p5090_p9 = scmp.ne.s32.totalorder %s7538_s4, %s5089_s23  ;;  %p5096_p12 = scmp.lt.u32.totalorder %s5089_s23, %s7538_s4 }
  0x26   : > { %p5092_p10 = pnand %p5090_p9, %p5381_p7 }
  0x28   : > { %p5093_p11 = pneg %p5092_p10 }
  0x2a   : > { %p5098_p13 = pnand %p5096_p12, %p5093_p11 }
  0x2c   : > { %5101 = shalt.err (!%p5098_p13)
}
  0x2d   : > { %s5102_s13 = scalar_lea.vmem %s5361_s15, 512  ;;  %p5110_p6 = scmp.lt.s32.totalorder %s5361_s15, %s5361_s15 }
  0x2e   : > { %p5103_p0 = scmp.ne.s32.totalorder %s5361_s15, %s5102_s13  ;;  %p5111_p8 = scmp.lt.s32.totalorder %s5102_s13, %s5102_s13 }
  0x30   : > { %p5105_p1 = pnand %p5103_p0, %p5381_p7  ;;  %p5112_p9 = por %p5111_p8, %p5110_p6 }
  0x32   : > { %p5106_p4 = pneg %p5105_p1 }
  0x34   : > { %p5113_p10 = pnand %p5112_p9, %p5106_p4 }
  0x36   : > { %5116 = shalt.err (!%p5113_p10)
}
  0x37   : > { %4937 = dma.hbm_to_vmem [thread:$0]  (!%p5365_p5), %s7538_s4, 512, %s5361_s15, [#allocation8], %s5257_s12, %s5257_s12, %s5258_s14  }
  0x38   : > { %s5117_s22 = scalar_lea.hbm %s7535_s1, 1024 }
  0x39   : > { %p5118_p11 = scmp.ne.s32.totalorder %s7535_s1, %s5117_s22  ;;  %p5124_p0 = scmp.lt.u32.totalorder %s5117_s22, %s7535_s1 }
  0x3b   : > { %p5120_p12 = pnand %p5118_p11, %p5381_p7 }
  0x3d   : > { %p5121_p13 = pneg %p5120_p12 }
  0x3f   : > { %p5126_p1 = pnand %p5124_p0, %p5121_p13 }
  0x41   : > { %5129 = shalt.err (!%p5126_p1)
}
  0x42   : > { %s5130_s15 = scalar_lea.vmem %s5369_s18, 1024  ;;  %p5138_p9 = scmp.lt.s32.totalorder %s5369_s18, %s5369_s18 }
  0x43   : > { %p5131_p4 = scmp.ne.s32.totalorder %s5369_s18, %s5130_s15  ;;  %p5139_p10 = scmp.lt.s32.totalorder %s5130_s15, %s5130_s15 }
  0x45   : > { %p5133_p6 = pnand %p5131_p4, %p5381_p7  ;;  %p5140_p11 = por %p5139_p10, %p5138_p9 }
  0x47   : > { %p5134_p8 = pneg %p5133_p6 }
  0x49   : > { %p5141_p12 = pnand %p5140_p11, %p5134_p8 }
  0x4b   : > { %5144 = shalt.err (!%p5141_p12)
}
  0x4c   : > { %4928 = dma.hbm_to_vmem [thread:$0]  (!%p5365_p5), %s7535_s1, 1024, %s5369_s18, [#allocation3], %s5257_s12, %s5257_s12, %s5258_s14  }
  0x4d   : > { %s5145_s19 = scalar_lea.hbm %s7537_s3, 4608 }
  0x4e   : > { %p5146_p13 = scmp.ne.s32.totalorder %s7537_s3, %s5145_s19  ;;  %p5152_p4 = scmp.lt.u32.totalorder %s5145_s19, %s7537_s3 }
  0x50   : > { %p5148_p0 = pnand %p5146_p13, %p5381_p7 }
  0x52   : > { %p5149_p1 = pneg %p5148_p0 }
  0x54   : > { %p5154_p6 = pnand %p5152_p4, %p5149_p1 }
  0x56   : > { %5157 = shalt.err (!%p5154_p6)
}
  0x57   : > { %s5158_s25 = scalar_lea.vmem %s287_s20, 4608  ;;  %p5166_p11 = scmp.lt.s32.totalorder %s287_s20, %s287_s20 }
  0x58   : > { %p5159_p8 = scmp.ne.s32.totalorder %s287_s20, %s5158_s25  ;;  %p5167_p12 = scmp.lt.s32.totalorder %s5158_s25, %s5158_s25 }
  0x5a   : > { %p5161_p9 = pnand %p5159_p8, %p5381_p7  ;;  %p5168_p2 = por %p5167_p12, %p5166_p11 }
  0x5c   : > { %p5162_p10 = pneg %p5161_p9 }
  0x5e   : > { %p5169_p3 = pnand %p5168_p2, %p5162_p10 }
  0x60   : > { %5172 = shalt.err (!%p5169_p3)
}
  0x61   : > { %4934 = dma.hbm_to_vmem [thread:$0]  (!%p5365_p5), %s7537_s3, 4608, %s287_s20, [#allocation5], %s5257_s12, %s5257_s12, %s5258_s14  }
  0x62   : > { %s5259_s15 = smov [#allocation9]   ;;  %s5173_s17 = scalar_lea.hbm %s7539_s5, 576 }
  0x63   : > { %s312_s28 = sshll.u32 %s5259_s15, 4  ;;  %p5174_p2 = scmp.ne.s32.totalorder %s7539_s5, %s5173_s17  ;;  %s313_s28 = int_to_ptr.vmem [resolvable:$true] %s312_s28 }
  0x64   : > { %p5180_p0 = scmp.lt.u32.totalorder %s5173_s17, %s7539_s5 }
  0x65   : > { %p5176_p3 = pnand %p5174_p2, %p5381_p7 }
  0x67   : > { %p5177_p13 = pneg %p5176_p3 }
  0x69   : > { %p5182_p1 = pnand %p5180_p0, %p5177_p13 }
  0x6b   : > { %5185 = shalt.err (!%p5182_p1)
}
  0x6c   : > { %s5186_s20 = scalar_lea.vmem %s313_s28, 576  ;;  %p5194_p9 = scmp.lt.s32.totalorder %s313_s28, %s313_s28 }
  0x6d   : > { %p5187_p4 = scmp.ne.s32.totalorder %s313_s28, %s5186_s20  ;;  %p5195_p10 = scmp.lt.s32.totalorder %s5186_s20, %s5186_s20 }
  0x6f   : > { %p5189_p6 = pnand %p5187_p4, %p5381_p7  ;;  %p5196_p11 = por %p5195_p10, %p5194_p9 }
  0x71   : > { %p5190_p8 = pneg %p5189_p6 }
  0x73   : > { %p5197_p12 = pnand %p5196_p11, %p5190_p8 }
  0x75   : > { %5200 = shalt.err (!%p5197_p12)
}
  0x76   : > { %s5260_s12 = smov 64   ;;  %s5261_s14 = smov 4  }
  0x77   : > { %4940 = dma.hbm_to_vmem [thread:$0]  (!%p5365_p5), %s7539_s5, 576, %s313_s28, [#allocation8], %s5260_s12, %s5260_s12, %s5261_s14  }
  0x78   : > { %s5262_s18 = smov [#allocation10]   ;;  %s5201_s29 = scalar_lea.hbm %s7542_s8, 288 }
  0x79   : > { %s331_s27 = sshll.u32 %s5262_s18, 4  ;;  %p5202_p2 = scmp.ne.s32.totalorder %s7542_s8, %s5201_s29  ;;  %s332_s27 = int_to_ptr.vmem [resolvable:$true] %s331_s27 }
  0x7a   : > { %p5208_p0 = scmp.lt.u32.totalorder %s5201_s29, %s7542_s8 }
  0x7b   : > { %p5204_p3 = pnand %p5202_p2, %p5381_p7 }
  0x7d   : > { %p5205_p13 = pneg %p5204_p3 }
  0x7f   : > { %p5210_p1 = pnand %p5208_p0, %p5205_p13 }
  0x81   : > { %5213 = shalt.err (!%p5210_p1)
}
  0x82   : > { %s5214_s28 = scalar_lea.vmem %s332_s27, 288  ;;  %p5222_p9 = scmp.lt.s32.totalorder %s332_s27, %s332_s27 }
  0x83   : > { %p5215_p4 = scmp.ne.s32.totalorder %s332_s27, %s5214_s28  ;;  %p5223_p10 = scmp.lt.s32.totalorder %s5214_s28, %s5214_s28 }
  0x85   : > { %p5217_p6 = pnand %p5215_p4, %p5381_p7  ;;  %p5224_p11 = por %p5223_p10, %p5222_p9 }
  0x87   : > { %p5218_p8 = pneg %p5217_p6 }
  0x89   : > { %p5225_p12 = pnand %p5224_p11, %p5218_p8 }
  0x8b   : > { %5228 = shalt.err (!%p5225_p12)
}
  0x8c   : > { %s5263_s23 = smov 32   ;;  %s5264_s20 = smov 2  }
  0x8d   : > { %4943 = dma.hbm_to_vmem [thread:$0]  (!%p5365_p5), %s7542_s8, 288, %s332_s27, [#allocation11], %s5263_s23, %s5263_s23, %s5264_s20  }
  0x8e   : > { %p7594_p2 = scmp.ne.s32.totalorder %s7591_s11, 0 }
  0x90   : > { %354 = sbr.rel (%p7594_p2) target bundleno = 1710 (0x6ae), region = 56 }
  0x97   : > { %p7595_p3 = scmp.eq.s32.totalorder %s5348_s10, 0 }
  0x99   : > { %5234 = dma.done.wait (%p7595_p3), [#allocation3], 1024   ;;  %p7596_p7 = pmov %p7595_p3 }
  0x9a   : > { %p7597_p13 = pmov %p7595_p3 }
  0x9b   : > { %5236 = vsyncadd (%p7596_p7), [#allocation3], 4294966272 }
  0x9c   : > { %5238 = dma.done.wait (%p7597_p13), [#allocation5], 5632   ;;  %p7598_p0 = pmov %p7595_p3 }
  0x9e   : > { %5240 = vsyncadd (%p7598_p0), [#allocation5], 4294961664  ;;  %p7599_p1 = pmov %p7598_p0 }
  0x9f   : > { %p7600_p5 = pmov %p7598_p0 }
  0xa0   : > { %5242 = dma.done.wait (%p7599_p1), [#allocation8], 1088  }
  0xa1   : > { %5244 = vsyncadd (%p7600_p5), [#allocation8], 4294966208  ;;  %p7601_p4 = pmov %p7598_p0 }
  0xa2   : > { %p7602_p6 = pmov %p7598_p0 }
  0xa3   : > { %5246 = dma.done.wait (%p7601_p4), [#allocation11], 288  }
  0xa4   : > { %5248 = vsyncadd (%p7602_p6), [#allocation11], 4294967008  ;;  %p409_p8 = scmp.lt.s32.totalorder %s5348_s10, 1  ;;  %v420_v0 = vlaneseq  ;;  %s5265_s25 = smov 14   ;;  %v7546_v7 = vmov 0.0   ;;  %v1206_v10 = vld [vmem:[#allocation4] sm:$0xff] }
  0xa5   : > { %s5266_s18 = smov 33   ;;  %s5267_s27 = smov 32   ;;  %1349 = vmatprep.mubr.f32.mxu0 %v7546_v7  ;;  %1818 = vmatprep.mubr.f32.mxu1 %v7546_v7  ;;  %v1207_v11 = vld [vmem:[#allocation4 + $0x8] sm:$0xff]  ;;  %v5290_v12 = vmov 0   ;;  %v1209_v15 = vld [vmem:[#allocation4 + $0x18] sm:$0xff]  ;;  %v1208_v16 = vld [vmem:[#allocation4 + $0x10] sm:$0xff] }
  0xa6   : > { %s7787_s10 = smov (!%p409_p8, %s5348_s10), 1  ;;  %v421_v1 = vshrl.u32 %v420_v0, 7  ;;  %s5268_s15 = smov 2   ;;  %5003 = vset.pattern.permute.xlu0 %v5290_v12  ;;  %5004 = vset.pattern.permute.xlu1 %v5290_v12  ;;  %v1211_v19 = vld [vmem:[#allocation4 + $0x28] sm:$0xff]  ;;  %v1210_v20 = vld [vmem:[#allocation4 + $0x20] sm:$0xff]  ;;  %v1213_v23 = vld [vmem:[#allocation4 + $0x38] sm:$0xff] }
  0xa7   : > { %s4501_s11 = sshll.u32 %s7787_s10, 1  ;;  %s5269_s13 = smov 34   ;;  %v1212_v24 = vld [vmem:[#allocation4 + $0x30] sm:$0xff]  ;;  %v5652_v33 = vld [vmem:[%s7541_s7 + $0x12] sm:$0x3]  ;;  %vm657_vm0 = vcmask 113664  }
  0xa8   : > { %v5538_v2 = vsub.s32 1, %v421_v1  ;;  %s412_s24 = scalar_lea.vmem %s7534_s0, %s4501_s11  ;;  %v5543_v3 = vsub.s32 0, %v421_v1  ;;  %s5270_s29 = smov 31   ;;  %v5657_v34 = vld [vmem:[%s7541_s7 + $0x2] sm:$0x3]  ;;  %vm457_vm1 = vcmask 269312  }
  0xa9   : > { %v418_v4 = vld [vmem:[%s412_s24] sm:$0x3]  ;;  %s5271_s17 = smov 15   ;;  %s5272_s19 = smov 1   ;;  %v5662_v35 = vld [vmem:[%s7541_s7 + $0x4] sm:$0x3] }
  0xaa   : > { %v5546_v5 = vrot.slane %v418_v4, %v5538_v2  ;;  %v5551_v6 = vrot.slane %v418_v4, %v5543_v3  ;;  %s5273_s21 = smov 30   ;;  %s5274_s22 = smov 18   ;;  %v5667_v36 = vld [vmem:[%s7541_s7 + $0x14] sm:$0x3]  ;;  %v5676_v39 = vld [vmem:[%s7541_s7] sm:$0x3]  ;;  %v668_v40 = vrot.slane %v5652_v33, %v5543_v3  ;;  %v672_v41 = vrot.slane %v5652_v33, %v5538_v2 }
  0xab   : > { %s5275_s28 = smov 127   ;;  %s5276_s23 = smov 112   ;;  %v468_v42 = vrot.slane %v5657_v34, %v5543_v3  ;;  %v472_v43 = vrot.slane %v5657_v34, %v5538_v2  ;;  %vm7548_vm2 = vcmask 261120   ;;  %v5689_v44 = vld [vmem:[%s7541_s7 + $0x6] sm:$0x3]  ;;  %v493_v45 = vrot.slane %v5662_v35, %v5543_v3 }
  0xac   : > { %652 = vrot.lane.b32.xlu1 %v5546_v5, %s5265_s25  ;;  %452 = vrot.lane.b32.xlu0 %v5546_v5, %s5266_s18  ;;  %s5277_s20 = smov 17   ;;  %s5278_s12 = smov 126   ;;  %v497_v46 = vrot.slane %v5662_v35, %v5538_v2  ;;  %vm682_vm3 = vcmask 15360   ;;  %v693_v47 = vrot.slane %v5667_v36, %v5543_v3  ;;  %v5700_v48 = vld [vmem:[%s7541_s7 + $0x10] sm:$0x3]  ;;  %v697_v50 = vrot.slane %v5667_v36, %v5538_v2 }
  0xad   : > { %s5279_s14 = smov 111   ;;  %s5280_s11 = smov 16   ;;  %v5705_v49 = vld [vmem:[%s7541_s7 + $0x16] sm:$0x3]  ;;  %vm433_vm4 = vcmask 277504   ;;  %v443_v51 = vrot.slane %v5676_v39, %v5543_v3  ;;  %v447_v52 = vrot.slane %v5676_v39, %v5538_v2  ;;  %vm507_vm5 = vcmask 252928  }
  0xae   : > { %s5281_s16 = smov 114   ;;  %s5282_s26 = smov 113   ;;  %v5716_v53 = vld [vmem:[%s7541_s7 + $0x8] sm:$0x3]  ;;  %v5723_v55 = vld [vmem:[%s7541_s7 + $0xa] sm:$0x3]  ;;  %v518_v57 = vrot.slane %v5689_v44, %v5543_v3  ;;  %v522_v58 = vrot.slane %v5689_v44, %v5538_v2  ;;  %v643_v60 = vrot.slane %v5700_v48, %v5543_v3  ;;  %v647_v61 = vrot.slane %v5700_v48, %v5538_v2 }
  0xaf   : > { %s5283_s24 = smov 110   ;;  %vm7551_vm6 = vcmask 121856   ;;  %v5734_v59 = vld [vmem:[%s7541_s7 + $0x1a] sm:$0x3]  ;;  %v718_v62 = vrot.slane %v5705_v49, %v5543_v3  ;;  %v722_v63 = vrot.slane %v5705_v49, %v5538_v2  ;;  %v5747_v0 = vld [vmem:[%s7541_s7 + $0xc] sm:$0x3]  ;;  %v543_v1 = vrot.slane %v5716_v53, %v5543_v3 }
  0xb0   : > { %655 = vrot.lane.b32.xlu1 %v5551_v6, %s5265_s25  ;;  %455 = vrot.lane.b32.xlu0 %v5551_v6, %s5266_s18  ;;  %s5284_s25 = smov 98   ;;  %s5285_s18 = smov 97   ;;  %vm1107_vm7 = vcmask 1040384   ;;  %v547_v4 = vrot.slane %v5716_v53, %v5538_v2  ;;  %v5760_v12 = vld [vmem:[%s7541_s7 + $0x1c] sm:$0x3]  ;;  %vm7550_vm8 = vcmask 7168  }
  0xb1   : > { %vm532_vm9 = vcmask 244736   ;;  %v772_v7 = vrot.slane %v5760_v12, %v5538_v2  ;;  %vm1110_vm10 = vcmask 1041408   ;;  %vm1113_vm11 = vcmask 1042432  }
  0xb2   : > { %vm557_vm12 = vcmask 146432   ;;  %vm7549_vm13 = vcmask 1039360   ;;  %vm582_vm14 = vcmask 138240   ;;  %vm756_vm15 = vcmask 1031168  }
  0xb4   : > { %480 = vrot.lane.b32.xlu1 %v5551_v6, %s5267_s27  ;;  %477 = vrot.lane.b32.xlu0 %v5546_v5, %s5267_s27  ;;  %s5286_s27 = smov 96  }
  0xb8   : > { %680 = vrot.lane.b32.xlu1 %v5551_v6, %s5268_s15  ;;  %677 = vrot.lane.b32.xlu0 %v5546_v5, %s5268_s15  ;;  %s5288_s15 = smov 95  }
  0xbc   : > { %431 = vrot.lane.b32.xlu1 %v5551_v6, %s5269_s13  ;;  %424 = vrot.lane.b32.xlu0 %v5546_v5, %s5269_s13  ;;  %s5289_s13 = smov 94  }
  0xc0   : > { %505 = vrot.lane.b32.xlu1 %v5551_v6, %s5270_s29  ;;  %502 = vrot.lane.b32.xlu0 %v5546_v5, %s5270_s29 }
  0xc4   : > { %630 = vrot.lane.b32.xlu1 %v5551_v6, %s5271_s17  ;;  %627 = vrot.lane.b32.xlu0 %v5546_v5, %s5271_s17 }
  0xc8   : > { %705 = vrot.lane.b32.xlu1 %v5551_v6, %s5272_s19  ;;  %702 = vrot.lane.b32.xlu0 %v5546_v5, %s5272_s19 }
  0xcc   : > { %530 = vrot.lane.b32.xlu1 %v5551_v6, %s5273_s21  ;;  %527 = vrot.lane.b32.xlu0 %v5546_v5, %s5273_s21 }
  0xd0   : > { %555 = vrot.lane.b32.xlu1 %v5551_v6, %s5274_s22  ;;  %552 = vrot.lane.b32.xlu0 %v5546_v5, %s5274_s22 }
  0xd4   : > { %729 = vrot.lane.b32.xlu1 %v5546_v5, %s5275_s28  ;;  %727 = vrot.lane.b32.xlu0 %v5551_v6, %s5275_s28 }
  0xd8   : > { %829 = vrot.lane.b32.xlu1 %v5546_v5, %s5276_s23  ;;  %827 = vrot.lane.b32.xlu0 %v5551_v6, %s5276_s23 }
  0xdc   : > { %580 = vrot.lane.b32.xlu1 %v5551_v6, %s5277_s20  ;;  %577 = vrot.lane.b32.xlu0 %v5546_v5, %s5277_s20 }
  0xe0   : > { %754 = vrot.lane.b32.xlu1 %v5546_v5, %s5278_s12  ;;  %752 = vrot.lane.b32.xlu0 %v5551_v6, %s5278_s12 }
  0xe4   : > { %854 = vrot.lane.b32.xlu1 %v5546_v5, %s5279_s14  ;;  %852 = vrot.lane.b32.xlu0 %v5551_v6, %s5279_s14 }
  0xe8   : > { %605 = vrot.lane.b32.xlu1 %v5551_v6, %s5280_s11  ;;  %602 = vrot.lane.b32.xlu0 %v5546_v5, %s5280_s11 }
  0xec   : > { %779 = vrot.lane.b32.xlu1 %v5546_v5, %s5281_s16  ;;  %777 = vrot.lane.b32.xlu0 %v5551_v6, %s5281_s16 }
  0xf0   : > { %804 = vrot.lane.b32.xlu1 %v5546_v5, %s5282_s26  ;;  %802 = vrot.lane.b32.xlu0 %v5551_v6, %s5282_s26 }
  0xf4   : > { %879 = vrot.lane.b32.xlu1 %v5546_v5, %s5283_s24  ;;  %877 = vrot.lane.b32.xlu0 %v5551_v6, %s5283_s24 }
  0xf8   : > { %904 = vrot.lane.b32.xlu1 %v5546_v5, %s5284_s25  ;;  %902 = vrot.lane.b32.xlu0 %v5551_v6, %s5284_s25 }
  0xfc   : > { %929 = vrot.lane.b32.xlu1 %v5546_v5, %s5285_s18  ;;  %927 = vrot.lane.b32.xlu0 %v5551_v6, %s5285_s18 }
 0x100   : > { %954 = vrot.lane.b32.xlu1 %v5546_v5, %s5286_s27  ;;  %952 = vrot.lane.b32.xlu0 %v5551_v6, %s5286_s27 }
 0x104   : > { %979 = vrot.lane.b32.xlu1 %v5546_v5, %s5288_s15  ;;  %977 = vrot.lane.b32.xlu0 %v5551_v6, %s5288_s15 }
 0x108   : > { %1004 = vrot.lane.b32.xlu1 %v5546_v5, %s5289_s13  ;;  %1002 = vrot.lane.b32.xlu0 %v5551_v6, %s5289_s13 }
 0x10c   : > { %1216 = vperm.xlu0 %5003, %v1206_v10   ;;  %1221 = vperm.xlu1 %5004, %v1207_v11   ;;  %v568_v10 = vrot.slane %v5723_v55, %v5543_v3 }
 0x110   : > { %1231 = vperm.xlu0 %5003, %v1209_v15   ;;  %1226 = vperm.xlu1 %5004, %v1208_v16   ;;  %v5765_v15 = vld [vmem:[%s7541_s7 + $0xe] sm:$0x3] }
 0x114   : > { %1241 = vperm.xlu0 %5003, %v1211_v19   ;;  %1236 = vperm.xlu1 %5004, %v1210_v20  }
 0x118   : > { %1251 = vperm.xlu0 %5003, %v1213_v23   ;;  %1246 = vperm.xlu1 %5004, %v1212_v24  }
 0x11e   : > { %v5617_v8 = vpop.permute.xlu1 %652  ;;  %v5619_v9 = vpop.permute.xlu0 %452 }
 0x122   : > { %v5621_v13 = vpop.permute.xlu1 %655  ;;  %v5623_v14 = vpop.permute.xlu0 %455 }
 0x123   : > { %v658_v16 = vsel %vm657_vm0, %v5621_v13, %v5617_v8  ;;  %v661_v19 = vsel %vm657_vm0, %v5617_v8, %v5621_v13  ;;  %v458_v34 = vsel %vm457_vm1, %v5623_v14, %v5619_v9  ;;  %v461_v39 = vsel %vm457_vm1, %v5619_v9, %v5623_v14 }
 0x124   : > { %v675_v9 = vmul.f32 %v668_v40, %v661_v19  ;;  %v676_v14 = vmul.f32 %v672_v41, %v658_v16  ;;  %v475_v13 = vmul.f32 %v468_v42, %v461_v39  ;;  %v476_v11 = vmul.f32 %v472_v43, %v458_v34  ;;  %v5818_v19 = vld [vmem:[%s7541_s7 + $0x1e] sm:$0x3] }
 0x125   : > { %v793_v23 = vrot.slane %v5818_v19, %v5543_v3  ;;  %vm607_vm0 = vcmask 130048   ;;  %vm781_vm1 = vcmask 932864  }
 0x126   : > { %v5625_v17 = vpop.permute.xlu1 %480  ;;  %v5627_v18 = vpop.permute.xlu0 %477  ;;  %v1071_v35 = vrot.slane %v675_v9, 7 }
 0x12a   : > { %v5629_v21 = vpop.permute.xlu1 %680  ;;  %v5631_v22 = vpop.permute.xlu0 %677 }
 0x12e   : > { %v5633_v25 = vpop.permute.xlu1 %431  ;;  %v5635_v26 = vpop.permute.xlu0 %424 }
 0x12f   : > { %v434_v8 = vsel %vm433_vm4, %v5633_v25, %v5635_v26  ;;  %v437_v44 = vsel %vm433_vm4, %v5635_v26, %v5633_v25  ;;  %v483_v25 = vsel %vm7548_vm2, %v5625_v17, %v5627_v18  ;;  %v486_v26 = vsel %vm7548_vm2, %v5627_v18, %v5625_v17 }
 0x130   : > { %v450_v42 = vmul.f32 %v443_v51, %v437_v44  ;;  %v451_v43 = vmul.f32 %v447_v52, %v434_v8  ;;  %v1030_v51 = vrot.slane %v476_v11, 7  ;;  %v500_v52 = vmul.f32 %v493_v45, %v486_v26 }
 0x131   : > { %vm1119_vm4 = vcmask 1044480   ;;  %vm881_vm2 = vcmask 900096  }
 0x132   : > { %v5637_v27 = vpop.permute.xlu1 %505  ;;  %v5639_v28 = vpop.permute.xlu0 %502 }
 0x133   : > { %v508_v24 = vsel %vm507_vm5, %v5637_v27, %v5639_v28  ;;  %v511_v40 = vsel %vm507_vm5, %v5639_v28, %v5637_v27  ;;  %v683_v27 = vsel %vm682_vm3, %v5629_v21, %v5631_v22  ;;  %v686_v28 = vsel %vm682_vm3, %v5631_v22, %v5629_v21 }
 0x134   : > { %v525_v17 = vmul.f32 %v518_v57, %v511_v40  ;;  %v526_v18 = vmul.f32 %v522_v58, %v508_v24  ;;  %v797_v21 = vrot.slane %v5818_v19, %v5538_v2  ;;  %v1029_v22 = vrot.slane %v475_v13, 7  ;;  %v4519_v19 = vld [vmem:[%s7541_s7 + $0x22] sm:$0x3] }
 0x135   : > { %v700_v58 = vmul.f32 %v693_v47, %v686_v28  ;;  %v701_v24 = vmul.f32 %v697_v50, %v683_v27  ;;  %v1109_v13 = vsel %vm1107_vm7, %v451_v43, %v1030_v51  ;;  %vm1116_vm3 = vcmask 1043456  }
 0x136   : > { %v5641_v29 = vpop.permute.xlu1 %630  ;;  %v5643_v30 = vpop.permute.xlu0 %627  ;;  %v1108_v8 = vsel %vm1107_vm7, %v450_v42, %v1029_v22  ;;  %v1041_v47 = vrot.slane %v525_v17, 5  ;;  %v1042_v44 = vrot.slane %v526_v18, 5  ;;  %vm1122_vm5 = vcmask 1045504  }
 0x137   : > { %v633_v34 = vsel %vm7551_vm6, %v5641_v29, %v5643_v30  ;;  %v636_v39 = vsel %vm7551_vm6, %v5643_v30, %v5641_v29  ;;  %v501_v29 = vmul.f32 %v497_v46, %v483_v25  ;;  %v1072_v46 = vrot.slane %v676_v14, 7 }
 0x138   : > { %v650_v11 = vmul.f32 %v643_v60, %v636_v39  ;;  %v651_v45 = vmul.f32 %v647_v61, %v633_v34  ;;  %v1035_v60 = vrot.slane %v500_v52, 6  ;;  %v1077_v25 = vrot.slane %v700_v58, 6 }
 0x139   : > { %v1036_v48 = vrot.slane %v501_v29, 6  ;;  %v1078_v26 = vrot.slane %v701_v24, 6  ;;  %vm956_vm6 = vcmask 785408  }
 0x13a   : > { %v5645_v31 = vpop.permute.xlu1 %705  ;;  %v5647_v32 = vpop.permute.xlu0 %702  ;;  %v1128_v27 = vsel %vm1107_vm7, %v650_v11, %v1071_v35  ;;  %v1129_v28 = vsel %vm1107_vm7, %v651_v45, %v1072_v46  ;;  %v7605_v45 = vrot.slane %v5734_v59, %v5538_v2  ;;  %v7606_v46 = vrot.slane %v5747_v0, %v5543_v3 }
 0x13b   : > { %v708_v36 = vsel %vm7550_vm8, %v5645_v31, %v5647_v32  ;;  %v711_v50 = vsel %vm7550_vm8, %v5647_v32, %v5645_v31  ;;  %v1111_v31 = vsel %vm1110_vm10, %v1108_v8, %v1035_v60  ;;  %v1112_v32 = vsel %vm1110_vm10, %v1109_v13, %v1036_v48 }
 0x13c   : > { %v725_v42 = vmul.f32 %v718_v62, %v711_v50  ;;  %v1115_v43 = vsel %vm1113_vm11, %v1112_v32, %v1042_v44  ;;  %v1130_v62 = vsel %vm1110_vm10, %v1128_v27, %v1077_v25  ;;  %v1131_v17 = vsel %vm1110_vm10, %v1129_v28, %v1078_v26 }
 0x13d   : > { %v7608_v44 = vrot.slane %v5760_v12, %v5543_v3  ;;  %vm931_vm8 = vcmask 793600  }
 0x13e   : > { %v5669_v37 = vpop.permute.xlu1 %530  ;;  %v5671_v38 = vpop.permute.xlu0 %527  ;;  %v1083_v52 = vrot.slane %v725_v42, 5 }
 0x13f   : > { %v533_v61 = vsel %vm532_vm9, %v5669_v37, %v5671_v38  ;;  %v536_v9 = vsel %vm532_vm9, %v5671_v38, %v5669_v37  ;;  %v726_v37 = vmul.f32 %v722_v63, %v708_v36  ;;  %v1114_v38 = vsel %vm1113_vm11, %v1111_v31, %v1041_v47 }
 0x140   : > { %v550_v34 = vmul.f32 %v543_v1, %v536_v9  ;;  %v551_v39 = vmul.f32 %v547_v4, %v533_v61  ;;  %vm1125_vm9 = vcmask 1046528   ;;  %v1132_v48 = vsel %vm1113_vm11, %v1130_v62, %v1083_v52 }
 0x141   : > { %v1084_v29 = vrot.slane %v726_v37, 5 }
 0x142   : > { %v5718_v54 = vpop.permute.xlu1 %555  ;;  %v5725_v56 = vpop.permute.xlu0 %552  ;;  %v1047_v58 = vrot.slane %v550_v34, 4  ;;  %v1048_v24 = vrot.slane %v551_v39, 4 }
 0x143   : > { %v558_v49 = vsel %vm557_vm12, %v5718_v54, %v5725_v56  ;;  %v561_v63 = vsel %vm557_vm12, %v5725_v56, %v5718_v54  ;;  %v1133_v61 = vsel %vm1113_vm11, %v1131_v17, %v1084_v29  ;;  %vm7552_vm12 = vcmask 916480  }
 0x144   : > { %v575_v11 = vmul.f32 %v568_v10, %v561_v63  ;;  %v7607_v10 = vrot.slane %v5747_v0, %v5538_v2  ;;  %v7609_v0 = vrot.slane %v5765_v15, %v5543_v3  ;;  %v1117_v12 = vsel %vm1116_vm3, %v1114_v38, %v1047_v58 }
 0x146   : > { %v5773_v20 = vpop.permute.xlu1 %729  ;;  %v5779_v33 = vpop.permute.xlu0 %727  ;;  %v1053_v25 = vrot.slane %v575_v11, 3  ;;  %v4518_v11 = vld [vmem:[%s7541_s7 + $0x20] sm:$0x3] }
 0x147   : > { %v732_v53 = vsel %vm7549_vm13, %v5779_v33, %v5773_v20  ;;  %v736_v1 = vsel %vm7549_vm13, %v5773_v20, %v5779_v33  ;;  %v7603_v20 = vrot.slane %v5723_v55, %v5538_v2  ;;  %vm906_vm13 = vcmask 801792  }
 0x148   : > { %v751_v35 = vmul.f32 %v7605_v45, %v736_v1  ;;  %v1120_v1 = vsel %vm1119_vm4, %v1117_v12, %v1053_v25  ;;  %v4521_v45 = vld [vmem:[%s7541_s7 + $0x26] sm:$0x3]  ;;  %v6009_v25 = vld [vmem:[%s7541_s7 + $0x2e] sm:$0x3] }
 0x149   : > { %v576_v33 = vmul.f32 %v7603_v20, %v558_v49 }
 0x14a   : > { %v5811_v41 = vpop.permute.xlu1 %829  ;;  %v5813_v16 = vpop.permute.xlu0 %827  ;;  %v1092_v28 = vrot.slane %v751_v35, 3 }
 0x14b   : > { %v1054_v26 = vrot.slane %v576_v33, 3 }
 0x14e   : > { %v581_v30 = vpop.permute.xlu1 %580  ;;  %v578_v57 = vpop.permute.xlu0 %577 }
 0x14f   : > { %v583_v4 = vsel %vm582_vm14, %v581_v30, %v578_v57  ;;  %v586_v51 = vsel %vm582_vm14, %v578_v57, %v581_v30  ;;  %v7604_v30 = vrot.slane %v5734_v59, %v5543_v3 }
 0x150   : > { %v600_v8 = vmul.f32 %v7606_v46, %v586_v51  ;;  %v601_v13 = vmul.f32 %v7607_v10, %v583_v4  ;;  %v1134_v4 = vsel %vm1116_vm3, %v1132_v48, %v5551_v6  ;;  %v847_v10 = vrot.slane %v4519_v19, %v5538_v2 }
 0x151   : > { %v750_v57 = vmul.f32 %v7604_v30, %v732_v53  ;;  %v1135_v53 = vsel %vm1116_vm3, %v1133_v61, %v5546_v5  ;;  %v4520_v5 = vld [vmem:[%s7541_s7 + $0x24] sm:$0x3]  ;;  %v893_v48 = vrot.slane %v4521_v45, %v5543_v3  ;;  %v897_v61 = vrot.slane %v4521_v45, %v5538_v2 }
 0x152   : > { %v755_v14 = vpop.permute.xlu1 %754  ;;  %v753_v40 = vpop.permute.xlu0 %752  ;;  %v1059_v31 = vrot.slane %v600_v8, 2  ;;  %v1060_v32 = vrot.slane %v601_v13, 2  ;;  %v843_v8 = vrot.slane %v4519_v19, %v5543_v3  ;;  %v868_v13 = vrot.slane %v4520_v5, %v5543_v3 }
 0x153   : > { %v757_v54 = vsel %vm756_vm15, %v753_v40, %v755_v14  ;;  %v761_v56 = vsel %vm756_vm15, %v755_v14, %v753_v40  ;;  %v7610_v14 = vrot.slane %v5765_v15, %v5538_v2  ;;  %v1091_v27 = vrot.slane %v750_v57, 3 }
 0x154   : > { %v775_v36 = vmul.f32 %v7608_v44, %v757_v54  ;;  %v776_v50 = vmul.f32 %v772_v7, %v761_v56  ;;  %v1118_v7 = vsel %vm1116_vm3, %v1115_v43, %v1048_v24  ;;  %v1123_v58 = vsel %vm1122_vm5, %v1120_v1, %v1059_v31  ;;  %v4522_v44 = vld [vmem:[%s7541_s7 + $0x28] sm:$0x3] }
 0x155   : > { %v1121_v63 = vsel %vm1119_vm4, %v1118_v7, %v1054_v26  ;;  %v1136_v56 = vsel %vm1119_vm4, %v1134_v4, %v1091_v27  ;;  %vm856_vm15 = vcmask 908288   ;;  %v832_v26 = vsel %vm7552_vm12, %v5813_v16, %v5811_v41 }
 0x156   : > { %v5900_v18 = vpop.permute.xlu1 %854  ;;  %v5902_v22 = vpop.permute.xlu0 %852  ;;  %v1097_v34 = vrot.slane %v775_v36, 2  ;;  %v1098_v39 = vrot.slane %v776_v50, 2  ;;  %v4523_v36 = vld [vmem:[%s7541_s7 + $0x2a] sm:$0x3]  ;;  %v872_v50 = vrot.slane %v4520_v5, %v5538_v2  ;;  %v836_v7 = vsel %vm7552_vm12, %v5811_v41, %v5813_v16 }
 0x157   : > { %v857_v31 = vsel %vm856_vm15, %v5902_v22, %v5900_v18  ;;  %vm981_vm12 = vcmask 777216   ;;  %v993_v16 = vrot.slane %v6009_v25, %v5543_v3 }
 0x158   : > { %v1138_v24 = vsel %vm1122_vm5, %v1136_v56, %v1097_v34 }
 0x15a   : > { %v606_v47 = vpop.permute.xlu1 %605  ;;  %v603_v55 = vpop.permute.xlu0 %602 }
 0x15b   : > { %v608_v59 = vsel %vm607_vm0, %v606_v47, %v603_v55  ;;  %v611_v60 = vsel %vm607_vm0, %v603_v55, %v606_v47 }
 0x15c   : > { %v625_v9 = vmul.f32 %v7609_v0, %v611_v60  ;;  %v626_v40 = vmul.f32 %v7610_v14, %v608_v59  ;;  %v818_v59 = vrot.slane %v4518_v11, %v5543_v3  ;;  %v822_v60 = vrot.slane %v4518_v11, %v5538_v2  ;;  %v4524_v0 = vld [vmem:[%s7541_s7 + $0x2c] sm:$0x3] }
 0x15d   : > { %v922_v14 = vrot.slane %v4522_v44, %v5538_v2 }
 0x15e   : > { %v780_v42 = vpop.permute.xlu1 %779  ;;  %v778_v37 = vpop.permute.xlu0 %777  ;;  %v1065_v15 = vrot.slane %v625_v9, 1  ;;  %v1066_v49 = vrot.slane %v626_v40, 1  ;;  %v918_v9 = vrot.slane %v4522_v44, %v5543_v3  ;;  %v943_v40 = vrot.slane %v4523_v36, %v5543_v3 }
 0x15f   : > { %v782_v62 = vsel %vm781_vm1, %v778_v37, %v780_v42  ;;  %v786_v17 = vsel %vm781_vm1, %v780_v42, %v778_v37  ;;  %vm806_vm1 = vcmask 924672   ;;  %v968_v42 = vrot.slane %v4524_v0, %v5543_v3 }
 0x160   : > { %v800_v43 = vmul.f32 %v793_v23, %v782_v62  ;;  %v801_v38 = vmul.f32 %v797_v21, %v786_v17  ;;  %v1137_v23 = vsel %vm1119_vm4, %v1135_v53, %v1092_v28  ;;  %v1124_v21 = vsel %vm1122_vm5, %v1121_v63, %v1060_v32 }
 0x161   : > { %v1139_v6 = vsel %vm1122_vm5, %v1137_v23, %v1098_v39  ;;  %v1127_v20 = vsel %vm1125_vm9, %v1124_v21, %v1066_v49  ;;  %v1126_v30 = vsel %vm1125_vm9, %v1123_v58, %v1065_v15  ;;  %v947_v28 = vrot.slane %v4523_v36, %v5538_v2 }
 0x162   : > { %v1103_v51 = vrot.slane %v800_v43, 1  ;;  %v1104_v52 = vrot.slane %v801_v38, 1  ;;  %v805_v29 = vpop.permute.xlu1 %804  ;;  %v803_v54 = vpop.permute.xlu0 %802  ;;  %v861_v32 = vsel %vm856_vm15, %v5900_v18, %v5902_v22  ;;  %v972_v37 = vrot.slane %v4524_v0, %v5538_v2 }
 0x163   : > { %v807_v34 = vsel %vm806_vm1, %v803_v54, %v805_v29  ;;  %v811_v41 = vsel %vm806_vm1, %v805_v29, %v803_v54  ;;  %v850_v39 = vmul.f32 %v843_v8, %v832_v26  ;;  %v851_v62 = vmul.f32 %v847_v10, %v836_v7 }
 0x164   : > { %v1141_v33 = vsel %vm1125_vm9, %v1139_v6, %v1104_v52  ;;  %v1140_v57 = vsel %vm1125_vm9, %v1138_v24, %v1103_v51  ;;  %v875_v49 = vmul.f32 %v868_v13, %v857_v31  ;;  %v876_v18 = vmul.f32 %v872_v50, %v861_v32 }
 0x165   : > { %v4587_v35 = vpack.c.bf16 %v1141_v33, %v1127_v20  ;;  %v4589_v46 = vpack.c.bf16 %v1140_v57, %v1126_v30  ;;  %v825_v53 = vmul.f32 %v818_v59, %v807_v34  ;;  %v826_v1 = vmul.f32 %v822_v60, %v811_v41  ;;  %v4526_v33 = vld [vmem:[%s7541_s7 + $0x30] sm:$0x3] }
 0x166   : > { %v880_v47 = vpop.permute.xlu1 %879  ;;  %v878_v55 = vpop.permute.xlu0 %877  ;;  %v997_v54 = vrot.slane %v6009_v25, %v5538_v2  ;;  %v1144_v23 = vrot.slane %v850_v39, 7  ;;  %v1145_v56 = vrot.slane %v851_v62, 7  ;;  %v1150_v21 = vrot.slane %v875_v49, 6 }
 0x167   : > { %4588 = vmatprep.subr.bf16.mxu0 %v4587_v35  ;;  %v882_v17 = vsel %vm881_vm2, %v878_v55, %v880_v47  ;;  %v886_v15 = vsel %vm881_vm2, %v880_v47, %v878_v55  ;;  %vm1006_vm2 = vcmask 769024   ;;  %v1151_v6 = vrot.slane %v876_v18, 6 }
 0x168   : > { %4590 = vmatpush1.bf16.msra.mxu0 %v4589_v46  ;;  %v900_v52 = vmul.f32 %v893_v48, %v882_v17  ;;  %v901_v29 = vmul.f32 %v897_v61, %v886_v15  ;;  %v1184_v30 = vsel %vm1107_vm7, %v825_v53, %v1144_v23  ;;  %v1185_v57 = vsel %vm1107_vm7, %v826_v1, %v1145_v56  ;;  %v1198_v53 = vld [vmem:[#allocation2] sm:$0xff]  ;;  %v1204_v23 = vld [vmem:[#allocation2 + $0x30] sm:$0xff]  ;;  %v1205_v56 = vld [vmem:[#allocation2 + $0x38] sm:$0xff] }
 0x169   : > { %v1018_v44 = vrot.slane %v4526_v33, %v5543_v3  ;;  %v1022_v36 = vrot.slane %v4526_v33, %v5538_v2  ;;  %v1186_v50 = vsel %vm1110_vm10, %v1184_v30, %v1150_v21  ;;  %v1187_v59 = vsel %vm1110_vm10, %v1185_v57, %v1151_v6 }
 0x16a   : > { %v905_v12 = vpop.permute.xlu1 %904  ;;  %v903_v27 = vpop.permute.xlu0 %902  ;;  %v1156_v46 = vrot.slane %v900_v52, 5  ;;  %v1157_v8 = vrot.slane %v901_v29, 5  ;;  %vm1254_vm10 = vcmask 203776   ;;  %v7611_v1 = vmov 0.0   ;;  %v1201_v52 = vld [vmem:[#allocation2 + $0x18] sm:$0xff]  ;;  %v1202_v29 = vld [vmem:[#allocation2 + $0x20] sm:$0xff] }
 0x16b   : > { %v907_v22 = vsel %vm906_vm13, %v903_v27, %v905_v12  ;;  %v911_v43 = vsel %vm906_vm13, %v905_v12, %v903_v27 }
 0x16c   : > { %v925_v19 = vmul.f32 %v918_v9, %v907_v22  ;;  %v926_v5 = vmul.f32 %v922_v14, %v911_v43  ;;  %v1188_v26 = vsel %vm1113_vm11, %v1186_v50, %v1156_v46  ;;  %v1189_v7 = vsel %vm1113_vm11, %v1187_v59, %v1157_v8 }
 0x16e   : > { %v930_v38 = vpop.permute.xlu1 %929  ;;  %v928_v63 = vpop.permute.xlu0 %927  ;;  %v1162_v47 = vrot.slane %v925_v19, 4  ;;  %v1163_v55 = vrot.slane %v926_v5, 4 }
 0x16f   : > { %v932_v4 = vsel %vm931_vm8, %v928_v63, %v930_v38  ;;  %v936_v51 = vsel %vm931_vm8, %v930_v38, %v928_v63 }
 0x170   : > { %v950_v58 = vmul.f32 %v943_v40, %v932_v4  ;;  %v951_v24 = vmul.f32 %v947_v28, %v936_v51  ;;  %v1190_v28 = vsel %vm1116_vm3, %v1188_v26, %v1162_v47  ;;  %v1191_v31 = vsel %vm1116_vm3, %v1189_v7, %v1163_v55  ;;  %v1199_v4 = vld [vmem:[#allocation2 + $0x8] sm:$0xff]  ;;  %v1200_v51 = vld [vmem:[#allocation2 + $0x10] sm:$0xff] }
 0x172   : > { %v955_v11 = vpop.permute.xlu1 %954  ;;  %v953_v20 = vpop.permute.xlu0 %952  ;;  %v1168_v60 = vrot.slane %v950_v58, 3  ;;  %v1169_v48 = vrot.slane %v951_v24, 3 }
 0x173   : > { %v957_v45 = vsel %vm956_vm6, %v953_v20, %v955_v11  ;;  %v961_v35 = vsel %vm956_vm6, %v955_v11, %v953_v20  ;;  %vm5291_vm6 = vmmov 1  }
 0x174   : > { %v975_v10 = vmul.f32 %v968_v42, %v957_v45  ;;  %v976_v13 = vmul.f32 %v972_v37, %v961_v35  ;;  %v1192_v32 = vsel %vm1119_vm4, %v1190_v28, %v1168_v60  ;;  %v1193_v42 = vsel %vm1119_vm4, %v1191_v31, %v1169_v48  ;;  %vm4592_vm8 = vmpackc.low %vm1107_vm7, %vm5291_vm6 }
 0x175   : > { %vm7644_vm7 = vcmask 121856  }
 0x176   : > { %v980_v61 = vpop.permute.xlu1 %979  ;;  %v978_v0 = vpop.permute.xlu0 %977  ;;  %v1174_v9 = vrot.slane %v975_v10, 2  ;;  %v1175_v14 = vrot.slane %v976_v13, 2  ;;  %vm7645_vm11 = vmmov %vm7644_vm7 }
 0x177   : > { %v982_v40 = vsel %vm981_vm12, %v978_v0, %v980_v61  ;;  %v986_v25 = vsel %vm981_vm12, %v980_v61, %v978_v0  ;;  %vm7646_vm13 = vmmov %vm7644_vm7 }
 0x178   : > { %v1000_v12 = vmul.f32 %v993_v16, %v982_v40  ;;  %v1001_v27 = vmul.f32 %v997_v54, %v986_v25  ;;  %v1194_v62 = vsel %vm1122_vm5, %v1192_v32, %v1174_v9  ;;  %v1195_v17 = vsel %vm1122_vm5, %v1193_v42, %v1175_v14  ;;  %v1203_v54 = vld [vmem:[#allocation2 + $0x28] sm:$0xff]  ;;  %vm7647_vm3 = vmmov %vm7644_vm7 }
 0x179   : > { %vm7648_vm4 = vmmov %vm7647_vm3 }
 0x17a   : > { %v1180_v37 = vrot.slane %v1000_v12, 1  ;;  %v1181_v34 = vrot.slane %v1001_v27, 1  ;;  %v1005_v41 = vpop.permute.xlu1 %1004  ;;  %v1003_v39 = vpop.permute.xlu0 %1002  ;;  %vm7649_vm5 = vmmov %vm7647_vm3 }
 0x17b   : > { %v1007_v15 = vsel %vm1006_vm2, %v1003_v39, %v1005_v41  ;;  %v1011_v16 = vsel %vm1006_vm2, %v1005_v41, %v1003_v39  ;;  %vm7651_vm12 = vmmov %vm7647_vm3 }
 0x17c   : > { %v1196_v49 = vsel %vm1125_vm9, %v1194_v62, %v1180_v37  ;;  %v1197_v18 = vsel %vm1125_vm9, %v1195_v17, %v1181_v34  ;;  %v1025_v22 = vmul.f32 %v1018_v44, %v1007_v15  ;;  %v1026_v43 = vmul.f32 %v1022_v36, %v1011_v16  ;;  %vm7650_vm9 = vmmov %vm7647_vm3 }
 0x17d   : > { %vm7652_vm2 = vmmov %vm7647_vm3 }
 0x17e   : > { %v4591_v38 = vpack.c.bf16 %v1026_v43, %v1197_v18  ;;  %v4594_v63 = vpack.c.bf16 %v1025_v22, %v1196_v49  ;;  %vm7653_vm6 = vmmov %vm7652_vm2 }
 0x180   : > { %4593 = vmatprep.subr.msk.bf16.mxu0 %vm4592_vm8, %v4591_v38 }
 0x181   : > { %4596 = vmatpush1.bf16.msk.msra.mxu0 %vm4592_vm8, %v4594_v63  ;;  %vm1640_vm8 = vcmask 523264  }
 0x184   : > { %4529 = vmatmul.mubr.msk.f32.vlgmr.msra.gmra.mrb[0].mxu0 %vm1254_vm10, %v1198_v53 }
 0x185   : > { %1355 = vmatprep.mubr.f32.mxu0 %v7611_v1 }
 0x188   : > { %4530 = vmatmul.mubr.msk.f32.gmra.mrb[2].mxu0 %vm1254_vm10, %v1199_v4 }
 0x189   : > { %1361 = vmatprep.mubr.f32.mxu0 %v7611_v1 }
 0x18b   : > { %v1217_v19 = vpop.permute.xlu0 %1216  ;;  %v1222_v20 = vpop.permute.xlu1 %1221 }
 0x18c   : > { %4531 = vmatmul.mubr.msk.f32.gmra.mrb[4].mxu0 %vm1254_vm10, %v1200_v51 }
 0x18d   : > { %1367 = vmatprep.mubr.f32.mxu0 %v7611_v1 }
 0x18f   : > { %v1227_v0 = vpop.permute.xlu1 %1226  ;;  %v1232_v40 = vpop.permute.xlu0 %1231 }
 0x190   : > { %4532 = vmatmul.mubr.msk.f32.gmra.mrb[6].mxu0 %vm1254_vm10, %v1201_v52 }
 0x191   : > { %1373 = vmatprep.mubr.f32.mxu0 %v7611_v1 }
 0x193   : > { %v1237_v31 = vpop.permute.xlu1 %1236  ;;  %v1242_v37 = vpop.permute.xlu0 %1241 }
 0x194   : > { %4533 = vmatmul.mubr.msk.f32.gmra.mrb[8].mxu0 %vm1254_vm10, %v1202_v29 }
 0x195   : > { %1379 = vmatprep.mubr.f32.mxu0 %v7611_v1 }
 0x197   : > { %v1247_v16 = vpop.permute.xlu1 %1246  ;;  %v1252_v49 = vpop.permute.xlu0 %1251 }
 0x198   : > { %4534 = vmatmul.mubr.msk.f32.gmra.mrb[10].mxu0 %vm1254_vm10, %v1203_v54 }
 0x199   : > { %1385 = vmatprep.mubr.f32.mxu0 %v7611_v1 }
 0x19c   : > { %4535 = vmatmul.mubr.msk.f32.gmra.mrb[12].mxu0 %vm1254_vm10, %v1204_v23 }
 0x19d   : > { %1391 = vmatprep.mubr.f32.mxu0 %v7611_v1 }
 0x1a0   : > { %4536 = vmatmul.mubr.msk.f32.gmra.mrb[14].mxu0 %vm1254_vm10, %v1205_v56  ;;  %vm7654_vm10 = vmmov %vm7652_vm2 }
 0x1a1   : > { %1717 = vmatprep.mubr.f32.mxu0 %v7611_v1 }
 0x257   : > { %v1351_v5 = vpop.f32.mrb[0].mxu0 }
 0x258   : > { %v1352_v21 = vadd.f32 %v1351_v5, %v1217_v19  ;;  %v1353_v6 = vpop.f32.mrb[1].mxu0 }
 0x259   : > { %v1354_v58 = vadd.f32 %v1353_v6, %v1217_v19 }
 0x25a   : > { %5005 = vtanh.f32 %v1352_v21 }
 0x25b   : > { %5007 = vtanh.f32 %v1354_v58  ;;  %v1357_v24 = vpop.f32.mrb[2].mxu0  ;;  %v1506_v58 = vld [vmem:[#allocation10] sm:$0x3] }
 0x25c   : > { %v1359_v11 = vpop.f32.mrb[3].mxu0  ;;  %v1358_v33 = vadd.f32 %v1357_v24, %v1222_v20 }
 0x25d   : > { %v1360_v36 = vadd.f32 %v1359_v11, %v1222_v20  ;;  %v6286_v20 = vrot.slane %v1506_v58, %v5538_v2 }
 0x25e   : > { %5009 = vtanh.f32 %v1358_v33  ;;  %v6289_v33 = vrot.slane %v1506_v58, %v5543_v3 }
 0x25f   : > { %v1363_v30 = vpop.f32.mrb[4].mxu0  ;;  %5011 = vtanh.f32 %v1360_v36 }
 0x260   : > { %v1365_v57 = vpop.f32.mrb[5].mxu0  ;;  %v1364_v9 = vadd.f32 %v1363_v30, %v1227_v0 }
 0x261   : > { %v1366_v14 = vadd.f32 %v1365_v57, %v1227_v0 }
 0x262   : > { %5013 = vtanh.f32 %v1364_v9 }
 0x263   : > { %v1369_v45 = vpop.f32.mrb[6].mxu0  ;;  %5015 = vtanh.f32 %v1366_v14 }
 0x264   : > { %v6080_v35 = vpop.eup %5005  ;;  %v1371_v46 = vpop.f32.mrb[7].mxu0  ;;  %v1370_v25 = vadd.f32 %v1369_v45, %v1232_v40 }
 0x265   : > { %v6082_v8 = vpop.eup %5007  ;;  %1458 = vrot.lane.b32.xlu1 %v6080_v35, %s5277_s20  ;;  %v1372_v12 = vadd.f32 %v1371_v46, %v1232_v40 }
 0x266   : > { %2394 = vrot.lane.b32.xlu0 %v6082_v8, %s5275_s28  ;;  %5017 = vtanh.f32 %v1370_v25 }
 0x267   : > { %v1375_v10 = vpop.f32.mrb[8].mxu0  ;;  %5019 = vtanh.f32 %v1372_v12 }
 0x268   : > { %v6088_v13 = vpop.f32.mrb[9].mxu0  ;;  %v6098_v44 = vpop.eup %5009  ;;  %v1376_v32 = vadd.f32 %v1375_v10, %v1237_v31 }
 0x269   : > { %1872 = vrot.lane.b32.xlu1 %v6080_v35, %s5271_s17  ;;  %v6124_v61 = vpop.eup %5011  ;;  %v1378_v42 = vadd.f32 %v6088_v13, %v1237_v31  ;;  %v1612_v31 = vld [vmem:[#allocation10 + $0x2] sm:$0x3] }
 0x26a   : > { %2609 = vrot.lane.b32.xlu0 %v6082_v8, %s5282_s26  ;;  %5021 = vtanh.f32 %v1376_v32 }
 0x26b   : > { %v6094_v47 = vpop.f32.mrb[10].mxu0  ;;  %5023 = vtanh.f32 %v1378_v42 }
 0x26c   : > { %v6096_v55 = vpop.f32.mrb[11].mxu0  ;;  %v6150_v26 = vpop.eup %5013  ;;  %v1382_v34 = vadd.f32 %v6094_v47, %v1242_v37 }
 0x26d   : > { %2087 = vrot.lane.b32.xlu1 %v6080_v35, %s5272_s19  ;;  %v6152_v7 = vpop.eup %5015  ;;  %v1384_v62 = vadd.f32 %v6096_v55, %v1242_v37  ;;  %v6336_v37 = vrot.slane %v1612_v31, %v5543_v3 }
 0x26e   : > { %1460 = vrot.lane.b32.xlu0 %v6098_v44, %s5277_s20  ;;  %5025 = vtanh.f32 %v1382_v34  ;;  %v6339_v34 = vrot.slane %v1612_v31, %v5538_v2 }
 0x26f   : > { %v6104_v50 = vpop.f32.mrb[12].mxu0  ;;  %5027 = vtanh.f32 %v1384_v62 }
 0x270   : > { %v6106_v59 = vpop.f32.mrb[13].mxu0  ;;  %v6162_v27 = vpop.eup %5017  ;;  %v1388_v18 = vadd.f32 %v6104_v50, %v1247_v16 }
 0x271   : > { %2392 = vrot.lane.b32.xlu1 %v6080_v35, %s5275_s28  ;;  %v6176_v28 = vpop.eup %5019  ;;  %v1390_v22 = vadd.f32 %v6106_v59, %v1247_v16 }
 0x272   : > { %1874 = vrot.lane.b32.xlu0 %v6098_v44, %s5271_s17  ;;  %5029 = vtanh.f32 %v1388_v18 }
 0x273   : > { %v6112_v60 = vpop.f32.mrb[14].mxu0  ;;  %5031 = vtanh.f32 %v1390_v22 }
 0x274   : > { %v6114_v48 = vpop.f32.mrb[15].mxu0  ;;  %v6200_v41 = vpop.eup %5021  ;;  %v1394_v63 = vadd.f32 %v6112_v60, %v1252_v49 }
 0x275   : > { %2607 = vrot.lane.b32.xlu1 %v6080_v35, %s5282_s26  ;;  %7612 = vst [vmem:[#allocation16_spill] sm:$0xff] %v6200_v41  ;;  %v6202_v39 = vpop.eup %5023  ;;  %v1396_v19 = vadd.f32 %v6114_v48, %v1252_v49 }
 0x276   : > { %2089 = vrot.lane.b32.xlu0 %v6098_v44, %s5272_s19  ;;  %5033 = vtanh.f32 %v1394_v63 }
 0x277   : > { %5035 = vtanh.f32 %v1396_v19 }
 0x278   : > { %v6213_v17 = vpop.eup %5025 }
 0x279   : > { %1563 = vrot.lane.b32.xlu1 %v6080_v35, %s5280_s11  ;;  %7613 = vst [vmem:[#allocation17_spill] sm:$0xff] %v6213_v17  ;;  %v6227_v15 = vpop.eup %5027 }
 0x27a   : > { %1565 = vrot.lane.b32.xlu0 %v6098_v44, %s5280_s11 }
 0x27c   : > { %v6262_v54 = vpop.eup %5029 }
 0x27d   : > { %1426 = vrot.lane.b32.xlu1 %v6082_v8, %s5277_s20  ;;  %7617 = vst [vmem:[#allocation21_spill] sm:$0xff] %v6262_v54  ;;  %v6266_v56 = vpop.eup %5031 }
 0x27e   : > { %1428 = vrot.lane.b32.xlu0 %v6124_v61, %s5277_s20  ;;  %7618 = vst [vmem:[#allocation22_spill] sm:$0xff] %v6266_v56 }
 0x280   : > { %v6277_v6 = vpop.eup %5033 }
 0x281   : > { %1848 = vrot.lane.b32.xlu1 %v6082_v8, %s5271_s17  ;;  %7620 = vst [vmem:[#allocation24_spill] sm:$0xff] %v6277_v6  ;;  %v6309_v9 = vpop.eup %5035 }
 0x282   : > { %1850 = vrot.lane.b32.xlu0 %v6124_v61, %s5271_s17  ;;  %7621 = vst [vmem:[#allocation25_spill] sm:$0xff] %v6309_v9 }
 0x285   : > { %2063 = vrot.lane.b32.xlu1 %v6082_v8, %s5272_s19 }
 0x286   : > { %2065 = vrot.lane.b32.xlu0 %v6124_v61, %s5272_s19 }
 0x289   : > { %1539 = vrot.lane.b32.xlu1 %v6082_v8, %s5280_s11 }
 0x28a   : > { %2398 = vrot.lane.b32.xlu0 %v6124_v61, %s5275_s28 }
 0x28d   : > { %2396 = vrot.lane.b32.xlu1 %v6098_v44, %s5275_s28 }
 0x28e   : > { %2613 = vrot.lane.b32.xlu0 %v6124_v61, %s5282_s26 }
 0x291   : > { %2611 = vrot.lane.b32.xlu1 %v6098_v44, %s5282_s26 }
 0x292   : > { %1541 = vrot.lane.b32.xlu0 %v6124_v61, %s5280_s11 }
 0x295   : > { %1462 = vrot.lane.b32.xlu1 %v6150_v26, %s5277_s20 }
 0x296   : > { %2402 = vrot.lane.b32.xlu0 %v6152_v7, %s5275_s28 }
 0x299   : > { %1876 = vrot.lane.b32.xlu1 %v6150_v26, %s5271_s17 }
 0x29a   : > { %2617 = vrot.lane.b32.xlu0 %v6152_v7, %s5282_s26 }
 0x29d   : > { %2091 = vrot.lane.b32.xlu1 %v6150_v26, %s5272_s19 }
 0x29e   : > { %1464 = vrot.lane.b32.xlu0 %v6162_v27, %s5277_s20 }
 0x2a1   : > { %2400 = vrot.lane.b32.xlu1 %v6150_v26, %s5275_s28 }
 0x2a2   : > { %1878 = vrot.lane.b32.xlu0 %v6162_v27, %s5271_s17 }
 0x2a5   : > { %2615 = vrot.lane.b32.xlu1 %v6150_v26, %s5282_s26 }
 0x2a6   : > { %2093 = vrot.lane.b32.xlu0 %v6162_v27, %s5272_s19 }
 0x2a9   : > { %1430 = vrot.lane.b32.xlu1 %v6152_v7, %s5277_s20 }
 0x2aa   : > { %1432 = vrot.lane.b32.xlu0 %v6176_v28, %s5277_s20 }
 0x2ad   : > { %1852 = vrot.lane.b32.xlu1 %v6152_v7, %s5271_s17 }
 0x2ae   : > { %1854 = vrot.lane.b32.xlu0 %v6176_v28, %s5271_s17 }
 0x2b1   : > { %2067 = vrot.lane.b32.xlu1 %v6152_v7, %s5272_s19 }
 0x2b2   : > { %2069 = vrot.lane.b32.xlu0 %v6176_v28, %s5272_s19 }
 0x2b5   : > { %2404 = vrot.lane.b32.xlu1 %v6162_v27, %s5275_s28 }
 0x2b6   : > { %2406 = vrot.lane.b32.xlu0 %v6176_v28, %s5275_s28 }
 0x2b9   : > { %2619 = vrot.lane.b32.xlu1 %v6162_v27, %s5282_s26 }
 0x2ba   : > { %2621 = vrot.lane.b32.xlu0 %v6176_v28, %s5282_s26 }
 0x2bd   : > { %1466 = vrot.lane.b32.xlu1 %v6200_v41, %s5277_s20 }
 0x2be   : > { %2410 = vrot.lane.b32.xlu0 %v6202_v39, %s5275_s28 }
 0x2c1   : > { %1880 = vrot.lane.b32.xlu1 %v6200_v41, %s5271_s17 }
 0x2c2   : > { %2625 = vrot.lane.b32.xlu0 %v6202_v39, %s5282_s26 }
 0x2c5   : > { %2095 = vrot.lane.b32.xlu1 %v6200_v41, %s5272_s19 }
 0x2c6   : > { %1468 = vrot.lane.b32.xlu0 %v6213_v17, %s5277_s20 }
 0x2c9   : > { %2408 = vrot.lane.b32.xlu1 %v6200_v41, %s5275_s28 }
 0x2ca   : > { %1882 = vrot.lane.b32.xlu0 %v6213_v17, %s5271_s17 }
 0x2cd   : > { %2623 = vrot.lane.b32.xlu1 %v6200_v41, %s5282_s26 }
 0x2ce   : > { %2097 = vrot.lane.b32.xlu0 %v6213_v17, %s5272_s19 }
 0x2d1   : > { %1434 = vrot.lane.b32.xlu1 %v6202_v39, %s5277_s20 }
 0x2d2   : > { %1436 = vrot.lane.b32.xlu0 %v6227_v15, %s5277_s20 }
 0x2d5   : > { %1856 = vrot.lane.b32.xlu1 %v6202_v39, %s5271_s17 }
 0x2d6   : > { %1858 = vrot.lane.b32.xlu0 %v6227_v15, %s5271_s17 }
 0x2d7   : > { %v1459_v43 = vpop.permute.xlu1 %1458 }
 0x2d8   : > { %v6239_v38 = vpop.permute.xlu0 %2394 }
 0x2d9   : > { %7614 = vst [vmem:[#allocation18_spill] sm:$0xff] %v6239_v38  ;;  %2071 = vrot.lane.b32.xlu1 %v6202_v39, %s5272_s19 }
 0x2da   : > { %2073 = vrot.lane.b32.xlu0 %v6227_v15, %s5272_s19 }
 0x2db   : > { %v6246_v53 = vpop.permute.xlu1 %1872 }
 0x2dc   : > { %v6248_v4 = vpop.permute.xlu0 %2609 }
 0x2dd   : > { %7615 = vst [vmem:[#allocation19_spill] sm:$0xff] %v6248_v4  ;;  %2412 = vrot.lane.b32.xlu1 %v6213_v17, %s5275_s28 }
 0x2de   : > { %2414 = vrot.lane.b32.xlu0 %v6227_v15, %s5275_s28 }
 0x2df   : > { %v6254_v51 = vpop.permute.xlu1 %2087 }
 0x2e0   : > { %v1461_v52 = vpop.permute.xlu0 %1460 }
 0x2e1   : > { %2627 = vrot.lane.b32.xlu1 %v6213_v17, %s5282_s26 }
 0x2e2   : > { %2629 = vrot.lane.b32.xlu0 %v6227_v15, %s5282_s26 }
 0x2e3   : > { %v6260_v29 = vpop.permute.xlu1 %2392 }
 0x2e4   : > { %7616 = vst [vmem:[#allocation20_spill] sm:$0xff] %v6260_v29  ;;  %v6264_v23 = vpop.permute.xlu0 %1874 }
 0x2e5   : > { %1470 = vrot.lane.b32.xlu1 %v6262_v54, %s5277_s20 }
 0x2e6   : > { %2418 = vrot.lane.b32.xlu0 %v6266_v56, %s5275_s28 }
 0x2e7   : > { %v6273_v5 = vpop.permute.xlu1 %2607 }
 0x2e8   : > { %7619 = vst [vmem:[#allocation23_spill] sm:$0xff] %v6273_v5  ;;  %v6275_v21 = vpop.permute.xlu0 %2089 }
 0x2e9   : > { %1884 = vrot.lane.b32.xlu1 %v6262_v54, %s5271_s17 }
 0x2ea   : > { %1472 = vrot.lane.b32.xlu0 %v6277_v6, %s5277_s20 }
 0x2eb   : > { %v1564_v24 = vpop.permute.xlu1 %1563 }
 0x2ec   : > { %v1566_v11 = vpop.permute.xlu0 %1565 }
 0x2ed   : > { %2099 = vrot.lane.b32.xlu1 %v6262_v54, %s5272_s19 }
 0x2ee   : > { %1886 = vrot.lane.b32.xlu0 %v6277_v6, %s5271_s17 }
 0x2ef   : > { %v1427_v30 = vpop.permute.xlu1 %1426 }
 0x2f0   : > { %v1498_v57 = vsel %vm582_vm14, %v1427_v30, %v1459_v43  ;;  %v1429_v45 = vpop.permute.xlu0 %1428  ;;  %v1474_v46 = vsel %vm582_vm14, %v1459_v43, %v1427_v30 }
 0x2f1   : > { %v1499_v10 = vsel %vm582_vm14, %v1429_v45, %v1461_v52  ;;  %2416 = vrot.lane.b32.xlu1 %v6262_v54, %s5275_s28  ;;  %v1475_v13 = vsel %vm582_vm14, %v1461_v52, %v1429_v45  ;;  %v1519_v47 = vmul.f32 %v6286_v20, %v1474_v46  ;;  %v1518_v55 = vmul.f32 %v6289_v33, %v1498_v57 }
 0x2f2   : > { %2101 = vrot.lane.b32.xlu0 %v6277_v6, %s5272_s19  ;;  %v1521_v36 = vmul.f32 %v6286_v20, %v1475_v13  ;;  %v1520_v50 = vmul.f32 %v6289_v33, %v1499_v10 }
 0x2f3   : > { %v6305_v59 = vpop.permute.xlu1 %1848 }
 0x2f4   : > { %v6307_v60 = vpop.permute.xlu0 %1850  ;;  %v4613_v48 = vpack.c.bf16 %v1521_v36, %v1519_v47  ;;  %v4615_v0 = vpack.c.bf16 %v1520_v50, %v1518_v55 }
 0x2f5   : > { %1438 = vrot.lane.b32.xlu1 %v6266_v56, %s5277_s20 }
 0x2f6   : > { %1440 = vrot.lane.b32.xlu0 %v6309_v9, %s5277_s20  ;;  %4614 = vmatprep.subr.bf16.mxu1 %v4613_v48 }
 0x2f7   : > { %v6315_v14 = vpop.permute.xlu1 %2063  ;;  %4616 = vmatpush1.bf16.msra.mxu1 %v4615_v0 }
 0x2f8   : > { %v6317_v40 = vpop.permute.xlu0 %2065 }
 0x2f9   : > { %2631 = vrot.lane.b32.xlu1 %v6262_v54, %s5282_s26 }
 0x2fa   : > { %2633 = vrot.lane.b32.xlu0 %v6266_v56, %s5282_s26 }
 0x2fb   : > { %v1540_v25 = vpop.permute.xlu1 %1539 }
 0x2fc   : > { %v6323_v12 = vpop.permute.xlu0 %2398  ;;  %v1579_v62 = vsel %vm607_vm0, %v1564_v24, %v1540_v25  ;;  %v1603_v16 = vsel %vm607_vm0, %v1540_v25, %v1564_v24 }
 0x2fd   : > { %7622 = vst [vmem:[#allocation26_spill] sm:$0xff] %v6323_v12  ;;  %1860 = vrot.lane.b32.xlu1 %v6266_v56, %s5271_s17  ;;  %v1624_v63 = vmul.f32 %v6336_v37, %v1603_v16  ;;  %v1625_v52 = vmul.f32 %v6339_v34, %v1579_v62 }
 0x2fe   : > { %1545 = vrot.lane.b32.xlu0 %v6176_v28, %s5280_s11 }
 0x2ff   : > { %v6329_v32 = vpop.permute.xlu1 %2396 }
 0x300   : > { %7623 = vst [vmem:[#allocation27_spill] sm:$0xff] %v6329_v32  ;;  %v6331_v42 = vpop.permute.xlu0 %2613 }
 0x301   : > { %7624 = vst [vmem:[#allocation28_spill] sm:$0xff] %v6331_v42  ;;  %2075 = vrot.lane.b32.xlu1 %v6266_v56, %s5272_s19 }
 0x302   : > { %1569 = vrot.lane.b32.xlu0 %v6162_v27, %s5280_s11 }
 0x303   : > { %v6345_v49 = vpop.permute.xlu1 %2611 }
 0x304   : > { %7625 = vst [vmem:[#allocation29_spill] sm:$0xff] %v6345_v49  ;;  %v1542_v18 = vpop.permute.xlu0 %1541 }
 0x305   : > { %v1580_v22 = vsel %vm607_vm0, %v1566_v11, %v1542_v18  ;;  %v1604_v43 = vsel %vm607_vm0, %v1542_v18, %v1566_v11  ;;  %2420 = vrot.lane.b32.xlu1 %v6277_v6, %s5275_s28 }
 0x306   : > { %v1626_v19 = vmul.f32 %v6336_v37, %v1604_v43  ;;  %v1627_v58 = vmul.f32 %v6339_v34, %v1580_v22  ;;  %1862 = vrot.lane.b32.xlu0 %v6309_v9, %s5271_s17 }
 0x307   : > { %v1463_v24 = vpop.permute.xlu1 %1462 }
 0x308   : > { %v4599_v30 = vpack.c.bf16 %v1626_v19, %v1624_v63  ;;  %v6357_v57 = vpop.permute.xlu0 %2402  ;;  %v4597_v45 = vpack.c.bf16 %v1627_v58, %v1625_v52 }
 0x309   : > { %7626 = vst [vmem:[#allocation30_spill] sm:$0xff] %v6357_v57  ;;  %2635 = vrot.lane.b32.xlu1 %v6277_v6, %s5282_s26  ;;  %v1888_v57 = vsel %vm7644_vm7, %v6246_v53, %v6305_v59  ;;  %vm7655_vm7 = vmmov %vm7652_vm2 }
 0x30a   : > { %2824 = vrot.lane.b32.xlu0 %v6082_v8, %s5276_s23  ;;  %4598 = vmatprep.subr.bf16.mxu0 %v4597_v45 }
 0x30b   : > { %v6363_v11 = vpop.permute.xlu1 %1876  ;;  %4600 = vmatpush1.bf16.msra.mxu0 %v4599_v30 }
 0x30c   : > { %v6365_v46 = vpop.permute.xlu0 %2617 }
 0x30d   : > { %7627 = vst [vmem:[#allocation31_spill] sm:$0xff] %v6365_v46  ;;  %1543 = vrot.lane.b32.xlu1 %v6152_v7, %s5280_s11 }
 0x30e   : > { %2828 = vrot.lane.b32.xlu0 %v6124_v61, %s5276_s23 }
 0x30f   : > { %v6371_v10 = vpop.permute.xlu1 %2091 }
 0x310   : > { %v1465_v13 = vpop.permute.xlu0 %1464 }
 0x311   : > { %1567 = vrot.lane.b32.xlu1 %v6150_v26, %s5280_s11 }
 0x312   : > { %1549 = vrot.lane.b32.xlu0 %v6227_v15, %s5280_s11 }
 0x313   : > { %v6377_v47 = vpop.permute.xlu1 %2400 }
 0x314   : > { %7628 = vst [vmem:[#allocation32_spill] sm:$0xff] %v6377_v47  ;;  %v6379_v55 = vpop.permute.xlu0 %1878 }
 0x315   : > { %2822 = vrot.lane.b32.xlu1 %v6080_v35, %s5276_s23 }
 0x316   : > { %2077 = vrot.lane.b32.xlu0 %v6309_v9, %s5272_s19 }
 0x317   : > { %v6385_v36 = vpop.permute.xlu1 %2615 }
 0x318   : > { %7629 = vst [vmem:[#allocation33_spill] sm:$0xff] %v6385_v36  ;;  %v6387_v50 = vpop.permute.xlu0 %2093 }
 0x319   : > { %2826 = vrot.lane.b32.xlu1 %v6098_v44, %s5276_s23 }
 0x31a   : > { %1573 = vrot.lane.b32.xlu0 %v6213_v17, %s5280_s11 }
 0x31b   : > { %v1431_v48 = vpop.permute.xlu1 %1430 }
 0x31c   : > { %v1476_v0 = vsel %vm582_vm14, %v1463_v24, %v1431_v48  ;;  %v1500_v25 = vsel %vm582_vm14, %v1431_v48, %v1463_v24  ;;  %v1433_v31 = vpop.permute.xlu0 %1432 }
 0x31d   : > { %v1522_v62 = vmul.f32 %v6289_v33, %v1500_v25  ;;  %v1523_v16 = vmul.f32 %v6286_v20, %v1476_v0  ;;  %v1477_v18 = vsel %vm582_vm14, %v1465_v13, %v1433_v31  ;;  %v1501_v22 = vsel %vm582_vm14, %v1433_v31, %v1465_v13  ;;  %1547 = vrot.lane.b32.xlu1 %v6202_v39, %s5280_s11 }
 0x31e   : > { %v1524_v43 = vmul.f32 %v6289_v33, %v1501_v22  ;;  %v1525_v63 = vmul.f32 %v6286_v20, %v1477_v18  ;;  %2832 = vrot.lane.b32.xlu0 %v6152_v7, %s5276_s23 }
 0x31f   : > { %v6405_v52 = vpop.permute.xlu1 %1852 }
 0x320   : > { %v6407_v19 = vpop.permute.xlu0 %1854  ;;  %v4617_v58 = vpack.c.bf16 %v1525_v63, %v1523_v16  ;;  %v4619_v24 = vpack.c.bf16 %v1524_v43, %v1522_v62 }
 0x321   : > { %1571 = vrot.lane.b32.xlu1 %v6200_v41, %s5280_s11 }
 0x322   : > { %2836 = vrot.lane.b32.xlu0 %v6176_v28, %s5276_s23  ;;  %4618 = vmatprep.subr.bf16.mxu1 %v4617_v58 }
 0x323   : > { %v6413_v30 = vpop.permute.xlu1 %2067  ;;  %4620 = vmatpush1.bf16.msra.mxu1 %v4619_v24 }
 0x324   : > { %v6415_v45 = vpop.permute.xlu0 %2069 }
 0x325   : > { %2830 = vrot.lane.b32.xlu1 %v6150_v26, %s5276_s23 }
 0x326   : > { %1577 = vrot.lane.b32.xlu0 %v6277_v6, %s5280_s11 }
 0x327   : > { %v6421_v13 = vpop.permute.xlu1 %2404 }
 0x328   : > { %7630 = vst [vmem:[#allocation34_spill] sm:$0xff] %v6421_v13  ;;  %v6423_v48 = vpop.permute.xlu0 %2406 }
 0x329   : > { %7631 = vst [vmem:[#allocation35_spill] sm:$0xff] %v6423_v48  ;;  %2834 = vrot.lane.b32.xlu1 %v6162_v27, %s5276_s23  ;;  %v3249_v48 = vld [vmem:[#allocation7 + $0x10] sm:$0xff] }
 0x32a   : > { %2840 = vrot.lane.b32.xlu0 %v6202_v39, %s5276_s23 }
 0x32b   : > { %v6429_v0 = vpop.permute.xlu1 %2619 }
 0x32c   : > { %7632 = vst [vmem:[#allocation36_spill] sm:$0xff] %v6429_v0  ;;  %v6431_v25 = vpop.permute.xlu0 %2621 }
 0x32d   : > { %7633 = vst [vmem:[#allocation37_spill] sm:$0xff] %v6431_v25  ;;  %1551 = vrot.lane.b32.xlu1 %v6266_v56, %s5280_s11 }
 0x32e   : > { %2844 = vrot.lane.b32.xlu0 %v6227_v15, %s5276_s23 }
 0x32f   : > { %v1467_v31 = vpop.permute.xlu1 %1466 }
 0x330   : > { %v6437_v62 = vpop.permute.xlu0 %2410 }
 0x331   : > { %7634 = vst [vmem:[#allocation38_spill] sm:$0xff] %v6437_v62  ;;  %1575 = vrot.lane.b32.xlu1 %v6262_v54, %s5280_s11 }
 0x332   : > { %2848 = vrot.lane.b32.xlu0 %v6266_v56, %s5276_s23 }
 0x333   : > { %v6443_v16 = vpop.permute.xlu1 %1880 }
 0x334   : > { %v6445_v18 = vpop.permute.xlu0 %2625 }
 0x335   : > { %7635 = vst [vmem:[#allocation39_spill] sm:$0xff] %v6445_v18  ;;  %2838 = vrot.lane.b32.xlu1 %v6200_v41, %s5276_s23 }
 0x336   : > { %2422 = vrot.lane.b32.xlu0 %v6309_v9, %s5275_s28 }
 0x337   : > { %v6451_v22 = vpop.permute.xlu1 %2095 }
 0x338   : > { %v1469_v43 = vpop.permute.xlu0 %1468 }
 0x339   : > { %2842 = vrot.lane.b32.xlu1 %v6213_v17, %s5276_s23 }
 0x33a   : > { %3039 = vrot.lane.b32.xlu0 %v6082_v8, %s5279_s14 }
 0x33b   : > { %v6457_v63 = vpop.permute.xlu1 %2408 }
 0x33c   : > { %7636 = vst [vmem:[#allocation40_spill] sm:$0xff] %v6457_v63  ;;  %v6459_v58 = vpop.permute.xlu0 %1882 }
 0x33d   : > { %2846 = vrot.lane.b32.xlu1 %v6262_v54, %s5276_s23 }
 0x33e   : > { %3043 = vrot.lane.b32.xlu0 %v6124_v61, %s5279_s14 }
 0x33f   : > { %v6465_v24 = vpop.permute.xlu1 %2623 }
 0x340   : > { %7637 = vst [vmem:[#allocation41_spill] sm:$0xff] %v6465_v24  ;;  %v6467_v18 = vpop.permute.xlu0 %2097 }
 0x341   : > { %2850 = vrot.lane.b32.xlu1 %v6277_v6, %s5276_s23 }
 0x342   : > { %3047 = vrot.lane.b32.xlu0 %v6152_v7, %s5279_s14 }
 0x343   : > { %v1435_v46 = vpop.permute.xlu1 %1434 }
 0x344   : > { %v1478_v36 = vsel %vm582_vm14, %v1467_v31, %v1435_v46  ;;  %v1502_v25 = vsel %vm582_vm14, %v1435_v46, %v1467_v31  ;;  %v1437_v0 = vpop.permute.xlu0 %1436 }
 0x345   : > { %v1526_v4 = vmul.f32 %v6289_v33, %v1502_v25  ;;  %v1527_v5 = vmul.f32 %v6286_v20, %v1478_v36  ;;  %v1479_v24 = vsel %vm582_vm14, %v1469_v43, %v1437_v0  ;;  %v1503_v42 = vsel %vm582_vm14, %v1437_v0, %v1469_v43  ;;  %3037 = vrot.lane.b32.xlu1 %v6080_v35, %s5279_s14 }
 0x346   : > { %v1528_v49 = vmul.f32 %v6289_v33, %v1503_v42  ;;  %v1529_v62 = vmul.f32 %v6286_v20, %v1479_v24  ;;  %2637 = vrot.lane.b32.xlu0 %v6309_v9, %s5282_s26 }
 0x347   : > { %v6485_v46 = vpop.permute.xlu1 %1856 }
 0x348   : > { %v6487_v31 = vpop.permute.xlu0 %1858  ;;  %v4621_v25 = vpack.c.bf16 %v1529_v62, %v1527_v5  ;;  %v4623_v36 = vpack.c.bf16 %v1528_v49, %v1526_v4 }
 0x349   : > { %3041 = vrot.lane.b32.xlu1 %v6098_v44, %s5279_s14 }
 0x34a   : > { %3051 = vrot.lane.b32.xlu0 %v6176_v28, %s5279_s14  ;;  %4622 = vmatprep.subr.bf16.mxu1 %v4621_v25 }
 0x34b   : > { %v6493_v0 = vpop.permute.xlu1 %2071  ;;  %4624 = vmatpush1.bf16.msra.mxu1 %v4623_v36 }
 0x34c   : > { %v6495_v42 = vpop.permute.xlu0 %2073 }
 0x34d   : > { %3045 = vrot.lane.b32.xlu1 %v6150_v26, %s5279_s14 }
 0x34e   : > { %3055 = vrot.lane.b32.xlu0 %v6202_v39, %s5279_s14 }
 0x34f   : > { %v6501_v5 = vpop.permute.xlu1 %2412 }
 0x350   : > { %7638 = vst [vmem:[#allocation42_spill] sm:$0xff] %v6501_v5  ;;  %v6503_v4 = vpop.permute.xlu0 %2414 }
 0x351   : > { %7639 = vst [vmem:[#allocation43_spill] sm:$0xff] %v6503_v4  ;;  %3049 = vrot.lane.b32.xlu1 %v6162_v27, %s5279_s14 }
 0x352   : > { %1553 = vrot.lane.b32.xlu0 %v6309_v9, %s5280_s11 }
 0x353   : > { %v6509_v49 = vpop.permute.xlu1 %2627 }
 0x354   : > { %7640 = vst [vmem:[#allocation44_spill] sm:$0xff] %v6509_v49  ;;  %v6511_v62 = vpop.permute.xlu0 %2629  ;;  %v1921_v49 = vld [vmem:[#allocation10 + $0x4] sm:$0x3] }
 0x355   : > { %7641 = vst [vmem:[#allocation45_spill] sm:$0xff] %v6511_v62  ;;  %3053 = vrot.lane.b32.xlu1 %v6200_v41, %s5279_s14  ;;  %v6538_v4 = vrot.slane %v1921_v49, %v5538_v2  ;;  %v6551_v13 = vrot.slane %v1921_v49, %v5543_v3  ;;  %v1913_v41 = vsel %vm7647_vm3, %v6307_v60, %v6264_v23 }
 0x356   : > { %2852 = vrot.lane.b32.xlu0 %v6309_v9, %s5276_s23 }
 0x357   : > { %v1471_v43 = vpop.permute.xlu1 %1470 }
 0x358   : > { %v6517_v24 = vpop.permute.xlu0 %2418 }
 0x359   : > { %7642 = vst [vmem:[#allocation46_spill] sm:$0xff] %v6517_v24  ;;  %3057 = vrot.lane.b32.xlu1 %v6213_v17, %s5279_s14  ;;  %v3247_v24 = vld [vmem:[#allocation7] sm:$0xff]  ;;  %v3250_v17 = vld [vmem:[#allocation7 + $0x18] sm:$0xff] }
 0x35a   : > { %3059 = vrot.lane.b32.xlu0 %v6227_v15, %s5279_s14 }
 0x35b   : > { %v6523_v25 = vpop.permute.xlu1 %1884 }
 0x35c   : > { %v1473_v36 = vpop.permute.xlu0 %1472 }
 0x35d   : > { %3061 = vrot.lane.b32.xlu1 %v6262_v54, %s5279_s14  ;;  %v3248_v54 = vld [vmem:[#allocation7 + $0x8] sm:$0xff] }
 0x35e   : > { %3063 = vrot.lane.b32.xlu0 %v6266_v56, %s5279_s14 }
 0x35f   : > { %v6529_v62 = vpop.permute.xlu1 %2099 }
 0x360   : > { %v6531_v63 = vpop.permute.xlu0 %1886 }
 0x361   : > { %3065 = vrot.lane.b32.xlu1 %v6277_v6, %s5279_s14  ;;  %v1889_v6 = vsel %vm7645_vm11, %v6264_v23, %v6307_v60  ;;  %v1890_v23 = vsel %vm7648_vm4, %v6363_v11, %v6405_v52  ;;  %vm7656_vm11 = vcmask 7168   ;;  %vm7659_vm4 = vmmov %vm7652_vm2 }
 0x362   : > { %3067 = vrot.lane.b32.xlu0 %v6309_v9, %s5279_s14  ;;  %v1934_v9 = vmul.f32 %v6538_v4, %v1888_v57  ;;  %v1936_v38 = vmul.f32 %v6538_v4, %v1889_v6  ;;  %v1891_v6 = vsel %vm7649_vm5, %v6379_v55, %v6407_v19  ;;  %vm7658_vm3 = vmmov %vm7656_vm11 }
 0x363   : > { %v6540_v5 = vpop.permute.xlu1 %2416  ;;  %v1940_v32 = vmul.f32 %v6538_v4, %v1891_v6  ;;  %vm7660_vm5 = vmmov %vm7652_vm2 }
 0x364   : > { %7643 = vst [vmem:[#allocation47_spill] sm:$0xff] %v6540_v5  ;;  %v6545_v47 = vpop.permute.xlu0 %2101  ;;  %v1912_v5 = vsel %vm7646_vm13, %v6305_v59, %v6246_v53  ;;  %vm7657_vm13 = vmmov %vm7656_vm11 }
 0x365   : > { %3253 = vperm.xlu1 %5004, %v3247_v24  }
 0x366   : > { %3258 = vperm.xlu0 %5003, %v3248_v54  }
 0x367   : > { %v1439_v56 = vpop.permute.xlu1 %1438 }
 0x368   : > { %v1480_v54 = vsel %vm582_vm14, %v1471_v43, %v1439_v56  ;;  %v1504_v24 = vsel %vm582_vm14, %v1439_v56, %v1471_v43  ;;  %v1441_v49 = vpop.permute.xlu0 %1440 }
 0x369   : > { %v1530_v29 = vmul.f32 %v6289_v33, %v1504_v24  ;;  %v1531_v12 = vmul.f32 %v6286_v20, %v1480_v54  ;;  %v1481_v53 = vsel %vm582_vm14, %v1473_v36, %v1441_v49  ;;  %v1505_v59 = vsel %vm582_vm14, %v1441_v49, %v1473_v36  ;;  %3263 = vperm.xlu1 %5004, %v3249_v48  }
 0x36a   : > { %v1532_v56 = vmul.f32 %v6289_v33, %v1505_v59  ;;  %v1533_v60 = vmul.f32 %v6286_v20, %v1481_v53  ;;  %3268 = vperm.xlu0 %5003, %v3250_v17   ;;  %v1933_v48 = vmul.f32 %v6551_v13, %v1912_v5  ;;  %v1935_v24 = vmul.f32 %v6551_v13, %v1913_v41  ;;  %v1414_v5 = vld [vmem:[#allocation6] sm:$0xff] }
 0x36b   : > { %v6575_v57 = vpop.permute.xlu1 %2631  ;;  %v1938_v49 = vmul.f32 %v6538_v4, %v1890_v23  ;;  %v1914_v59 = vsel %vm7650_vm9, %v6405_v52, %v6363_v11  ;;  %v1915_v17 = vsel %vm7651_vm12, %v6407_v19, %v6379_v55  ;;  %v4629_v53 = vpack.c.bf16 %v1936_v38, %v1934_v9  ;;  %v2136_v23 = vld [vmem:[#allocation10 + $0x6] sm:$0x3]  ;;  %vm7661_vm9 = vmmov %vm7658_vm3 }
 0x36c   : > { %v6577_v43 = vpop.permute.xlu0 %2633  ;;  %v4625_v54 = vpack.c.bf16 %v1533_v60, %v1531_v12  ;;  %v4627_v36 = vpack.c.bf16 %v1532_v56, %v1530_v29  ;;  %v1892_v29 = vsel %vm7652_vm2, %v6443_v16, %v6485_v46  ;;  %v1893_v41 = vsel %vm7653_vm6, %v6459_v58, %v6487_v31  ;;  %vm7662_vm12 = vmmov %vm7658_vm3 }
 0x36d   : > { %v4631_v52 = vpack.c.bf16 %v1935_v24, %v1933_v48  ;;  %v1937_v55 = vmul.f32 %v6551_v13, %v1914_v59  ;;  %v1939_v38 = vmul.f32 %v6551_v13, %v1915_v17  ;;  %v4633_v9 = vpack.c.bf16 %v1940_v32, %v1938_v49  ;;  %v1415_v32 = vld [vmem:[#allocation6 + $0x8] sm:$0xff]  ;;  %vm7663_vm2 = vmmov %vm7658_vm3 }
 0x36e   : > { %4626 = vmatprep.subr.bf16.mxu1 %v4625_v54  ;;  %v1916_v19 = vsel %vm7654_vm10, %v6485_v46, %v6443_v16  ;;  %v1942_v6 = vmul.f32 %v6538_v4, %v1892_v29  ;;  %v1917_v56 = vsel %vm7655_vm7, %v6487_v31, %v6459_v58  ;;  %v1944_v60 = vmul.f32 %v6538_v4, %v1893_v41  ;;  %vm7664_vm6 = vmmov %vm7659_vm4 }
 0x36f   : > { %v1861_v12 = vpop.permute.xlu1 %1860  ;;  %4628 = vmatpush1.bf16.msra.mxu1 %v4627_v36  ;;  %v6612_v36 = vrot.slane %v2136_v23, %v5538_v2  ;;  %v2103_v16 = vsel %vm7656_vm11, %v6254_v51, %v6315_v14  ;;  %v2104_v58 = vsel %vm7657_vm13, %v6275_v21, %v6317_v40  ;;  %v4635_v31 = vpack.c.bf16 %v1939_v38, %v1937_v55  ;;  %vm7665_vm10 = vmmov %vm7659_vm4 }
 0x370   : > { %4630 = vmatprep.subr.bf16.mxu1 %v4629_v53  ;;  %v6595_v11 = vpop.permute.xlu0 %1545  ;;  %v1941_v48 = vmul.f32 %v6551_v13, %v1916_v19  ;;  %v1943_v24 = vmul.f32 %v6551_v13, %v1917_v56  ;;  %v6625_v49 = vrot.slane %v2136_v23, %v5543_v3  ;;  %v4637_v59 = vpack.c.bf16 %v1944_v60, %v1942_v6  ;;  %vm7666_vm7 = vmmov %vm7663_vm2 }
 0x371   : > { %v2127_v17 = vsel %vm7658_vm3, %v6315_v14, %v6254_v51  ;;  %v1894_v53 = vsel %vm7659_vm4, %v6523_v25, %v1861_v12  ;;  %v1918_v29 = vsel %vm7660_vm5, %v1861_v12, %v6523_v25  ;;  %v2128_v23 = vsel %vm7661_vm9, %v6317_v40, %v6275_v21  ;;  %vm7667_vm11 = vmmov %vm7663_vm2 }
 0x372   : > { %4541 = vmatmul.mubr.msk.f32.vlgmr.msra.gmra.mrb[0].mxu1 %vm1640_vm8, %v1414_v5  ;;  %v1416_v5 = vld [vmem:[#allocation6 + $0x10] sm:$0xff]  ;;  %v2151_v51 = vmul.f32 %v6612_v36, %v2104_v58  ;;  %v2105_v14 = vsel %vm7662_vm12, %v6371_v10, %v6413_v30  ;;  %v2106_v12 = vsel %vm7663_vm2, %v6387_v50, %v6415_v45  ;;  %v4639_v55 = vpack.c.bf16 %v1943_v24, %v1941_v48  ;;  %vm7668_vm13 = vmmov %vm7663_vm2 }
 0x373   : > { %v6608_v54 = vpop.permute.xlu1 %2075  ;;  %4632 = vmatpush1.bf16.msra.mxu1 %v4631_v52  ;;  %1824 = vmatprep.mubr.f32.mxu1 %v7611_v1  ;;  %v2149_v52 = vmul.f32 %v6612_v36, %v2103_v16  ;;  %v1945_v21 = vmul.f32 %v6551_v13, %v1918_v29  ;;  %v1946_v40 = vmul.f32 %v6538_v4, %v1894_v53  ;;  %vm7669_vm3 = vmmov %vm7663_vm2 }
 0x374   : > { %4634 = vmatprep.subr.bf16.mxu1 %v4633_v9  ;;  %v6617_v46 = vpop.permute.xlu0 %1569  ;;  %v2129_v56 = vsel %vm7666_vm7, %v6413_v30, %v6371_v10  ;;  %v2148_v48 = vmul.f32 %v6625_v49, %v2127_v17  ;;  %v2150_v24 = vmul.f32 %v6625_v49, %v2128_v23  ;;  %v2153_v10 = vmul.f32 %v6612_v36, %v2105_v14  ;;  %vm7670_vm4 = vmmov %vm7663_vm2 }
 0x375   : > { %v2155_v30 = vmul.f32 %v6612_v36, %v2106_v12  ;;  %v4645_v53 = vpack.c.bf16 %v2151_v51, %v2149_v52  ;;  %v2108_v17 = vsel %vm7669_vm3, %v6467_v18, %v6495_v42  ;;  %v2131_v52 = vsel %vm7670_vm4, %v6493_v0, %v6451_v22  ;;  %vm7671_vm5 = vmmov %vm7663_vm2 }
 0x376   : > { %4542 = vmatmul.mubr.msk.f32.gmra.mrb[2].mxu1 %vm1640_vm8, %v1415_v32  ;;  %v2130_v32 = vsel %vm7667_vm11, %v6415_v45, %v6387_v50  ;;  %v2107_v45 = vsel %vm7668_vm13, %v6451_v22, %v6493_v0  ;;  %v4647_v14 = vpack.c.bf16 %v2150_v24, %v2148_v48  ;;  %v2132_v51 = vsel %vm7671_vm5, %v6495_v42, %v6467_v18  ;;  %v1845_v18 = vld [vmem:[#allocation6 + $0x48] sm:$0xff]  ;;  %vm7672_vm9 = vmmov %vm7663_vm2 }
 0x377   : > { %v6635_v41 = vpop.permute.xlu1 %2420  ;;  %4636 = vmatpush1.bf16.msra.mxu1 %v4635_v31  ;;  %1830 = vmatprep.mubr.f32.mxu1 %v7611_v1  ;;  %v2154_v50 = vmul.f32 %v6625_v49, %v2130_v32  ;;  %v2157_v12 = vmul.f32 %v6612_v36, %v2107_v45  ;;  %v2156_v42 = vmul.f32 %v6625_v49, %v2131_v52  ;;  %vm7673_vm12 = vmmov %vm7663_vm2 }
 0x378   : > { %4638 = vmatprep.subr.bf16.mxu1 %v4637_v59  ;;  %v1863_v25 = vpop.permute.xlu0 %1862  ;;  %v2152_v59 = vmul.f32 %v6625_v49, %v2129_v56  ;;  %v2133_v32 = vsel %vm7672_vm9, %v6608_v54, %v6529_v62 }
 0x379   : > { %v1895_v38 = vsel %vm7664_vm6, %v6531_v63, %v1863_v25  ;;  %v1919_v9 = vsel %vm7665_vm10, %v1863_v25, %v6531_v63  ;;  %v1417_v63 = vld [vmem:[#allocation6 + $0x18] sm:$0xff]  ;;  %v4649_v25 = vpack.c.bf16 %v2155_v30, %v2153_v10  ;;  %v1846_v30 = vld [vmem:[#allocation6 + $0x50] sm:$0xff]  ;;  %vm7674_vm6 = vmmov %vm7663_vm2  ;;  %vm7677_vm10 = vcmask 1039360  }
 0x37a   : > { %v1947_v19 = vmul.f32 %v6551_v13, %v1919_v9  ;;  %v1948_v6 = vmul.f32 %v6538_v4, %v1895_v38  ;;  %4543 = vmatmul.mubr.msk.f32.gmra.mrb[4].mxu1 %vm1640_vm8, %v1416_v5  ;;  %v1844_v5 = vld [vmem:[#allocation6 + $0x40] sm:$0xff]  ;;  %v1582_v38 = vsel %vm607_vm0, %v6617_v46, %v6595_v11  ;;  %v1606_v9 = vsel %vm607_vm0, %v6595_v11, %v6617_v46  ;;  %vm7680_vm7 = vmmov %vm7677_vm10 }
 0x37b   : > { %v6661_v60 = vpop.permute.xlu1 %2635  ;;  %4640 = vmatpush1.bf16.msra.mxu1 %v4639_v55  ;;  %1836 = vmatprep.mubr.f32.mxu1 %v7611_v1  ;;  %v2159_v55 = vmul.f32 %v6612_v36, %v2108_v17  ;;  %v4651_v22 = vpack.c.bf16 %v2154_v50, %v2152_v59  ;;  %v1630_v11 = vmul.f32 %v6336_v37, %v1606_v9  ;;  %vm7683_vm11 = vmmov %vm7680_vm7 }
 0x37c   : > { %v4643_v16 = vpack.c.bf16 %v1947_v19, %v1945_v21  ;;  %v6667_v58 = vpop.permute.xlu0 %2824  ;;  %v4641_v31 = vpack.c.bf16 %v1948_v6, %v1946_v40  ;;  %v2158_v21 = vmul.f32 %v6625_v49, %v2132_v51  ;;  %v1631_v46 = vmul.f32 %v6339_v34, %v1582_v38  ;;  %vm7688_vm13 = vmmov %vm7680_vm7 }
 0x37d   : > { %v2160_v50 = vmul.f32 %v6625_v49, %v2133_v32  ;;  %v4663_v9 = vpack.c.bf16 %v6098_v44, %v6080_v35  ;;  %v4667_v44 = vpack.c.bf16 %v6162_v27, %v6150_v26  ;;  %vm7689_vm3 = vmmov %vm7680_vm7 }
 0x37e   : > { %4544 = vmatmul.mubr.msk.f32.gmra.mrb[6].mxu1 %vm1640_vm8, %v1417_v63  ;;  %4642 = vmatprep.subr.bf16.mxu1 %v4641_v31  ;;  %v2109_v31 = vsel %vm7673_vm12, %v6529_v62, %v6608_v54  ;;  %vm7692_vm4 = vmmov %vm7689_vm3 }
 0x37f   : > { %v1544_v29 = vpop.permute.xlu1 %1543  ;;  %4644 = vmatpush1.bf16.msra.mxu1 %v4643_v16  ;;  %2025 = vmatprep.mubr.f32.mxu1 %v7611_v1  ;;  %v4653_v16 = vpack.c.bf16 %v2159_v55, %v2157_v12  ;;  %v2161_v62 = vmul.f32 %v6612_v36, %v2109_v31  ;;  %v2059_v55 = vld [vmem:[#allocation6 + $0x60] sm:$0xff]  ;;  %vm7695_vm5 = vmmov %vm7689_vm3 }
 0x380   : > { %4646 = vmatprep.subr.bf16.mxu1 %v4645_v53  ;;  %v6683_v23 = vpop.permute.xlu0 %2828  ;;  %v4655_v53 = vpack.c.bf16 %v2158_v21, %v2156_v42  ;;  %vm7698_vm9 = vmmov %vm7689_vm3 }
 0x381   : > { %vm7699_vm12 = vmmov %vm7689_vm3 }
 0x382   : > { %4545 = vmatmul.mubr.msk.f32.vlgmr.msra.gmra.mrb[0].mxu1 %vm1640_vm8, %v1844_v5 }
 0x383   : > { %v1568_v0 = vpop.permute.xlu1 %1567  ;;  %4648 = vmatpush1.bf16.msra.mxu1 %v4647_v14  ;;  %2031 = vmatprep.mubr.f32.mxu1 %v7611_v1  ;;  %v1847_v14 = vld [vmem:[#allocation6 + $0x58] sm:$0xff] }
 0x384   : > { %v1581_v40 = vsel %vm607_vm0, %v1568_v0, %v1544_v29  ;;  %v1605_v19 = vsel %vm607_vm0, %v1544_v29, %v1568_v0  ;;  %4650 = vmatprep.subr.bf16.mxu1 %v4649_v25  ;;  %v1550_v6 = vpop.permute.xlu0 %1549 }
 0x385   : > { %v1628_v56 = vmul.f32 %v6336_v37, %v1605_v19  ;;  %v1629_v63 = vmul.f32 %v6339_v34, %v1581_v40  ;;  %v2465_v40 = vld [vmem:[#allocation10 + $0xa] sm:$0x3] }
 0x386   : > { %4546 = vmatmul.mubr.msk.f32.gmra.mrb[2].mxu1 %vm1640_vm8, %v1845_v18  ;;  %v2060_v18 = vld [vmem:[#allocation6 + $0x68] sm:$0xff]  ;;  %v6765_v31 = vrot.slane %v2465_v40, %v5538_v2 }
 0x387   : > { %v4603_v48 = vpack.c.bf16 %v1630_v11, %v1628_v56  ;;  %v6716_v24 = vpop.permute.xlu1 %2822  ;;  %4652 = vmatpush1.bf16.msra.mxu1 %v4651_v22  ;;  %v4601_v10 = vpack.c.bf16 %v1631_v46, %v1629_v63  ;;  %2037 = vmatprep.mubr.f32.mxu1 %v7611_v1  ;;  %v4669_v11 = vpack.c.bf16 %v6227_v15, %v6202_v39  ;;  %v7675_v46 = vld [vmem:[#allocation27_spill] sm:$0xff]  ;;  %v7676_v56 = vld [vmem:[#allocation26_spill] sm:$0xff] }
 0x388   : > { %4654 = vmatprep.subr.bf16.mxu1 %v4653_v16  ;;  %v2078_v59 = vpop.permute.xlu0 %2077  ;;  %v2457_v63 = vsel %vm7677_vm10, %v7676_v56, %v7675_v46  ;;  %v2061_v16 = vld [vmem:[#allocation6 + $0x70] sm:$0xff]  ;;  %v7679_v39 = vld [vmem:[#allocation18_spill] sm:$0xff] }
 0x389   : > { %v2110_v45 = vsel %vm7663_vm2, %v6545_v47, %v2078_v59  ;;  %v2134_v17 = vsel %vm7674_vm6, %v2078_v59, %v6545_v47  ;;  %4602 = vmatprep.subr.bf16.mxu0 %v4601_v10  ;;  %v4661_v47 = vpack.c.bf16 %v6124_v61, %v6082_v8  ;;  %v4665_v8 = vpack.c.bf16 %v6176_v28, %v6152_v7  ;;  %v7678_v10 = vld [vmem:[#allocation20_spill] sm:$0xff]  ;;  %v7682_v59 = vld [vmem:[#allocation17_spill] sm:$0xff]  ;;  %vm7702_vm2 = vmmov %vm7689_vm3 }
 0x38a   : > { %v2162_v54 = vmul.f32 %v6625_v49, %v2134_v17  ;;  %v2163_v29 = vmul.f32 %v6612_v36, %v2110_v45  ;;  %4604 = vmatpush1.bf16.msra.mxu0 %v4603_v48  ;;  %4547 = vmatmul.mubr.msk.f32.gmra.mrb[4].mxu1 %vm1640_vm8, %v1846_v30  ;;  %v2456_v15 = vsel %vm7680_vm7, %v7679_v39, %v7678_v10  ;;  %v7681_v30 = vld [vmem:[#allocation16_spill] sm:$0xff]  ;;  %v7684_v17 = vld [vmem:[#allocation22_spill] sm:$0xff]  ;;  %vm7703_vm6 = vmmov %vm7702_vm2 }
 0x38b   : > { %v6728_v5 = vpop.permute.xlu1 %2826  ;;  %4656 = vmatpush1.bf16.msra.mxu1 %v4655_v53  ;;  %2043 = vmatprep.mubr.f32.mxu1 %v7611_v1  ;;  %v4671_v53 = vpack.c.bf16 %v7682_v59, %v7681_v30  ;;  %v2480_v45 = vmul.f32 %v6765_v31, %v2457_v63  ;;  %vm7704_vm10 = vmmov %vm7702_vm2 }
 0x38c   : > { %v4659_v52 = vpack.c.bf16 %v2162_v54, %v2160_v50  ;;  %v1574_v51 = vpop.permute.xlu0 %1573  ;;  %v4657_v25 = vpack.c.bf16 %v2163_v29, %v2161_v62  ;;  %v2425_v50 = vsel %vm7683_vm11, %v7675_v46, %v7676_v56  ;;  %v7685_v62 = vld [vmem:[#allocation25_spill] sm:$0xff]  ;;  %v6782_v29 = vrot.slane %v2465_v40, %v5543_v3  ;;  %vm7709_vm7 = vmmov %vm7702_vm2 }
 0x38d   : > { %v1584_v22 = vsel %vm607_vm0, %v1574_v51, %v1550_v6  ;;  %v1608_v0 = vsel %vm607_vm0, %v1550_v6, %v1574_v51  ;;  %v4673_v54 = vpack.c.bf16 %v7685_v62, %v7684_v17  ;;  %v2274_v56 = vld [vmem:[#allocation6 + $0x80] sm:$0xff]  ;;  %vm7710_vm11 = vmmov %vm7702_vm2 }
 0x38e   : > { %4548 = vmatmul.mubr.msk.f32.gmra.mrb[6].mxu1 %vm1640_vm8, %v1847_v14  ;;  %4658 = vmatprep.subr.bf16.mxu1 %v4657_v25  ;;  %v1634_v19 = vmul.f32 %v6336_v37, %v1608_v0  ;;  %v1635_v7 = vmul.f32 %v6339_v34, %v1584_v22  ;;  %v7686_v14 = vld [vmem:[#allocation34_spill] sm:$0xff]  ;;  %v2479_v22 = vmul.f32 %v6782_v29, %v2425_v50  ;;  %v7690_v0 = vld [vmem:[#allocation32_spill] sm:$0xff] }
 0x38f   : > { %v1548_v12 = vpop.permute.xlu1 %1547  ;;  %4660 = vmatpush1.bf16.msra.mxu1 %v4659_v52  ;;  %2240 = vmatprep.mubr.f32.mxu1 %v7611_v1  ;;  %v7687_v52 = vld [vmem:[#allocation35_spill] sm:$0xff] }
 0x390   : > { %4662 = vmatprep.subr.bf16.mxu1 %v4661_v47  ;;  %v6735_v38 = vpop.permute.xlu0 %2832  ;;  %v2459_v51 = vsel %vm7688_vm13, %v7687_v52, %v7686_v14  ;;  %v2062_v47 = vld [vmem:[#allocation6 + $0x78] sm:$0xff]  ;;  %vm7713_vm13 = vmmov %vm7702_vm2 }
 0x391   : > { %v2484_v40 = vmul.f32 %v6765_v31, %v2459_v51 }
 0x392   : > { %4549 = vmatmul.mubr.msk.f32.vlgmr.msra.gmra.mrb[0].mxu1 %vm1640_vm8, %v2059_v55  ;;  %v2478_v55 = vmul.f32 %v6765_v31, %v2456_v15  ;;  %v7701_v15 = vld [vmem:[#allocation38_spill] sm:$0xff] }
 0x393   : > { %v1572_v61 = vpop.permute.xlu1 %1571  ;;  %4664 = vmatpush1.bf16.msra.mxu1 %v4663_v9  ;;  %2246 = vmatprep.mubr.f32.mxu1 %v7611_v1 }
 0x394   : > { %v1583_v42 = vsel %vm607_vm0, %v1572_v61, %v1548_v12  ;;  %v1607_v21 = vsel %vm607_vm0, %v1548_v12, %v1572_v61  ;;  %4666 = vmatprep.subr.bf16.mxu1 %v4665_v8  ;;  %v6747_v35 = vpop.permute.xlu0 %2836  ;;  %v2424_v12 = vsel %vm7689_vm3, %v7678_v10, %v7679_v39  ;;  %v7691_v8 = vld [vmem:[#allocation30_spill] sm:$0xff]  ;;  %v7700_v39 = vld [vmem:[#allocation40_spill] sm:$0xff]  ;;  %vm7714_vm3 = vmmov %vm7702_vm2 }
 0x395   : > { %v1632_v28 = vmul.f32 %v6336_v37, %v1607_v21  ;;  %v1633_v6 = vmul.f32 %v6339_v34, %v1583_v42  ;;  %v2458_v61 = vsel %vm7692_vm4, %v7691_v8, %v7690_v0  ;;  %v7694_v42 = vld [vmem:[#allocation24_spill] sm:$0xff]  ;;  %v2426_v63 = vsel %vm7699_vm12, %v7690_v0, %v7691_v8 }
 0x396   : > { %4550 = vmatmul.mubr.msk.f32.gmra.mrb[2].mxu1 %vm1640_vm8, %v2060_v18  ;;  %v7693_v18 = vld [vmem:[#allocation21_spill] sm:$0xff]  ;;  %v2460_v30 = vsel %vm7702_vm2, %v7701_v15, %v7700_v39  ;;  %v2481_v17 = vmul.f32 %v6782_v29, %v2426_v63  ;;  %v7706_v0 = vld [vmem:[#allocation28_spill] sm:$0xff]  ;;  %vm7724_vm4 = vcmask 916480  }
 0x397   : > { %v4607_v32 = vpack.c.bf16 %v1634_v19, %v1632_v28  ;;  %v6761_v26 = vpop.permute.xlu1 %2830  ;;  %4668 = vmatpush1.bf16.msra.mxu1 %v4667_v44  ;;  %v4605_v27 = vpack.c.bf16 %v1635_v7, %v1633_v6  ;;  %2252 = vmatprep.mubr.f32.mxu1 %v7611_v1  ;;  %v4675_v21 = vpack.c.bf16 %v7694_v42, %v7693_v18  ;;  %v7696_v28 = vld [vmem:[#allocation42_spill] sm:$0xff]  ;;  %v7697_v6 = vld [vmem:[#allocation43_spill] sm:$0xff]  ;;  %vm7728_vm12 = vmmov %vm7724_vm4 }
 0x398   : > { %4670 = vmatprep.subr.bf16.mxu1 %v4669_v11  ;;  %v6767_v48 = vpop.permute.xlu0 %1577  ;;  %v2427_v44 = vsel %vm7695_vm5, %v7686_v14, %v7687_v52  ;;  %v4677_v19 = vpack.c.bf16 %v2480_v45, %v2478_v55  ;;  %v2477_v7 = vmul.f32 %v6782_v29, %v2424_v12  ;;  %v2461_v11 = vsel %vm7698_vm9, %v7697_v6, %v7696_v28  ;;  %v2680_v45 = vld [vmem:[#allocation10 + $0xc] sm:$0x3]  ;;  %v7707_v42 = vld [vmem:[#allocation46_spill] sm:$0xff]  ;;  %vm7726_vm5 = vmmov %vm7724_vm4 }
 0x399   : > { %4606 = vmatprep.subr.bf16.mxu0 %v4605_v27  ;;  %v2483_v10 = vmul.f32 %v6782_v29, %v2427_v44  ;;  %v2429_v59 = vsel %vm7703_vm6, %v7696_v28, %v7697_v6  ;;  %v2428_v14 = vsel %vm7704_vm10, %v7700_v39, %v7701_v15  ;;  %v2486_v52 = vmul.f32 %v6765_v31, %v2460_v30  ;;  %v7711_v28 = vld [vmem:[#allocation23_spill] sm:$0xff]  ;;  %vm7727_vm9 = vmmov %vm7724_vm4 }
 0x39a   : > { %4608 = vmatpush1.bf16.msra.mxu0 %v4607_v32  ;;  %4551 = vmatmul.mubr.msk.f32.gmra.mrb[4].mxu1 %vm1640_vm8, %v2061_v16  ;;  %v2482_v32 = vmul.f32 %v6765_v31, %v2458_v61  ;;  %v4679_v16 = vpack.c.bf16 %v2479_v22, %v2477_v7  ;;  %v2487_v12 = vmul.f32 %v6782_v29, %v2429_v59  ;;  %v7705_v22 = vld [vmem:[#allocation29_spill] sm:$0xff]  ;;  %v2276_v7 = vld [vmem:[#allocation6 + $0x90] sm:$0xff]  ;;  %vm7729_vm2 = vmmov %vm7724_vm4 }
 0x39b   : > { %v6787_v25 = vpop.permute.xlu1 %2834  ;;  %4672 = vmatpush1.bf16.msra.mxu1 %v4671_v53  ;;  %2258 = vmatprep.mubr.f32.mxu1 %v7611_v1  ;;  %v2488_v53 = vmul.f32 %v6765_v31, %v2461_v11  ;;  %v6841_v55 = vrot.slane %v2680_v45, %v5538_v2  ;;  %v2672_v8 = vsel %vm806_vm1, %v7706_v0, %v7705_v22  ;;  %v7712_v6 = vld [vmem:[#allocation19_spill] sm:$0xff]  ;;  %vm7730_vm6 = vmmov %vm7729_vm2 }
 0x39c   : > { %4674 = vmatprep.subr.bf16.mxu1 %v4673_v54  ;;  %v6794_v9 = vpop.permute.xlu0 %2840  ;;  %v4681_v50 = vpack.c.bf16 %v2484_v40, %v2482_v32  ;;  %v2275_v54 = vld [vmem:[#allocation6 + $0x88] sm:$0xff]  ;;  %v2485_v18 = vmul.f32 %v6782_v29, %v2428_v14  ;;  %v2671_v11 = vsel %vm806_vm1, %v7712_v6, %v7711_v28  ;;  %vm7731_vm10 = vmmov %vm7729_vm2 }
 0x39d   : > { %v4685_v61 = vpack.c.bf16 %v2488_v53, %v2486_v52  ;;  %v2695_v32 = vmul.f32 %v6841_v55, %v2672_v8 }
 0x39e   : > { %4552 = vmatmul.mubr.msk.f32.gmra.mrb[6].mxu1 %vm1640_vm8, %v2062_v47  ;;  %v4683_v47 = vpack.c.bf16 %v2483_v10, %v2481_v17  ;;  %v7715_v17 = vld [vmem:[#allocation36_spill] sm:$0xff] }
 0x39f   : > { %v6811_v46 = vpop.permute.xlu1 %1551  ;;  %4676 = vmatpush1.bf16.msra.mxu1 %v4675_v21  ;;  %2354 = vmatprep.mubr.f32.mxu1 %v7611_v1  ;;  %v7708_v21 = vld [vmem:[#allocation47_spill] sm:$0xff] }
 0x3a0   : > { %4678 = vmatprep.subr.bf16.mxu1 %v4677_v19  ;;  %v6818_v27 = vpop.permute.xlu0 %2844  ;;  %v2430_v44 = vsel %vm7709_vm7, %v7708_v21, %v7707_v42  ;;  %v2462_v40 = vsel %vm7710_vm11, %v7707_v42, %v7708_v21  ;;  %vm7732_vm7 = vmmov %vm7729_vm2 }
 0x3a1   : > { %v2489_v15 = vmul.f32 %v6782_v29, %v2430_v44  ;;  %v2490_v30 = vmul.f32 %v6765_v31, %v2462_v40  ;;  %vm7733_vm11 = vmmov %vm7729_vm2 }
 0x3a2   : > { %4553 = vmatmul.mubr.msk.f32.vlgmr.msra.gmra.mrb[0].mxu1 %vm1640_vm8, %v2274_v56  ;;  %v2640_v56 = vsel %vm806_vm1, %v7705_v22, %v7706_v0 }
 0x3a3   : > { %v6830_v62 = vpop.permute.xlu1 %1575  ;;  %4680 = vmatpush1.bf16.msra.mxu1 %v4679_v16  ;;  %2360 = vmatprep.mubr.f32.mxu1 %v7611_v1  ;;  %v4687_v16 = vpack.c.bf16 %v2487_v12, %v2485_v18  ;;  %v2693_v12 = vmul.f32 %v6841_v55, %v2671_v11  ;;  %v7718_v18 = vld [vmem:[#allocation31_spill] sm:$0xff] }
 0x3a4   : > { %4682 = vmatprep.subr.bf16.mxu1 %v4681_v50  ;;  %v6837_v51 = vpop.permute.xlu0 %2848  ;;  %v6874_v50 = vrot.slane %v2680_v45, %v5543_v3 }
 0x3a5   : > { %v4693_v40 = vpack.c.bf16 %v2695_v32, %v2693_v12  ;;  %v2895_v12 = vld [vmem:[#allocation10 + $0xe] sm:$0x3] }
 0x3a6   : > { %4554 = vmatmul.mubr.msk.f32.gmra.mrb[2].mxu1 %vm1640_vm8, %v2275_v54  ;;  %v7716_v54 = vld [vmem:[#allocation37_spill] sm:$0xff]  ;;  %v2694_v8 = vmul.f32 %v6874_v50, %v2640_v56 }
 0x3a7   : > { %v6854_v19 = vpop.permute.xlu1 %2838  ;;  %4684 = vmatpush1.bf16.msra.mxu1 %v4683_v47  ;;  %2366 = vmatprep.mubr.f32.mxu1 %v7611_v1  ;;  %v2674_v14 = vsel %vm806_vm1, %v7716_v54, %v7715_v17  ;;  %v2639_v47 = vsel %vm806_vm1, %v7711_v28, %v7712_v6  ;;  %v2642_v21 = vsel %vm806_vm1, %v7715_v17, %v7716_v54  ;;  %v7719_v28 = vld [vmem:[#allocation44_spill] sm:$0xff]  ;;  %v7720_v6 = vld [vmem:[#allocation45_spill] sm:$0xff] }
 0x3a8   : > { %4686 = vmatprep.subr.bf16.mxu1 %v4685_v61  ;;  %v2423_v63 = vpop.permute.xlu0 %2422  ;;  %v7717_v61 = vld [vmem:[#allocation33_spill] sm:$0xff]  ;;  %v2699_v44 = vmul.f32 %v6841_v55, %v2674_v14  ;;  %v2676_v11 = vsel %vm806_vm1, %v7720_v6, %v7719_v28  ;;  %v2644_v17 = vsel %vm806_vm1, %v7719_v28, %v7720_v6  ;;  %v2887_v28 = vsel %vm7724_vm4, %v6683_v23, %v6728_v5  ;;  %vm7736_vm4 = vmmov %vm7729_vm2 }
 0x3a9   : > { %v2431_v10 = vsel %vm7713_vm13, %v6635_v41, %v2423_v63  ;;  %v2463_v39 = vsel %vm7714_vm3, %v2423_v63, %v6635_v41  ;;  %v2277_v41 = vld [vmem:[#allocation6 + $0x98] sm:$0xff]  ;;  %v2673_v42 = vsel %vm806_vm1, %v7718_v18, %v7717_v61  ;;  %v2388_v63 = vld [vmem:[#allocation6 + $0xa0] sm:$0xff]  ;;  %v2703_v54 = vmul.f32 %v6841_v55, %v2676_v11  ;;  %vm7734_vm13 = vmmov %vm7729_vm2 }
 0x3aa   : > { %v2491_v59 = vmul.f32 %v6782_v29, %v2431_v10  ;;  %v2492_v53 = vmul.f32 %v6765_v31, %v2463_v39  ;;  %4555 = vmatmul.mubr.msk.f32.gmra.mrb[4].mxu1 %vm1640_vm8, %v2276_v7  ;;  %v2692_v7 = vmul.f32 %v6874_v50, %v2639_v47  ;;  %v2697_v10 = vmul.f32 %v6841_v55, %v2673_v42  ;;  %v3110_v42 = vld [vmem:[#allocation10 + $0x10] sm:$0x3]  ;;  %vm7735_vm3 = vmmov %vm7729_vm2 }
 0x3ab   : > { %v6879_v52 = vpop.permute.xlu1 %2842  ;;  %4688 = vmatpush1.bf16.msra.mxu1 %v4687_v16  ;;  %2372 = vmatprep.mubr.f32.mxu1 %v7611_v1  ;;  %v2641_v16 = vsel %vm806_vm1, %v7717_v61, %v7718_v18  ;;  %v2702_v61 = vmul.f32 %v6874_v50, %v2644_v17  ;;  %v2677_v11 = vsel %vm806_vm1, %v6577_v43, %v6575_v57 }
 0x3ac   : > { %v4691_v22 = vpack.c.bf16 %v2491_v59, %v2489_v15  ;;  %v6886_v0 = vpop.permute.xlu0 %3039  ;;  %v4689_v45 = vpack.c.bf16 %v2492_v53, %v2490_v30  ;;  %v4695_v39 = vpack.c.bf16 %v2694_v8, %v2692_v7  ;;  %v2698_v15 = vmul.f32 %v6874_v50, %v2642_v21  ;;  %v7721_v30 = vld [vmem:[#allocation41_spill] sm:$0xff]  ;;  %v7722_v59 = vld [vmem:[#allocation39_spill] sm:$0xff] }
 0x3ad   : > { %v2675_v53 = vsel %vm806_vm1, %v7722_v59, %v7721_v30  ;;  %v4697_v14 = vpack.c.bf16 %v2699_v44, %v2697_v10  ;;  %v2643_v47 = vsel %vm806_vm1, %v7721_v30, %v7722_v59  ;;  %v2645_v44 = vsel %vm806_vm1, %v6575_v57, %v6577_v43 }
 0x3ae   : > { %4556 = vmatmul.mubr.msk.f32.gmra.mrb[6].mxu1 %vm1640_vm8, %v2277_v41  ;;  %4690 = vmatprep.subr.bf16.mxu1 %v4689_v45  ;;  %v2696_v41 = vmul.f32 %v6874_v50, %v2641_v16  ;;  %v2389_v45 = vld [vmem:[#allocation6 + $0xa8] sm:$0xff]  ;;  %v2701_v8 = vmul.f32 %v6841_v55, %v2675_v53  ;;  %v6935_v7 = vrot.slane %v2895_v12, %v5543_v3 }
 0x3af   : > { %v6901_v56 = vpop.permute.xlu1 %2846  ;;  %4692 = vmatpush1.bf16.msra.mxu1 %v4691_v22  ;;  %2569 = vmatprep.mubr.f32.mxu1 %v7611_v1  ;;  %v6948_v16 = vrot.slane %v3110_v42, %v5543_v3  ;;  %v2704_v30 = vmul.f32 %v6874_v50, %v2645_v44  ;;  %v2854_v59 = vsel %vm7726_vm5, %v6716_v24, %v6667_v58  ;;  %vm7738_vm5 = vmmov %vm7729_vm2 }
 0x3b0   : > { %4694 = vmatprep.subr.bf16.mxu1 %v4693_v40  ;;  %v6908_v32 = vpop.permute.xlu0 %3043  ;;  %v4699_v21 = vpack.c.bf16 %v2698_v15, %v2696_v41  ;;  %v2700_v40 = vmul.f32 %v6874_v50, %v2643_v47  ;;  %7723 = vst [vmem:[#allocation27_spill] sm:$0xff] %v6935_v7  ;;  %v4701_v6 = vpack.c.bf16 %v2703_v54, %v2701_v8 }
 0x3b1   : > { %7725 = vst [vmem:[#allocation26_spill] sm:$0xff] %v6948_v16  ;;  %v2886_v57 = vsel %vm7727_vm9, %v6667_v58, %v6716_v24  ;;  %v2855_v43 = vsel %vm7728_vm12, %v6728_v5, %v6683_v23  ;;  %v2857_v58 = vsel %vm7729_vm2, %v6787_v25, %v6747_v35  ;;  %v2856_v5 = vsel %vm7730_vm6, %v6761_v26, %v6735_v38  ;;  %vm7739_vm9 = vmmov %vm7729_vm2 }
 0x3b2   : > { %4557 = vmatmul.mubr.msk.f32.vlgmr.msra.gmra.mrb[0].mxu1 %vm1640_vm8, %v2388_v63  ;;  %v6945_v63 = vrot.slane %v2895_v12, %v5538_v2  ;;  %v4703_v15 = vpack.c.bf16 %v2702_v61, %v2700_v40  ;;  %v2391_v12 = vld [vmem:[#allocation6 + $0xb8] sm:$0xff]  ;;  %v2909_v8 = vmul.f32 %v6935_v7, %v2855_v43  ;;  %v2888_v40 = vsel %vm7732_vm7, %v6735_v38, %v6761_v26  ;;  %vm7740_vm12 = vmmov %vm7729_vm2 }
 0x3b3   : > { %v6923_v22 = vpop.permute.xlu1 %2850  ;;  %4696 = vmatpush1.bf16.msra.mxu1 %v4695_v39  ;;  %2575 = vmatprep.mubr.f32.mxu1 %v7611_v1  ;;  %v2390_v39 = vld [vmem:[#allocation6 + $0xb0] sm:$0xff]  ;;  %v1585_v38 = vsel %vm607_vm0, %v6830_v62, %v6811_v46  ;;  %v1609_v26 = vsel %vm607_vm0, %v6811_v46, %v6830_v62  ;;  %v7018_v46 = vrot.slane %v3110_v42, %v5538_v2 }
 0x3b4   : > { %4698 = vmatprep.subr.bf16.mxu1 %v4697_v14  ;;  %v6928_v18 = vpop.permute.xlu0 %3047  ;;  %v2910_v53 = vmul.f32 %v6945_v63, %v2887_v28  ;;  %v2705_v14 = vmul.f32 %v6841_v55, %v2677_v11  ;;  %v2908_v23 = vmul.f32 %v6945_v63, %v2886_v57  ;;  %v2913_v28 = vmul.f32 %v6935_v7, %v2857_v58 }
 0x3b5   : > { %7737 = vst [vmem:[#allocation20_spill] sm:$0xff] %v7018_v46  ;;  %v2860_v42 = vsel %vm7738_vm5, %v6901_v56, %v6837_v51 }
 0x3b6   : > { %4558 = vmatmul.mubr.msk.f32.gmra.mrb[2].mxu1 %vm1640_vm8, %v2389_v45  ;;  %v2907_v45 = vmul.f32 %v6935_v7, %v2854_v59  ;;  %v2890_v59 = vsel %vm7736_vm4, %v6794_v9, %v6854_v19  ;;  %vm7749_vm4 = vcmask 261120  }
 0x3b7   : > { %v6950_v10 = vpop.permute.xlu1 %3037  ;;  %4700 = vmatpush1.bf16.msra.mxu1 %v4699_v21  ;;  %2581 = vmatprep.mubr.f32.mxu1 %v7611_v1 }
 0x3b8   : > { %4702 = vmatprep.subr.bf16.mxu1 %v4701_v6  ;;  %v2638_v3 = vpop.permute.xlu0 %2637  ;;  %v2911_v6 = vmul.f32 %v6935_v7, %v2856_v5  ;;  %v3101_v58 = vsel %vm856_vm15, %v6886_v0, %v6950_v10  ;;  %v2892_v5 = vsel %vm7739_vm9, %v6837_v51, %v6901_v56  ;;  %v2919_v51 = vmul.f32 %v6935_v7, %v2860_v42 }
 0x3b9   : > { %v2646_v17 = vsel %vm806_vm1, %v6661_v60, %v2638_v3  ;;  %v2678_v54 = vsel %vm806_vm1, %v2638_v3, %v6661_v60  ;;  %v2889_v60 = vsel %vm7731_vm10, %v6747_v35, %v6787_v25  ;;  %v2859_v35 = vsel %vm7733_vm11, %v6879_v52, %v6818_v27 }
 0x3ba   : > { %v2706_v24 = vmul.f32 %v6874_v50, %v2646_v17  ;;  %v2707_v41 = vmul.f32 %v6841_v55, %v2678_v54  ;;  %4559 = vmatmul.mubr.msk.f32.gmra.mrb[4].mxu1 %vm1640_vm8, %v2390_v39  ;;  %v4709_v25 = vpack.c.bf16 %v2910_v53, %v2908_v23  ;;  %v2914_v11 = vmul.f32 %v6945_v63, %v2889_v60 }
 0x3bb   : > { %v3042_v47 = vpop.permute.xlu1 %3041  ;;  %4704 = vmatpush1.bf16.msra.mxu1 %v4703_v15  ;;  %2587 = vmatprep.mubr.f32.mxu1 %v7611_v1  ;;  %v2891_v39 = vsel %vm7734_vm13, %v6818_v27, %v6879_v52  ;;  %v2858_v15 = vsel %vm7735_vm3, %v6854_v19, %v6794_v9  ;;  %v2603_v27 = vld [vmem:[#allocation6 + $0xc0] sm:$0xff]  ;;  %v2912_v52 = vmul.f32 %v6945_v63, %v2888_v40  ;;  %vm7743_vm10 = vcmask 7168  }
 0x3bc   : > { %v4707_v61 = vpack.c.bf16 %v2706_v24, %v2704_v30  ;;  %v6985_v21 = vpop.permute.xlu0 %3051  ;;  %v4705_v44 = vpack.c.bf16 %v2707_v41, %v2705_v14  ;;  %v2917_v57 = vmul.f32 %v6935_v7, %v2859_v35  ;;  %v4711_v3 = vpack.c.bf16 %v2909_v8, %v2907_v45  ;;  %v2604_v41 = vld [vmem:[#allocation6 + $0xc8] sm:$0xff]  ;;  %vm7744_vm7 = vmmov %vm7743_vm10 }
 0x3bd   : > { %v4715_v43 = vpack.c.bf16 %v2913_v28, %v2911_v6  ;;  %v2918_v53 = vmul.f32 %v6945_v63, %v2891_v39  ;;  %v3102_v17 = vsel %vm856_vm15, %v6908_v32, %v3042_v47  ;;  %v1636_v54 = vmul.f32 %v6336_v37, %v1609_v26  ;;  %vm7751_vm5 = vmmov %vm7744_vm7 }
 0x3be   : > { %4560 = vmatmul.mubr.msk.f32.gmra.mrb[6].mxu1 %vm1640_vm8, %v2391_v12  ;;  %4706 = vmatprep.subr.bf16.mxu1 %v4705_v44  ;;  %v1637_v14 = vmul.f32 %v6339_v34, %v1585_v38  ;;  %v2915_v9 = vmul.f32 %v6935_v7, %v2858_v15  ;;  %v4713_v2 = vpack.c.bf16 %v2914_v11, %v2912_v52 }
 0x3bf   : > { %v7009_v30 = vpop.permute.xlu1 %3045  ;;  %4708 = vmatpush1.bf16.msra.mxu1 %v4707_v61  ;;  %2784 = vmatprep.mubr.f32.mxu1 %v7611_v1  ;;  %v2916_v19 = vmul.f32 %v6945_v63, %v2890_v59  ;;  %v3070_v60 = vsel %vm856_vm15, %v3042_v47, %v6908_v32  ;;  %v3125_v12 = vmul.f32 %v7018_v46, %v3102_v17  ;;  %v1535_v17 = vld [vmem:[#allocation6 + $0x20] sm:$0xff] }
 0x3c0   : > { %4710 = vmatprep.subr.bf16.mxu1 %v4709_v25  ;;  %v7020_v62 = vpop.permute.xlu0 %3055  ;;  %v4719_v23 = vpack.c.bf16 %v2917_v57, %v2915_v9  ;;  %v3069_v8 = vsel %vm856_vm15, %v6950_v10, %v6886_v0  ;;  %v3123_v56 = vmul.f32 %v7018_v46, %v3101_v58  ;;  %v2920_v28 = vmul.f32 %v6945_v63, %v2892_v5 }
 0x3c1   : > { %v4717_v40 = vpack.c.bf16 %v2918_v53, %v2916_v19  ;;  %v3124_v0 = vmul.f32 %v6948_v16, %v3070_v60  ;;  %v3122_v25 = vmul.f32 %v6948_v16, %v3069_v8  ;;  %v3103_v26 = vsel %vm856_vm15, %v6928_v18, %v7009_v30  ;;  %v1536_v60 = vld [vmem:[#allocation6 + $0x28] sm:$0xff] }
 0x3c2   : > { %4561 = vmatmul.mubr.msk.f32.vlgmr.msra.gmra.mrb[0].mxu1 %vm1640_vm8, %v2603_v27  ;;  %v4725_v38 = vpack.c.bf16 %v3125_v12, %v3123_v56 }
 0x3c3   : > { %v3050_v24 = vpop.permute.xlu1 %3049  ;;  %4712 = vmatpush1.bf16.msra.mxu1 %v4711_v3  ;;  %2790 = vmatprep.mubr.f32.mxu1 %v7611_v1 }
 0x3c4   : > { %4714 = vmatprep.subr.bf16.mxu1 %v4713_v2  ;;  %v1554_v45 = vpop.permute.xlu0 %1553  ;;  %v3104_v10 = vsel %vm856_vm15, %v6985_v21, %v3050_v24  ;;  %v3072_v15 = vsel %vm856_vm15, %v3050_v24, %v6985_v21  ;;  %v3071_v21 = vsel %vm856_vm15, %v7009_v30, %v6928_v18 }
 0x3c5   : > { %v1586_v61 = vsel %vm607_vm0, %v6767_v48, %v1554_v45  ;;  %v1610_v44 = vsel %vm607_vm0, %v1554_v45, %v6767_v48  ;;  %v2605_v48 = vld [vmem:[#allocation6 + $0xd0] sm:$0xff]  ;;  %v3129_v59 = vmul.f32 %v7018_v46, %v3104_v10  ;;  %v3128_v19 = vmul.f32 %v6948_v16, %v3072_v15  ;;  %v2819_v10 = vld [vmem:[#allocation6 + $0xe8] sm:$0xff] }
 0x3c6   : > { %v1638_v32 = vmul.f32 %v6336_v37, %v1610_v44  ;;  %v1639_v47 = vmul.f32 %v6339_v34, %v1586_v61  ;;  %4562 = vmatmul.mubr.msk.f32.gmra.mrb[2].mxu1 %vm1640_vm8, %v2604_v41  ;;  %v3126_v41 = vmul.f32 %v6948_v16, %v3071_v21  ;;  %v2818_v61 = vld [vmem:[#allocation6 + $0xe0] sm:$0xff]  ;;  %v2820_v15 = vld [vmem:[#allocation6 + $0xf0] sm:$0xff] }
 0x3c7   : > { %v3054_v35 = vpop.permute.xlu1 %3053  ;;  %4716 = vmatpush1.bf16.msra.mxu1 %v4715_v43  ;;  %2796 = vmatprep.mubr.f32.mxu1 %v7611_v1  ;;  %v4727_v43 = vpack.c.bf16 %v3124_v0, %v3122_v25 }
 0x3c8   : > { %v4611_v6 = vpack.c.bf16 %v1638_v32, %v1636_v54  ;;  %4718 = vmatprep.subr.bf16.mxu1 %v4717_v40  ;;  %v2853_v11 = vpop.permute.xlu0 %2852  ;;  %v4609_v39 = vpack.c.bf16 %v1639_v47, %v1637_v14  ;;  %v2606_v54 = vld [vmem:[#allocation6 + $0xd8] sm:$0xff]  ;;  %v3105_v42 = vsel %vm856_vm15, %v7020_v62, %v3054_v35  ;;  %v4731_v44 = vpack.c.bf16 %v3128_v19, %v3126_v41  ;;  %v1537_v47 = vld [vmem:[#allocation6 + $0x30] sm:$0xff] }
 0x3c9   : > { %v2861_v27 = vsel %vm7740_vm12, %v6923_v22, %v2853_v11  ;;  %v2893_v52 = vsel %vm7729_vm2, %v2853_v11, %v6923_v22  ;;  %v3127_v22 = vmul.f32 %v7018_v46, %v3103_v26  ;;  %v3131_v12 = vmul.f32 %v7018_v46, %v3105_v42 }
 0x3ca   : > { %v2921_v57 = vmul.f32 %v6935_v7, %v2861_v27  ;;  %v2922_v3 = vmul.f32 %v6945_v63, %v2893_v52  ;;  %4610 = vmatprep.subr.bf16.mxu0 %v4609_v39  ;;  %4563 = vmatmul.mubr.msk.f32.gmra.mrb[4].mxu1 %vm1640_vm8, %v2605_v48  ;;  %v3033_v52 = vld [vmem:[#allocation6 + $0x100] sm:$0xff] }
 0x3cb   : > { %v3058_v53 = vpop.permute.xlu1 %3057  ;;  %4612 = vmatpush1.bf16.msra.mxu0 %v4611_v6  ;;  %4720 = vmatpush1.bf16.msra.mxu1 %v4719_v23  ;;  %v4729_v24 = vpack.c.bf16 %v3129_v59, %v3127_v22  ;;  %v3073_v23 = vsel %vm856_vm15, %v3054_v35, %v7020_v62  ;;  %v2821_v59 = vld [vmem:[#allocation6 + $0xf8] sm:$0xff] }
 0x3cc   : > { %v4723_v14 = vpack.c.bf16 %v2921_v57, %v2919_v51  ;;  %4726 = vmatprep.subr.bf16.mxu0 %v4725_v38  ;;  %v3060_v9 = vpop.permute.xlu0 %3059  ;;  %2802 = vmatprep.mubr.f32.mxu1 %v7611_v1  ;;  %v4721_v2 = vpack.c.bf16 %v2922_v3, %v2920_v28  ;;  %v3130_v40 = vmul.f32 %v6948_v16, %v3073_v23  ;;  %v3034_v57 = vld [vmem:[#allocation6 + $0x108] sm:$0xff]  ;;  %v3035_v3 = vld [vmem:[#allocation6 + $0x110] sm:$0xff] }
 0x3cd   : > { %v3074_v18 = vsel %vm856_vm15, %v3058_v53, %v3060_v9  ;;  %v3106_v30 = vsel %vm856_vm15, %v3060_v9, %v3058_v53 }
 0x3ce   : > { %v3133_v58 = vmul.f32 %v7018_v46, %v3106_v30  ;;  %4537 = vmatmul.mubr.msk.f32.vlgmr.msra.gmra.mrb[16].mxu0 %vm1640_vm8, %v1535_v17  ;;  %4564 = vmatmul.mubr.msk.f32.gmra.mrb[6].mxu1 %vm1640_vm8, %v2606_v54  ;;  %v3132_v45 = vmul.f32 %v6948_v16, %v3074_v18 }
 0x3cf   : > { %4722 = vmatprep.subr.bf16.mxu1 %v4721_v2  ;;  %v3062_v5 = vpop.permute.xlu1 %3061  ;;  %4728 = vmatpush1.bf16.msra.mxu0 %v4727_v43 }
 0x3d0   : > { %4724 = vmatpush1.bf16.msra.mxu1 %v4723_v14  ;;  %4730 = vmatprep.subr.bf16.mxu0 %v4729_v24  ;;  %v3064_v8 = vpop.permute.xlu0 %3063  ;;  %v4733_v51 = vpack.c.bf16 %v3133_v58, %v3131_v12  ;;  %v4735_v28 = vpack.c.bf16 %v3132_v45, %v3130_v40 }
 0x3d1   : > { %4813 = vmatprep.subr.bf16.mxu1 %v4725_v38  ;;  %1723 = vmatprep.mubr.f32.mxu0 %v7611_v1  ;;  %v3075_v62 = vsel %vm856_vm15, %v3062_v5, %v3064_v8  ;;  %v3107_v56 = vsel %vm856_vm15, %v3064_v8, %v3062_v5  ;;  %v1538_v38 = vld [vmem:[#allocation6 + $0x38] sm:$0xff] }
 0x3d2   : > { %2999 = vmatprep.mubr.f32.mxu1 %v7611_v1  ;;  %4538 = vmatmul.mubr.msk.f32.gmra.mrb[18].mxu0 %vm1640_vm8, %v1536_v60  ;;  %v3134_v35 = vmul.f32 %v6948_v16, %v3075_v62  ;;  %v3135_v6 = vmul.f32 %v7018_v46, %v3107_v56 }
 0x3d3   : > { %4565 = vmatmul.mubr.msk.f32.vlgmr.msra.gmra.mrb[0].mxu1 %vm1640_vm8, %v2818_v61  ;;  %v3066_v32 = vpop.permute.xlu1 %3065  ;;  %4732 = vmatpush1.bf16.msra.mxu0 %v4731_v44 }
 0x3d4   : > { %4817 = vmatpush1.bf16.msra.mxu1 %v4727_v43  ;;  %4734 = vmatprep.subr.bf16.mxu0 %v4733_v51  ;;  %v3068_v0 = vpop.permute.xlu0 %3067  ;;  %v3036_v43 = vld [vmem:[#allocation6 + $0x118] sm:$0xff] }
 0x3d5   : > { %4814 = vmatprep.subr.bf16.mxu1 %v4729_v24  ;;  %v3076_v48 = vsel %vm856_vm15, %v3066_v32, %v3068_v0  ;;  %v3108_v25 = vsel %vm856_vm15, %v3068_v0, %v3066_v32  ;;  %1729 = vmatprep.mubr.f32.mxu0 %v7611_v1 }
 0x3d6   : > { %v3136_v11 = vmul.f32 %v6948_v16, %v3076_v48  ;;  %v3137_v39 = vmul.f32 %v7018_v46, %v3108_v25  ;;  %3005 = vmatprep.mubr.f32.mxu1 %v7611_v1  ;;  %4539 = vmatmul.mubr.msk.f32.gmra.mrb[20].mxu0 %vm1640_vm8, %v1537_v47 }
 0x3d7   : > { %4566 = vmatmul.mubr.msk.f32.gmra.mrb[2].mxu1 %vm1640_vm8, %v2819_v10  ;;  %4736 = vmatpush1.bf16.msra.mxu0 %v4735_v28 }
 0x3d8   : > { %v4739_v26 = vpack.c.bf16 %v3136_v11, %v3134_v35  ;;  %4818 = vmatpush1.bf16.msra.mxu1 %v4731_v44  ;;  %1735 = vmatprep.mubr.f32.mxu0 %v7611_v1  ;;  %v4737_v27 = vpack.c.bf16 %v3137_v39, %v3135_v6 }
 0x3d9   : > { %4815 = vmatprep.subr.bf16.mxu1 %v4733_v51  ;;  %3011 = vmatprep.mubr.f32.mxu1 %v7611_v1 }
 0x3da   : > { %4540 = vmatmul.mubr.msk.f32.gmra.mrb[22].mxu0 %vm1640_vm8, %v1538_v38  ;;  %4738 = vmatprep.subr.bf16.mxu0 %v4737_v27 }
 0x3db   : > { %4567 = vmatmul.mubr.msk.f32.gmra.mrb[4].mxu1 %vm1640_vm8, %v2820_v15  ;;  %4740 = vmatpush1.bf16.msra.mxu0 %v4739_v26 }
 0x3dc   : > { %4819 = vmatpush1.bf16.msra.mxu1 %v4735_v28  ;;  %3017 = vmatprep.mubr.f32.mxu1 %v7611_v1 }
 0x3dd   : > { %4816 = vmatprep.subr.bf16.mxu1 %v4737_v27  ;;  %3214 = vmatprep.mubr.f32.mxu0 %v7611_v1 }
 0x3de   : > { %4569 = vmatmul.mubr.msk.f32.vlgmr.msra.gmra.mrb[24].mxu0 %vm1640_vm8, %v3033_v52 }
 0x3df   : > { %4568 = vmatmul.mubr.msk.f32.gmra.mrb[6].mxu1 %vm1640_vm8, %v2821_v59  ;;  %3220 = vmatprep.mubr.f32.mxu0 %v7611_v1 }
 0x3e0   : > { %4820 = vmatpush1.bf16.msra.mxu1 %v4739_v26  ;;  %3232 = vmatprep.mubr.f32.mxu1 %v7611_v1 }
 0x3e2   : > { %4570 = vmatmul.mubr.msk.f32.gmra.mrb[26].mxu0 %vm1640_vm8, %v3034_v57 }
 0x3e3   : > { %3226 = vmatprep.mubr.f32.mxu0 %v7611_v1 }
 0x3e4   : > { %v3254_v40 = vpop.permute.xlu1 %3253 }
 0x3e5   : > { %v3259_v0 = vpop.permute.xlu0 %3258 }
 0x3e6   : > { %4571 = vmatmul.mubr.msk.f32.gmra.mrb[28].mxu0 %vm1640_vm8, %v3035_v3 }
 0x3e7   : > { %4572 = vmatmul.mubr.msk.f32.vlgmr.msra.gmra.mrb[6].mxu1 %vm1640_vm8, %v3036_v43  ;;  %3453 = vmatprep.mubr.f32.mxu0 %v7611_v1  ;;  %vm7741_vm8 = vcmask 1039360  }
 0x3e8   : > { %v3264_v43 = vpop.permute.xlu1 %3263  ;;  %vm7742_vm6 = vmmov %vm7741_vm8 }
 0x4a1   : > { %v1719_v21 = vpop.f32.mrb[16].mxu0 }
 0x4a2   : > { %v1721_v53 = vpop.f32.mrb[17].mxu0 }
 0x4a5   : > { %v1725_v17 = vpop.f32.mrb[18].mxu0 }
 0x4a6   : > { %v3001_v54 = vpop.f32.mrb[0].mxu1  ;;  %v1727_v22 = vpop.f32.mrb[19].mxu0 }
 0x4a7   : > { %v4821_v14 = vadd.f32 %v3001_v54, %v1719_v21  ;;  %v3003_v9 = vpop.f32.mrb[1].mxu1 }
 0x4a8   : > { %v4823_v2 = vadd.f32 %v3003_v9, %v1721_v53 }
 0x4a9   : > { %v1731_v19 = vpop.f32.mrb[20].mxu0 }
 0x4aa   : > { %v3007_v42 = vpop.f32.mrb[2].mxu1  ;;  %v1733_v18 = vpop.f32.mrb[21].mxu0 }
 0x4ab   : > { %v4825_v30 = vadd.f32 %v3007_v42, %v1725_v17  ;;  %v3009_v58 = vpop.f32.mrb[3].mxu1  ;;  %v3269_v17 = vpop.permute.xlu0 %3268 }
 0x4ac   : > { %v4827_v24 = vadd.f32 %v3009_v58, %v1727_v22 }
 0x4ad   : > { %v1737_v41 = vpop.f32.mrb[22].mxu0 }
 0x4ae   : > { %v3013_v23 = vpop.f32.mrb[4].mxu1  ;;  %v1739_v5 = vpop.f32.mrb[23].mxu0 }
 0x4af   : > { %v4829_v60 = vadd.f32 %v3013_v23, %v1731_v19  ;;  %v3015_v12 = vpop.f32.mrb[5].mxu1  ;;  %v4344_v23 = vld [vmem:[%s7540_s6] sm:$0xf] }
 0x4b0   : > { %v4831_v45 = vadd.f32 %v3015_v12, %v1733_v18 }
 0x4b1   : > { %v3216_v8 = vpop.f32.mrb[24].mxu0 }
 0x4b2   : > { %v4822_v61 = vadd.f32 %v4821_v14, %v3216_v8  ;;  %v3218_v44 = vpop.f32.mrb[25].mxu0 }
 0x4b3   : > { %v4824_v62 = vadd.f32 %v4823_v2, %v3218_v44 }
 0x4b4   : > { %v3271_v51 = vadd.f32 %v4822_v61, %v3254_v40 }
 0x4b5   : > { %v3272_v56 = vadd.f32 %v4824_v62, %v3254_v40  ;;  %v3222_v32 = vpop.f32.mrb[26].mxu0 }
 0x4b6   : > { %5037 = vtanh.f32 %v3271_v51  ;;  %v4826_v47 = vadd.f32 %v4825_v30, %v3222_v32  ;;  %v3224_v28 = vpop.f32.mrb[27].mxu0 }
 0x4b7   : > { %5039 = vtanh.f32 %v3272_v56  ;;  %v4828_v10 = vadd.f32 %v4827_v24, %v3224_v28 }
 0x4b8   : > { %v3273_v35 = vadd.f32 %v4826_v47, %v3259_v0 }
 0x4b9   : > { %v3228_v48 = vpop.f32.mrb[28].mxu0  ;;  %v3274_v57 = vadd.f32 %v4828_v10, %v3259_v0 }
 0x4ba   : > { %5041 = vtanh.f32 %v3273_v35  ;;  %v4830_v25 = vadd.f32 %v4829_v60, %v3228_v48  ;;  %v3234_v6 = vpop.f32.mrb[6].mxu1  ;;  %v3230_v11 = vpop.f32.mrb[29].mxu0 }
 0x4bb   : > { %v4833_v39 = vadd.f32 %v3234_v6, %v1737_v41  ;;  %v4832_v38 = vadd.f32 %v4831_v45, %v3230_v11  ;;  %v3236_v26 = vpop.f32.mrb[7].mxu1  ;;  %5043 = vtanh.f32 %v3274_v57 }
 0x4bc   : > { %v4834_v15 = vadd.f32 %v3236_v26, %v1739_v5  ;;  %v3275_v21 = vadd.f32 %v4830_v25, %v3264_v43 }
 0x4bd   : > { %v3276_v53 = vadd.f32 %v4832_v38, %v3264_v43  ;;  %v3277_v54 = vadd.f32 %v4833_v39, %v3269_v17 }
 0x4be   : > { %5045 = vtanh.f32 %v3275_v21  ;;  %v3278_v2 = vadd.f32 %v4834_v15, %v3269_v17 }
 0x4bf   : > { %5047 = vtanh.f32 %v3276_v53 }
 0x4c0   : > { %v7124_v27 = vpop.eup %5037  ;;  %5049 = vtanh.f32 %v3277_v54 }
 0x4c1   : > { %v7126_v52 = vpop.eup %5039  ;;  %3354 = vrot.lane.b32.xlu1 %v7124_v27, %s5280_s11  ;;  %5051 = vtanh.f32 %v3278_v2 }
 0x4c2   : > { %3860 = vrot.lane.b32.xlu0 %v7126_v52, %s5275_s28 }
 0x4c4   : > { %v7132_v59 = vpop.eup %5041 }
 0x4c5   : > { %3308 = vrot.lane.b32.xlu1 %v7124_v27, %s5277_s20  ;;  %v7150_v3 = vpop.eup %5043 }
 0x4c6   : > { %3356 = vrot.lane.b32.xlu0 %v7132_v59, %s5280_s11 }
 0x4c8   : > { %v7172_v22 = vpop.eup %5045 }
 0x4c9   : > { %3548 = vrot.lane.b32.xlu1 %v7124_v27, %s5271_s17  ;;  %v7174_v14 = vpop.eup %5047 }
 0x4ca   : > { %3310 = vrot.lane.b32.xlu0 %v7132_v59, %s5277_s20  ;;  %v7180_v9 = vpop.eup %5049 }
 0x4cb   : > { %v7198_v19 = vpop.eup %5051 }
 0x4cd   : > { %3670 = vrot.lane.b32.xlu1 %v7124_v27, %s5272_s19 }
 0x4ce   : > { %3550 = vrot.lane.b32.xlu0 %v7132_v59, %s5271_s17 }
 0x4d1   : > { %3858 = vrot.lane.b32.xlu1 %v7124_v27, %s5275_s28 }
 0x4d2   : > { %3672 = vrot.lane.b32.xlu0 %v7132_v59, %s5272_s19 }
 0x4d5   : > { %3342 = vrot.lane.b32.xlu1 %v7126_v52, %s5280_s11 }
 0x4d6   : > { %3344 = vrot.lane.b32.xlu0 %v7150_v3, %s5280_s11 }
 0x4d9   : > { %3292 = vrot.lane.b32.xlu1 %v7126_v52, %s5277_s20 }
 0x4da   : > { %3294 = vrot.lane.b32.xlu0 %v7150_v3, %s5277_s20 }
 0x4dd   : > { %3536 = vrot.lane.b32.xlu1 %v7126_v52, %s5271_s17 }
 0x4de   : > { %3538 = vrot.lane.b32.xlu0 %v7150_v3, %s5271_s17 }
 0x4e1   : > { %3658 = vrot.lane.b32.xlu1 %v7126_v52, %s5272_s19 }
 0x4e2   : > { %3660 = vrot.lane.b32.xlu0 %v7150_v3, %s5272_s19 }
 0x4e5   : > { %3862 = vrot.lane.b32.xlu1 %v7132_v59, %s5275_s28 }
 0x4e6   : > { %3864 = vrot.lane.b32.xlu0 %v7150_v3, %s5275_s28 }
 0x4e9   : > { %3358 = vrot.lane.b32.xlu1 %v7172_v22, %s5280_s11 }
 0x4ea   : > { %3868 = vrot.lane.b32.xlu0 %v7174_v14, %s5275_s28 }
 0x4ed   : > { %3312 = vrot.lane.b32.xlu1 %v7172_v22, %s5277_s20 }
 0x4ee   : > { %3360 = vrot.lane.b32.xlu0 %v7180_v9, %s5280_s11 }
 0x4f1   : > { %3552 = vrot.lane.b32.xlu1 %v7172_v22, %s5271_s17 }
 0x4f2   : > { %3314 = vrot.lane.b32.xlu0 %v7180_v9, %s5277_s20 }
 0x4f5   : > { %3674 = vrot.lane.b32.xlu1 %v7172_v22, %s5272_s19 }
 0x4f6   : > { %3554 = vrot.lane.b32.xlu0 %v7180_v9, %s5271_s17 }
 0x4f9   : > { %3866 = vrot.lane.b32.xlu1 %v7172_v22, %s5275_s28 }
 0x4fa   : > { %3676 = vrot.lane.b32.xlu0 %v7180_v9, %s5272_s19 }
 0x4fd   : > { %3346 = vrot.lane.b32.xlu1 %v7174_v14, %s5280_s11 }
 0x4fe   : > { %3348 = vrot.lane.b32.xlu0 %v7198_v19, %s5280_s11 }
 0x501   : > { %3980 = vrot.lane.b32.xlu1 %v7124_v27, %s5282_s26 }
 0x502   : > { %3982 = vrot.lane.b32.xlu0 %v7126_v52, %s5282_s26 }
 0x505   : > { %3296 = vrot.lane.b32.xlu1 %v7174_v14, %s5277_s20 }
 0x506   : > { %3298 = vrot.lane.b32.xlu0 %v7198_v19, %s5277_s20 }
 0x509   : > { %3540 = vrot.lane.b32.xlu1 %v7174_v14, %s5271_s17 }
 0x50a   : > { %3986 = vrot.lane.b32.xlu0 %v7150_v3, %s5282_s26 }
 0x50d   : > { %3662 = vrot.lane.b32.xlu1 %v7174_v14, %s5272_s19 }
 0x50e   : > { %3542 = vrot.lane.b32.xlu0 %v7198_v19, %s5271_s17 }
 0x511   : > { %3870 = vrot.lane.b32.xlu1 %v7180_v9, %s5275_s28 }
 0x512   : > { %3990 = vrot.lane.b32.xlu0 %v7174_v14, %s5282_s26 }
 0x515   : > { %3984 = vrot.lane.b32.xlu1 %v7132_v59, %s5282_s26 }
 0x516   : > { %3664 = vrot.lane.b32.xlu0 %v7198_v19, %s5272_s19 }
 0x519   : > { %3988 = vrot.lane.b32.xlu1 %v7172_v22, %s5282_s26 }
 0x51a   : > { %4104 = vrot.lane.b32.xlu0 %v7126_v52, %s5276_s23 }
 0x51d   : > { %3992 = vrot.lane.b32.xlu1 %v7180_v9, %s5282_s26 }
 0x51e   : > { %4108 = vrot.lane.b32.xlu0 %v7150_v3, %s5276_s23 }
 0x521   : > { %4102 = vrot.lane.b32.xlu1 %v7124_v27, %s5276_s23 }
 0x522   : > { %4112 = vrot.lane.b32.xlu0 %v7174_v14, %s5276_s23 }
 0x525   : > { %4106 = vrot.lane.b32.xlu1 %v7132_v59, %s5276_s23 }
 0x526   : > { %3872 = vrot.lane.b32.xlu0 %v7198_v19, %s5275_s28  ;;  %s4586_s28 = sshll.u32 %s7787_s10, 3 }
 0x529   : > { %4110 = vrot.lane.b32.xlu1 %v7172_v22, %s5276_s23 }
 0x52a   : > { %4226 = vrot.lane.b32.xlu0 %v7126_v52, %s5279_s14 }
 0x52d   : > { %4114 = vrot.lane.b32.xlu1 %v7180_v9, %s5276_s23 }
 0x52e   : > { %3994 = vrot.lane.b32.xlu0 %v7198_v19, %s5282_s26 }
 0x531   : > { %4224 = vrot.lane.b32.xlu1 %v7124_v27, %s5279_s14 }
 0x532   : > { %4230 = vrot.lane.b32.xlu0 %v7150_v3, %s5279_s14 }
 0x533   : > { %v3355_v42 = vpop.permute.xlu1 %3354 }
 0x534   : > { %v3861_v18 = vpop.permute.xlu0 %3860 }
 0x535   : > { %4228 = vrot.lane.b32.xlu1 %v7132_v59, %s5279_s14 }
 0x536   : > { %4116 = vrot.lane.b32.xlu0 %v7198_v19, %s5276_s23 }
 0x537   : > { %v3309_v30 = vpop.permute.xlu1 %3308 }
 0x538   : > { %v3357_v58 = vpop.permute.xlu0 %3356 }
 0x539   : > { %4232 = vrot.lane.b32.xlu1 %v7172_v22, %s5279_s14 }
 0x53a   : > { %4234 = vrot.lane.b32.xlu0 %v7174_v14, %s5279_s14 }
 0x53b   : > { %v7264_v24 = vpop.permute.xlu1 %3548 }
 0x53c   : > { %v3311_v41 = vpop.permute.xlu0 %3310 }
 0x53d   : > { %4236 = vrot.lane.b32.xlu1 %v7180_v9, %s5279_s14 }
 0x53e   : > { %4238 = vrot.lane.b32.xlu0 %v7198_v19, %s5279_s14  ;;  %s417_s14 = scalar_lea.vmem %s7543_s9, %s4586_s28 }
 0x53f   : > { %v7273_v5 = vpop.permute.xlu1 %3670 }
 0x540   : > { %v7275_v60 = vpop.permute.xlu0 %3550 }
 0x541   : > { %4347 = vperm.xlu1 %5004, %v4344_v23  }
 0x543   : > { %v3859_v12 = vpop.permute.xlu1 %3858 }
 0x544   : > { %v7278_v45 = vsel %vm7741_vm8, %v3859_v12, %v3861_v18  ;;  %v7281_v8 = vsel %vm7742_vm6, %v3861_v18, %v3859_v12  ;;  %v7283_v61 = vpop.permute.xlu0 %3672  ;;  %vm7756_vm6 = vmmov %vm7749_vm4 }
 0x547   : > { %v3343_v44 = vpop.permute.xlu1 %3342 }
 0x548   : > { %v3362_v40 = vsel %vm607_vm0, %v3355_v42, %v3343_v44  ;;  %v3374_v62 = vsel %vm607_vm0, %v3343_v44, %v3355_v42  ;;  %v3345_v51 = vpop.permute.xlu0 %3344 }
 0x549   : > { %v3378_v56 = vmul.f32 %v3374_v62, %v6336_v37  ;;  %v3379_v32 = vmul.f32 %v3362_v40, %v6339_v34  ;;  %v3363_v47 = vsel %vm607_vm0, %v3357_v58, %v3345_v51  ;;  %v3375_v28 = vsel %vm607_vm0, %v3345_v51, %v3357_v58 }
 0x54a   : > { %v3380_v0 = vmul.f32 %v3375_v28, %v6336_v37  ;;  %v3381_v10 = vmul.f32 %v3363_v47, %v6339_v34 }
 0x54b   : > { %v3293_v35 = vpop.permute.xlu1 %3292 }
 0x54c   : > { %v4743_v48 = vpack.c.bf16 %v3380_v0, %v3378_v56  ;;  %v3295_v25 = vpop.permute.xlu0 %3294  ;;  %v4741_v6 = vpack.c.bf16 %v3381_v10, %v3379_v32  ;;  %v3316_v56 = vsel %vm582_vm14, %v3309_v30, %v3293_v35  ;;  %v3328_v28 = vsel %vm582_vm14, %v3293_v35, %v3309_v30 }
 0x54d   : > { %v3317_v32 = vsel %vm582_vm14, %v3311_v41, %v3295_v25  ;;  %v3329_v0 = vsel %vm582_vm14, %v3295_v25, %v3311_v41  ;;  %v3333_v46 = vmul.f32 %v3316_v56, %v6286_v20  ;;  %v3332_v35 = vmul.f32 %v3328_v28, %v6289_v33 }
 0x54e   : > { %4742 = vmatprep.subr.bf16.mxu0 %v4741_v6  ;;  %v3335_v7 = vmul.f32 %v3317_v32, %v6286_v20  ;;  %v3334_v25 = vmul.f32 %v3329_v0, %v6289_v33 }
 0x54f   : > { %v3537_v11 = vpop.permute.xlu1 %3536  ;;  %4744 = vmatpush1.bf16.msra.mxu0 %v4743_v48 }
 0x550   : > { %v3539_v39 = vpop.permute.xlu0 %3538 }
 0x553   : > { %v7293_v38 = vpop.permute.xlu1 %3658 }
 0x554   : > { %v3690_v26 = vsel %vm7743_vm10, %v7293_v38, %v7273_v5  ;;  %v7298_v15 = vpop.permute.xlu0 %3660  ;;  %vm7757_vm10 = vmmov %vm7751_vm5 }
 0x555   : > { %v7301_v57 = vmul.f32 %v3690_v26, %v6625_v49  ;;  %v3691_v43 = vsel %vm7744_vm7, %v7298_v15, %v7283_v61 }
 0x556   : > { %v7307_v21 = vmul.f32 %v3691_v43, %v6625_v49 }
 0x557   : > { %v7309_v53 = vpop.permute.xlu1 %3862 }
 0x558   : > { %v7313_v54 = vpop.permute.xlu0 %3864 }
 0x55b   : > { %v3359_v2 = vpop.permute.xlu1 %3358 }
 0x55c   : > { %v7315_v42 = vpop.permute.xlu0 %3868 }
 0x55f   : > { %v3313_v18 = vpop.permute.xlu1 %3312 }
 0x560   : > { %v3361_v58 = vpop.permute.xlu0 %3360 }
 0x563   : > { %v7317_v23 = vpop.permute.xlu1 %3552 }
 0x564   : > { %v3315_v12 = vpop.permute.xlu0 %3314 }
 0x567   : > { %v7319_v44 = vpop.permute.xlu1 %3674 }
 0x568   : > { %v7321_v40 = vpop.permute.xlu0 %3554 }
 0x56b   : > { %v7323_v62 = vpop.permute.xlu1 %3866 }
 0x56c   : > { %v7325_v51 = vpop.permute.xlu0 %3676 }
 0x56f   : > { %v3347_v47 = vpop.permute.xlu1 %3346 }
 0x570   : > { %v3364_v10 = vsel %vm607_vm0, %v3359_v2, %v3347_v47  ;;  %v3376_v48 = vsel %vm607_vm0, %v3347_v47, %v3359_v2  ;;  %v3349_v6 = vpop.permute.xlu0 %3348 }
 0x571   : > { %v3382_v26 = vmul.f32 %v3376_v48, %v6336_v37  ;;  %v3383_v43 = vmul.f32 %v3364_v10, %v6339_v34  ;;  %v3365_v17 = vsel %vm607_vm0, %v3361_v58, %v3349_v6  ;;  %v3377_v16 = vsel %vm607_vm0, %v3349_v6, %v3361_v58 }
 0x572   : > { %v3384_v30 = vmul.f32 %v3377_v16, %v6336_v37  ;;  %v3385_v41 = vmul.f32 %v3365_v17, %v6339_v34  ;;  %v4749_v58 = vpack.c.bf16 %v3335_v7, %v3333_v46  ;;  %v4751_v6 = vpack.c.bf16 %v3334_v25, %v3332_v35  ;;  %v3341_v16 = vld [vmem:[#allocation9 + $0x4] sm:$0xf] }
 0x573   : > { %v7343_v2 = vpop.permute.xlu1 %3980  ;;  %vm7745_vm0 = vcmask 121856  }
 0x574   : > { %v4747_v47 = vpack.c.bf16 %v3384_v30, %v3382_v26  ;;  %v7345_v10 = vpop.permute.xlu0 %3982  ;;  %v4745_v48 = vpack.c.bf16 %v3385_v41, %v3383_v43  ;;  %v3556_v56 = vsel %vm7745_vm0, %v7264_v24, %v3537_v11  ;;  %vm7746_vm11 = vmmov %vm7745_vm0 }
 0x575   : > { %v3557_v37 = vsel %vm7746_vm11, %v7275_v60, %v3539_v39  ;;  %vm7747_vm13 = vmmov %vm7745_vm0  ;;  %v3573_v41 = vmul.f32 %v3556_v56, %v6538_v4 }
 0x576   : > { %4746 = vmatprep.subr.bf16.mxu0 %v4745_v48  ;;  %v3568_v17 = vsel %vm7747_vm13, %v3537_v11, %v7264_v24  ;;  %vm7748_vm3 = vmmov %vm7745_vm0  ;;  %v3575_v24 = vmul.f32 %v3557_v37, %v6538_v4  ;;  %v3287_v37 = vld [vmem:[#allocation9] sm:$0xf] }
 0x577   : > { %v3297_v34 = vpop.permute.xlu1 %3296  ;;  %4748 = vmatpush1.bf16.msra.mxu0 %v4747_v47  ;;  %v3569_v32 = vsel %vm7748_vm3, %v3539_v39, %v7275_v60  ;;  %vm7752_vm9 = vmmov %vm7745_vm0  ;;  %vm7763_vm3 = vcmask 1039360  }
 0x578   : > { %v3318_v28 = vsel %vm582_vm14, %v3313_v18, %v3297_v34  ;;  %v3330_v7 = vsel %vm582_vm14, %v3297_v34, %v3313_v18  ;;  %4750 = vmatprep.subr.bf16.mxu0 %v4749_v58  ;;  %v3299_v46 = vpop.permute.xlu0 %3298  ;;  %v3572_v18 = vmul.f32 %v3568_v17, %v6551_v13  ;;  %v3574_v35 = vmul.f32 %v3569_v32, %v6551_v13  ;;  %vm7753_vm12 = vmmov %vm7745_vm0 }
 0x579   : > { %v3336_v0 = vmul.f32 %v3330_v7, %v6289_v33  ;;  %v3337_v26 = vmul.f32 %v3318_v28, %v6286_v20  ;;  %v3319_v43 = vsel %vm582_vm14, %v3315_v12, %v3299_v46  ;;  %v3331_v30 = vsel %vm582_vm14, %v3299_v46, %v3315_v12  ;;  %vm7750_vm14 = vmmov %vm7744_vm7 }
 0x57a   : > { %v3338_v60 = vmul.f32 %v3331_v30, %v6289_v33  ;;  %v3339_v11 = vmul.f32 %v3319_v43, %v6286_v20  ;;  %4573 = vmatmul.mubr.msk.f32.vlgmr.msra.gmra.mrb[30].mxu0 %vm7749_vm4, %v3341_v16  ;;  %v3678_v33 = vsel %vm7750_vm14, %v7273_v5, %v7293_v38  ;;  %v3679_v20 = vsel %vm7751_vm5, %v7283_v61, %v7298_v15  ;;  %vm7754_vm2 = vmmov %vm7745_vm0  ;;  %v3535_v30 = vld [vmem:[#allocation9 + $0x8] sm:$0xf] }
 0x57b   : > { %v3541_v39 = vpop.permute.xlu1 %3540  ;;  %4752 = vmatpush1.bf16.msra.mxu0 %v4751_v6  ;;  %3527 = vmatprep.mubr.f32.mxu0 %v7611_v1  ;;  %v4757_v48 = vpack.c.bf16 %v3575_v24, %v3573_v41  ;;  %v4759_v34 = vpack.c.bf16 %v3574_v35, %v3572_v18  ;;  %v3695_v5 = vmul.f32 %v3678_v33, %v6612_v36  ;;  %vm7755_vm8 = vmmov %vm7745_vm0 }
 0x57c   : > { %v4755_v25 = vpack.c.bf16 %v3338_v60, %v3336_v0  ;;  %v7369_v12 = vpop.permute.xlu0 %3986  ;;  %v4753_v47 = vpack.c.bf16 %v3339_v11, %v3337_v26  ;;  %v3558_v58 = vsel %vm7752_vm9, %v7317_v23, %v3541_v39  ;;  %v3570_v6 = vsel %vm7753_vm12, %v3541_v39, %v7317_v23  ;;  %vm7758_vm7 = vmmov %vm7751_vm5 }
 0x57d   : > { %v3697_v38 = vmul.f32 %v3679_v20, %v6612_v36  ;;  %v3576_v17 = vmul.f32 %v3570_v6, %v6551_v13  ;;  %v3577_v23 = vmul.f32 %v3558_v58, %v6538_v4  ;;  %vm7759_vm0 = vmmov %vm7751_vm5  ;;  %v4773_v20 = vpack.c.bf16 %v7150_v3, %v7126_v52 }
 0x57e   : > { %4754 = vmatprep.subr.bf16.mxu0 %v4753_v47  ;;  %vm7760_vm11 = vmmov %vm7759_vm0  ;;  %v4775_v58 = vpack.c.bf16 %v7132_v59, %v7124_v27  ;;  %v4777_v52 = vpack.c.bf16 %v7198_v19, %v7174_v14  ;;  %v4779_v59 = vpack.c.bf16 %v7180_v9, %v7172_v22  ;;  %v3894_v14 = vmul.f32 %v7278_v45, %v6782_v29 }
 0x57f   : > { %v3663_v56 = vpop.permute.xlu1 %3662  ;;  %4756 = vmatpush1.bf16.msra.mxu0 %v4755_v25  ;;  %vm7761_vm13 = vmmov %vm7749_vm4  ;;  %v7762_v25 = vpack.c.bf16 %v7307_v21, %v7301_v57  ;;  %v4012_v22 = vsel %vm806_vm1, %v7345_v10, %v7343_v2 }
 0x580   : > { %4758 = vmatprep.subr.bf16.mxu0 %v4757_v48  ;;  %v3543_v16 = vpop.permute.xlu0 %3542  ;;  %v3680_v43 = vsel %vm7757_vm10, %v7319_v44, %v3663_v56  ;;  %v3657_v48 = vld [vmem:[#allocation9 + $0xc] sm:$0xf]  ;;  %vm7764_vm4 = vmmov %vm7763_vm3 }
 0x581   : > { %v3559_v61 = vsel %vm7754_vm2, %v7321_v40, %v3543_v16  ;;  %v3571_v15 = vsel %vm7755_vm8, %v3543_v16, %v7321_v40  ;;  %v4765_v40 = vpack.c.bf16 %v3697_v38, %v3695_v5  ;;  %v3699_v39 = vmul.f32 %v3680_v43, %v6612_v36  ;;  %vm7765_vm14 = vmmov %vm7756_vm6  ;;  %v3779_v16 = vld [vmem:[#allocation9 + $0x10] sm:$0xf] }
 0x582   : > { %v3578_v32 = vmul.f32 %v3571_v15, %v6551_v13  ;;  %v3579_v28 = vmul.f32 %v3559_v61, %v6538_v4  ;;  %4574 = vmatmul.mubr.msk.f32.vlgmr.msra.gmra.mrb[30].mxu0 %vm7756_vm6, %v3287_v37  ;;  %v3692_v13 = vsel %vm7758_vm7, %v3663_v56, %v7319_v44  ;;  %v3875_v21 = vsel %vm7764_vm4, %v7309_v53, %v7313_v54  ;;  %vm7766_vm5 = vmmov %vm7763_vm3 }
 0x583   : > { %v7392_v7 = vpop.permute.xlu1 %3870  ;;  %4760 = vmatpush1.bf16.msra.mxu0 %v4759_v34  ;;  %3647 = vmatprep.mubr.f32.mxu0 %v7611_v1  ;;  %v3698_v11 = vmul.f32 %v3692_v13, %v6625_v49  ;;  %v3895_v56 = vmul.f32 %v7281_v8, %v6765_v31  ;;  %v3896_v37 = vmul.f32 %v3875_v21, %v6782_v29  ;;  %vm7767_vm9 = vmmov %vm7763_vm3 }
 0x584   : > { %v4763_v46 = vpack.c.bf16 %v3578_v32, %v3576_v17  ;;  %v7395_v0 = vpop.permute.xlu0 %3990  ;;  %v4761_v26 = vpack.c.bf16 %v3579_v28, %v3577_v23  ;;  %v3876_v27 = vsel %vm7766_vm5, %v7323_v62, %v7315_v42  ;;  %v3892_v8 = vsel %vm7767_vm9, %v7315_v42, %v7323_v62  ;;  %vm7768_vm12 = vmmov %vm7763_vm3 }
 0x585   : > { %v4783_v5 = vpack.c.bf16 %v3896_v37, %v3894_v14  ;;  %v3898_v38 = vmul.f32 %v3876_v27, %v6782_v29  ;;  %vm7769_vm2 = vmmov %vm7763_vm3  ;;  %v3899_v62 = vmul.f32 %v3892_v8, %v6765_v31  ;;  %v4017_v28 = vmul.f32 %v4012_v22, %v6841_v55 }
 0x586   : > { %4762 = vmatprep.subr.bf16.mxu0 %v4761_v26  ;;  %vm7770_vm8 = vmmov %vm7756_vm6  ;;  %vm7771_vm6 = vcmask 916480  }
 0x587   : > { %v3985_v4 = vpop.permute.xlu1 %3984  ;;  %4764 = vmatpush1.bf16.msra.mxu0 %v4763_v46  ;;  %vm7772_vm10 = vmmov %vm7771_vm6 }
 0x588   : > { %4766 = vmatprep.subr.bf16.mxu0 %v4765_v40  ;;  %v3665_v41 = vpop.permute.xlu0 %3664  ;;  %v3997_v9 = vsel %vm806_vm1, %v3985_v4, %v7369_v12  ;;  %vm7773_vm7 = vmmov %vm7771_vm6 }
 0x589   : > { %v3681_v24 = vsel %vm7759_vm0, %v7325_v51, %v3665_v41  ;;  %v3693_v60 = vsel %vm7760_vm11, %v3665_v41, %v7325_v51  ;;  %vm7774_vm0 = vmmov %vm7770_vm8 }
 0x58a   : > { %v3700_v18 = vmul.f32 %v3693_v60, %v6625_v49  ;;  %v3701_v35 = vmul.f32 %v3681_v24, %v6612_v36  ;;  %4575 = vmatmul.mubr.msk.f32.vlgmr.msra.gmra.mrb[30].mxu0 %vm7761_vm13, %v3535_v30  ;;  %v3891_v36 = vsel %vm7763_vm3, %v7313_v54, %v7309_v53  ;;  %v4013_v54 = vsel %vm806_vm1, %v7369_v12, %v3985_v4  ;;  %v3857_v4 = vld [vmem:[#allocation9 + $0x14] sm:$0xf]  ;;  %vm7775_vm11 = vmmov %vm7771_vm6 }
 0x58b   : > { %v3989_v44 = vpop.permute.xlu1 %3988  ;;  %4768 = vmatpush1.bf16.msra.mxu0 %v7762_v25  ;;  %3769 = vmatprep.mubr.f32.mxu0 %v7611_v1  ;;  %v3897_v6 = vmul.f32 %v3891_v36, %v6765_v31  ;;  %v4019_v15 = vmul.f32 %v4013_v54, %v6841_v55  ;;  %v3996_v12 = vsel %vm806_vm1, %v7343_v2, %v7345_v10  ;;  %v7776_v36 = vld [vmem:[#allocation27_spill] sm:$0xff]  ;;  %v7781_v54 = vld [vmem:[#allocation20_spill] sm:$0xff]  ;;  %vm7784_vm5 = vmmov %vm7774_vm0 }
 0x58c   : > { %v4771_v47 = vpack.c.bf16 %v3700_v18, %v3698_v11  ;;  %v7414_v33 = vpop.permute.xlu0 %4104  ;;  %v4769_v51 = vpack.c.bf16 %v3701_v35, %v3699_v39  ;;  %v4014_v2 = vsel %vm806_vm1, %v7395_v0, %v3989_v44  ;;  %vm7785_vm9 = vmmov %vm7774_vm0 }
 0x58d   : > { %v4781_v19 = vpack.c.bf16 %v3897_v6, %v3895_v56  ;;  %v4789_v43 = vpack.c.bf16 %v4019_v15, %v4017_v28  ;;  %v4021_v18 = vmul.f32 %v4014_v2, %v6841_v55  ;;  %v4101_v28 = vld [vmem:[#allocation9 + $0x1c] sm:$0xf] }
 0x58e   : > { %4770 = vmatprep.subr.bf16.mxu0 %v4769_v51 }
 0x58f   : > { %v7421_v49 = vpop.permute.xlu1 %3992  ;;  %4772 = vmatpush1.bf16.msra.mxu0 %v4771_v47 }
 0x590   : > { %4774 = vmatprep.subr.bf16.mxu0 %v4773_v20  ;;  %v4109_v57 = vpop.permute.xlu0 %4108 }
 0x592   : > { %4576 = vmatmul.mubr.msk.f32.vlgmr.msra.gmra.mrb[30].mxu0 %vm7765_vm14, %v3657_v48  ;;  %vm7782_vm14 = vmmov %vm7774_vm0 }
 0x593   : > { %v4103_v3 = vpop.permute.xlu1 %4102  ;;  %4776 = vmatpush1.bf16.msra.mxu0 %v4775_v58  ;;  %3847 = vmatprep.mubr.f32.mxu0 %v7611_v1 }
 0x594   : > { %4778 = vmatprep.subr.bf16.mxu0 %v4777_v52  ;;  %v7436_v53 = vpop.permute.xlu0 %4112  ;;  %v4134_v60 = vsel %vm7772_vm10, %v7414_v33, %v4103_v3  ;;  %v4118_v47 = vsel %vm7775_vm11, %v4103_v3, %v7414_v33  ;;  %v3979_v52 = vld [vmem:[#allocation9 + $0x18] sm:$0xf] }
 0x595   : > { %v4139_v20 = vmul.f32 %v4134_v60, %v6945_v63 }
 0x597   : > { %v4107_v34 = vpop.permute.xlu1 %4106  ;;  %4780 = vmatpush1.bf16.msra.mxu0 %v4779_v59 }
 0x598   : > { %4782 = vmatprep.subr.bf16.mxu0 %v4781_v19  ;;  %v3873_v61 = vpop.permute.xlu0 %3872  ;;  %v4135_v10 = vsel %vm7771_vm6, %v4109_v57, %v4107_v34  ;;  %v4119_v11 = vsel %vm7773_vm7, %v4107_v34, %v4109_v57 }
 0x599   : > { %v3877_v45 = vsel %vm7768_vm12, %v7392_v7, %v3873_v61  ;;  %v3893_v42 = vsel %vm7769_vm2, %v3873_v61, %v7392_v7  ;;  %v4018_v7 = vmul.f32 %v3997_v9, %v6874_v50  ;;  %v4141_v35 = vmul.f32 %v4135_v10, %v6945_v63 }
 0x59a   : > { %v3900_v17 = vmul.f32 %v3877_v45, %v6782_v29  ;;  %v3901_v23 = vmul.f32 %v3893_v42, %v6765_v31  ;;  %4577 = vmatmul.mubr.msk.f32.vlgmr.msra.gmra.mrb[30].mxu0 %vm7770_vm8, %v3779_v16  ;;  %v3998_v31 = vsel %vm806_vm1, %v3989_v44, %v7395_v0  ;;  %v4016_v29 = vmul.f32 %v3996_v12, %v6874_v50 }
 0x59b   : > { %v4111_v32 = vpop.permute.xlu1 %4110  ;;  %4784 = vmatpush1.bf16.msra.mxu0 %v4783_v5  ;;  %3969 = vmatprep.mubr.f32.mxu0 %v7611_v1  ;;  %v4020_v41 = vmul.f32 %v3998_v31, %v6874_v50  ;;  %v4797_v33 = vpack.c.bf16 %v4141_v35, %v4139_v20 }
 0x59c   : > { %v4787_v46 = vpack.c.bf16 %v3900_v17, %v3898_v38  ;;  %v4227_v26 = vpop.permute.xlu0 %4226  ;;  %v4785_v40 = vpack.c.bf16 %v3901_v23, %v3899_v62  ;;  %v4791_v30 = vpack.c.bf16 %v4018_v7, %v4016_v29  ;;  %v7783_v62 = vld [vmem:[#allocation26_spill] sm:$0xff] }
 0x59e   : > { %4786 = vmatprep.subr.bf16.mxu0 %v4785_v40 }
 0x59f   : > { %v4115_v13 = vpop.permute.xlu1 %4114  ;;  %4788 = vmatpush1.bf16.msra.mxu0 %v4787_v46 }
 0x5a0   : > { %4790 = vmatprep.subr.bf16.mxu0 %v4789_v43  ;;  %v3995_v24 = vpop.permute.xlu0 %3994 }
 0x5a1   : > { %v3999_v39 = vsel %vm806_vm1, %v7421_v49, %v3995_v24  ;;  %v4015_v0 = vsel %vm806_vm1, %v3995_v24, %v7421_v49  ;;  %v4140_v49 = vmul.f32 %v4119_v11, %v7776_v36  ;;  %vm7777_vm1 = vmmov %vm7771_vm6 }
 0x5a2   : > { %v4022_v44 = vmul.f32 %v3999_v39, %v6874_v50  ;;  %v4023_v25 = vmul.f32 %v4015_v0, %v6841_v55  ;;  %4578 = vmatmul.mubr.msk.f32.vlgmr.msra.gmra.mrb[30].mxu0 %vm7774_vm0, %v3857_v4  ;;  %v4120_v50 = vsel %vm7777_vm1, %v4111_v32, %v7436_v53  ;;  %v4138_v55 = vmul.f32 %v4118_v47, %v7776_v36  ;;  %vm7778_vm13 = vmmov %vm7777_vm1  ;;  %v4223_v4 = vld [vmem:[#allocation9 + $0x20] sm:$0xf] }
 0x5a3   : > { %v4225_v51 = vpop.permute.xlu1 %4224  ;;  %4792 = vmatpush1.bf16.msra.mxu0 %v4791_v30  ;;  %4091 = vmatprep.mubr.f32.mxu0 %v7611_v1  ;;  %v4136_v58 = vsel %vm7778_vm13, %v7436_v53, %v4111_v32  ;;  %v4142_v56 = vmul.f32 %v4120_v50, %v7776_v36  ;;  %vm7779_vm3 = vmmov %vm7777_vm1 }
 0x5a4   : > { %v4795_v48 = vpack.c.bf16 %v4022_v44, %v4020_v41  ;;  %v4231_v57 = vpop.permute.xlu0 %4230  ;;  %v4793_v21 = vpack.c.bf16 %v4023_v25, %v4021_v18  ;;  %v4799_v3 = vpack.c.bf16 %v4140_v49, %v4138_v55  ;;  %v4143_v59 = vmul.f32 %v4136_v58, %v6945_v63  ;;  %vm7780_vm4 = vmmov %vm7777_vm1 }
 0x5a5   : > { %v4256_v14 = vsel %vm856_vm15, %v4227_v26, %v4225_v51  ;;  %v4240_v61 = vsel %vm856_vm15, %v4225_v51, %v4227_v26 }
 0x5a6   : > { %4794 = vmatprep.subr.bf16.mxu0 %v4793_v21  ;;  %v4261_v22 = vmul.f32 %v4256_v14, %v7781_v54  ;;  %v4260_v23 = vmul.f32 %v4240_v61, %v7783_v62 }
 0x5a7   : > { %v4229_v6 = vpop.permute.xlu1 %4228  ;;  %4796 = vmatpush1.bf16.msra.mxu0 %v4795_v48 }
 0x5a8   : > { %v4257_v37 = vsel %vm856_vm15, %v4231_v57, %v4229_v6  ;;  %4798 = vmatprep.subr.bf16.mxu0 %v4797_v33  ;;  %v4117_v27 = vpop.permute.xlu0 %4116  ;;  %v4241_v8 = vsel %vm856_vm15, %v4229_v6, %v4231_v57 }
 0x5a9   : > { %v4121_v19 = vsel %vm7779_vm3, %v4115_v13, %v4117_v27  ;;  %v4137_v53 = vsel %vm7780_vm4, %v4117_v27, %v4115_v13  ;;  %v4263_v34 = vmul.f32 %v4257_v37, %v7781_v54  ;;  %v4262_v15 = vmul.f32 %v4241_v8, %v7783_v62 }
 0x5aa   : > { %v4144_v16 = vmul.f32 %v4121_v19, %v7776_v36  ;;  %v4145_v5 = vmul.f32 %v4137_v53, %v6945_v63  ;;  %4579 = vmatmul.mubr.msk.f32.vlgmr.msra.gmra.mrb[30].mxu0 %vm7782_vm14, %v3979_v52 }
 0x5ab   : > { %v4233_v38 = vpop.permute.xlu1 %4232  ;;  %4800 = vmatpush1.bf16.msra.mxu0 %v4799_v3  ;;  %4213 = vmatprep.mubr.f32.mxu0 %v7611_v1  ;;  %v4805_v17 = vpack.c.bf16 %v4263_v34, %v4261_v22  ;;  %v4807_v46 = vpack.c.bf16 %v4262_v15, %v4260_v23 }
 0x5ac   : > { %v4803_v9 = vpack.c.bf16 %v4144_v16, %v4142_v56  ;;  %v4235_v45 = vpop.permute.xlu0 %4234  ;;  %v4801_v42 = vpack.c.bf16 %v4145_v5, %v4143_v59 }
 0x5ad   : > { %v4242_v63 = vsel %vm856_vm15, %v4233_v38, %v4235_v45  ;;  %v4258_v12 = vsel %vm856_vm15, %v4235_v45, %v4233_v38 }
 0x5ae   : > { %4802 = vmatprep.subr.bf16.mxu0 %v4801_v42  ;;  %v4264_v31 = vmul.f32 %v4242_v63, %v7783_v62  ;;  %v4265_v29 = vmul.f32 %v4258_v12, %v7781_v54 }
 0x5af   : > { %v4237_v32 = vpop.permute.xlu1 %4236  ;;  %4804 = vmatpush1.bf16.msra.mxu0 %v4803_v9 }
 0x5b0   : > { %4806 = vmatprep.subr.bf16.mxu0 %v4805_v17  ;;  %v4239_v7 = vpop.permute.xlu0 %4238 }
 0x5b1   : > { %v4243_v26 = vsel %vm856_vm15, %v4237_v32, %v4239_v7  ;;  %v4259_v40 = vsel %vm856_vm15, %v4239_v7, %v4237_v32 }
 0x5b2   : > { %v4266_v43 = vmul.f32 %v4243_v26, %v7783_v62  ;;  %v4267_v2 = vmul.f32 %v4259_v40, %v7781_v54  ;;  %4580 = vmatmul.mubr.msk.f32.vlgmr.msra.gmra.mrb[30].mxu0 %vm7784_vm5, %v4101_v28 }
 0x5b3   : > { %4808 = vmatpush1.bf16.msra.mxu0 %v4807_v46  ;;  %4335 = vmatprep.mubr.f32.mxu0 %v7611_v1 }
 0x5b4   : > { %v4811_v10 = vpack.c.bf16 %v4266_v43, %v4264_v31  ;;  %v4809_v13 = vpack.c.bf16 %v4267_v2, %v4265_v29 }
 0x5b6   : > { %4810 = vmatprep.subr.bf16.mxu0 %v4809_v13 }
 0x5b7   : > { %4812 = vmatpush1.bf16.msra.mxu0 %v4811_v10 }
 0x5ba   : > { %4581 = vmatmul.mubr.msk.f32.vlgmr.msra.gmra.mrb[30].mxu0 %vm7785_vm9, %v4223_v4 }
 0x5c0   : > { %v4348_v30 = vpop.permute.xlu1 %4347 }
 0x68d   : > { %v4337_v41 = vpop.f32.mrb[30].mxu0 }
 0x68e   : > { %v4350_v24 = vadd.f32 %v4348_v30, %v4337_v41  ;;  %v4339_v60 = vpop.f32.mrb[31].mxu0 }
 0x68f   : > { %v4351_v11 = vadd.f32 %v4348_v30, %v4339_v60 }
 0x690   : > { %v4582_v39 = vmul.f32 -1.442695, %v4350_v24 }
 0x691   : > { %v4583_v0 = vmul.f32 -1.442695, %v4351_v11 }
 0x692   : > { %5053 = vpow2.f32 %v4582_v39 }
 0x693   : > { %5055 = vpow2.f32 %v4583_v0 }
 0x69c   : > { %v5054_v18 = vpop.eup %5053 }
 0x69d   : > { %v5056_v35 = vpop.eup %5055  ;;  %v4358_v1 = vadd.f32 1.0, %v5054_v18 }
 0x69e   : > { %v4359_v44 = vadd.f32 1.0, %v5056_v35 }
 0x69f   : > { %5057 = vrcp.f32 %v4358_v1 }
 0x6a0   : > { %5059 = vrcp.f32 %v4359_v44 }
 0x6a9   : > { %v5058_v25 = vpop.eup %5057 }
 0x6aa   : > { %v5060_v47 = vpop.eup %5059 }
 0x6ab   : > { %v4366_v51 = vcombine.low %v5058_v25, %v5060_v47 }
 0x6ad   : > { %4368 = vst [vmem:[%s417_s14] sm:$0xff] %v4366_v51 }
 0x6ae PF: > { %s23_s30 = sadd.s32 1, %s5251_s30  }
 0x6af   : > { %p20_p9 = scmp.ge.s32.totalorder %s23_s30, 4  }
 0x6b1   :  { %22 = sbr.rel (!%p20_p9) target bundleno = 4 (0x4), region = 157 }
 0x6b8   :  { %4390 = vsyncpa [#allocation3], 1 }
 0x6b9   :  { %4392 = vsyncpa [#allocation3 + $0x1], 1 }
 0x6ba   :  { %4393 = vsyncpa [#allocation5], 1 }
 0x6bb   :  { %4394 = vsyncpa [#allocation8], 1 }
 0x6bc   :  { %4395 = vsyncpa [#allocation11], 1 }

</bundles_post_ra>
